<compile_context>
chip_gen: v5e
topology: v5e:2x2
jax: 0.10.0
libtpu: 0.0.40
codegen_flags: <defaults>
</compile_context>

<pallas_src>
import jax
import jax.numpy as jnp
from jax.experimental import pallas as pl
from jax.experimental.pallas import tpu as pltpu

IN_DIM = 3 * 32 * 32   # 3072
H1 = 512
H2 = 256
OUT_DIM = 10
OUT_PAD = 128          # lane-dense padded output width


def _round_up(x, m):
    return ((x + m - 1) // m) * m


def _choose_tb(batch, tb_max):
    """Pick the batch tile.

    * multiple of 8 (sublane granularity);
    * at most ~tb_max rows (amortizes the ~0.35 us per-step overhead without
      blowing VMEM);
    * at least 2 grid steps whenever batch > 8, so the "parallel" batch axis
      can shard across v7x's two TensorCores;
    * TB ~ ceil(batch / n_steps), so ragged-edge waste is < 8 rows per step.
    """
    if batch <= 8:
        return 8
    n_steps = max(2, pl.cdiv(batch, tb_max))
    return _round_up(pl.cdiv(batch, n_steps), 8)


def _vmem_limit_bytes(tb):
    """Scoped-VMEM budget derived from the actual tile footprint."""
    x_bufs = 2 * tb * IN_DIM * 4                            # f32 x tile, double-buffered
    out_bufs = 2 * tb * OUT_PAD * 4                         # f32 out tile, double-buffered
    weights = (IN_DIM * H1 + H1 * H2 + H2 * OUT_PAD) * 2    # bf16, single-buffered
    biases = (H1 + H2 + OUT_PAD) * 4
    live = tb * (IN_DIM * 2 + (H1 + H2) * (4 + 2) + OUT_PAD * 4)  # in-body temporaries
    total = x_bufs + out_bufs + weights + biases + live
    total = int(total * 1.25) + (4 << 20)                   # 25% + 4 MiB headroom
    # Default TB<=1024 lands well under v7x's 64 MiB core; allow up to 100 MiB
    # only if a caller explicitly asks for huge tiles on v5e/v6e (128 MiB VMEM).
    return max(32 << 20, min(total, 100 << 20))


def mlp_kernel(x_ref, w1_ref, b1_ref, w2_ref, b2_ref, w3_ref, b3_ref, o_ref):
    # Cast the f32 input tile to bf16 in-kernel: VPU work hidden under MXU
    # slack, and it avoids a separate wrapper-side cast pass over x in HBM.
    x = x_ref[...].astype(jnp.bfloat16)
    # fc1 + ReLU  (bf16 operands, f32 MXU accumulation).
    h1 = jnp.dot(x, w1_ref[...], preferred_element_type=jnp.float32) + b1_ref[...]
    h1 = jnp.maximum(h1, 0.0).astype(jnp.bfloat16)
    # fc2 + ReLU.
    h2 = jnp.dot(h1, w2_ref[...], preferred_element_type=jnp.float32) + b2_ref[...]
    h2 = jnp.maximum(h2, 0.0).astype(jnp.bfloat16)
    # fc3 (padded to 128 output lanes -> full, unmasked lane-dense store).
    o_ref[...] = jnp.dot(h2, w3_ref[...], preferred_element_type=jnp.float32) + b3_ref[...]


def tt_net_forward(x_nchw, params, tb=1024):
    """x_nchw: (B, 3, 32, 32) float32 -> logits (B, 10) float32."""
    B = x_nchw.shape[0]
    w1, b1, w2, b2, w3p, b3p = params

    # torch's x.view(B, -1); stays f32 (metadata-only reshape, no HBM pass).
    x2d = x_nchw.reshape(B, -1)
    assert x2d.shape[1] == IN_DIM, "TT_Net.fc1 expects 3*32*32 inputs"

    # Only tiny batches (< one 8-row sublane) get padded; everything else is a
    # ragged last block handled by the pl.cdiv grid (no jnp.pad pass over x).
    Bk = B
    if B < 8:
        x2d = jnp.pad(x2d, ((0, 8 - B), (0, 0)))
        Bk = 8

    TB = _choose_tb(Bk, tb)
    grid = (pl.cdiv(Bk, TB),)

    rows = grid[0] * TB
    flops = 2 * rows * (IN_DIM * H1 + H1 * H2 + H2 * OUT_PAD)
    bytes_accessed = (
        Bk * IN_DIM * 4                                   # x tiles (f32, read once)
        + (IN_DIM * H1 + H1 * H2 + H2 * OUT_PAD) * 2      # weights (bf16, fetched once)
        + (H1 + H2 + OUT_PAD) * 4                         # biases (f32)
        + Bk * OUT_PAD * 4                                # output (f32)
    )

    # Weights/biases: constant index_map -> fetched once; single-buffer them.
    resident = dict(pipeline_mode=pl.Buffered(1))

    out = pl.pallas_call(
        mlp_kernel,
        out_shape=jax.ShapeDtypeStruct((Bk, OUT_PAD), jnp.float32),
        grid=grid,
        in_specs=[
            pl.BlockSpec((TB, IN_DIM), lambda i: (i, 0)),               # x (pipelined)
            pl.BlockSpec((IN_DIM, H1), lambda i: (0, 0), **resident),   # w1 (resident)
            pl.BlockSpec((1, H1), lambda i: (0, 0), **resident),        # b1
            pl.BlockSpec((H1, H2), lambda i: (0, 0), **resident),       # w2
            pl.BlockSpec((1, H2), lambda i: (0, 0), **resident),        # b2
            pl.BlockSpec((H2, OUT_PAD), lambda i: (0, 0), **resident),  # w3 (padded)
            pl.BlockSpec((1, OUT_PAD), lambda i: (0, 0), **resident),   # b3 (padded)
        ],
        out_specs=pl.BlockSpec((TB, OUT_PAD), lambda i: (i, 0)),
        compiler_params=pltpu.CompilerParams(
            dimension_semantics=("parallel",),
            vmem_limit_bytes=_vmem_limit_bytes(TB),
        ),
        cost_estimate=pl.CostEstimate(
            flops=flops, transcendentals=0, bytes_accessed=bytes_accessed),
    )(x2d, w1, b1, w2, b2, w3p, b3p)

    return out[:B, :OUT_DIM]


def init_params(key):
    """Mirrors TT_Net.__init__ for the Linear layers (the custom init in the
    PyTorch spec): weight ~ N(0, sqrt(2 / (in_features * out_features))),
    bias = 0.  Weights are stored pre-transposed (in, out) and cast to bf16;
    w3/b3 are zero-padded from 10 -> 128 output lanes."""
    dims = [(IN_DIM, H1), (H1, H2), (H2, OUT_DIM)]
    keys = jax.random.split(key, len(dims))
    ws, bs = [], []
    for k, (fin, fout) in zip(keys, dims):
        std = (2.0 / (fin * fout)) ** 0.5
        w = std * jax.random.normal(k, (fin, fout), dtype=jnp.float32)
        ws.append(w)
        bs.append(jnp.zeros((1, fout), dtype=jnp.float32))

    w1 = ws[0].astype(jnp.bfloat16)
    w2 = ws[1].astype(jnp.bfloat16)
    w3p = jnp.zeros((H2, OUT_PAD), dtype=jnp.float32).at[:, :OUT_DIM].set(ws[2])
    w3p = w3p.astype(jnp.bfloat16)
    b1 = bs[0]
    b2 = bs[1]
    b3p = jnp.zeros((1, OUT_PAD), dtype=jnp.float32).at[:, :OUT_DIM].set(bs[2])
    return (w1, b1, w2, b2, w3p, b3p)


def _reference(x, params):
    """Pure-JAX reference in the same (bf16 operands, f32 accum) precision."""
    w1, b1, w2, b2, w3p, b3p = params
    B = x.shape[0]
    h = x.reshape(B, -1).astype(jnp.bfloat16)
    h = jnp.maximum(
        jnp.dot(h, w1, preferred_element_type=jnp.float32) + b1, 0.0
    ).astype(jnp.bfloat16)
    h = jnp.maximum(
        jnp.dot(h, w2, preferred_element_type=jnp.float32) + b2, 0.0
    ).astype(jnp.bfloat16)
    h = jnp.dot(h, w3p, preferred_element_type=jnp.float32) + b3p
    return h[:, :OUT_DIM]


if __name__ == "__main__":
    key = jax.random.PRNGKey(0)
    kx, kx2, kp = jax.random.split(key, 3)
    params = init_params(kp)

    # Spatial must be 3x32x32 because fc1.in_features = 3*32*32.
    # Case 1: tiny batch (B < 8 -> padded to one sublane, single grid step).
    B1 = 2
    x1 = jax.random.normal(kx, (B1, 3, 32, 32), dtype=jnp.float32)
    out1 = jax.block_until_ready(tt_net_forward(x1, params))
    ref1 = _reference(x1, params)
    assert out1.shape == (B1, OUT_DIM)
    assert jnp.allclose(out1, ref1, atol=1e-3, rtol=1e-2), (
        f"case1 max abs err {jnp.max(jnp.abs(out1 - ref1))}")

    # Case 2: ragged batch (B=12 -> TB=8, 2 grid steps, ragged last block);
    # exercises the resident weights across steps and the pl.cdiv edge handling.
    B2 = 12
    x2 = jax.random.normal(kx2, (B2, 3, 32, 32), dtype=jnp.float32)
    out2 = jax.block_until_ready(tt_net_forward(x2, params))
    ref2 = _reference(x2, params)
    assert out2.shape == (B2, OUT_DIM)
    assert jnp.allclose(out2, ref2, atol=1e-3, rtol=1e-2), (
        f"case2 max abs err {jnp.max(jnp.abs(out2 - ref2))}")

    print("KERNEL_OK")
</pallas_src>

<mosaic_0001>
module attributes {stable_mosaic.version = 11 : i64} {
  func.func @mlp_kernel(%arg0: i32, %arg1: memref<8x3072xf32, #tpu.memory_space<vmem>>, %arg2: memref<3072x512xbf16, #tpu.memory_space<vmem>>, %arg3: memref<1x512xf32, #tpu.memory_space<vmem>>, %arg4: memref<512x256xbf16, #tpu.memory_space<vmem>>, %arg5: memref<1x256xf32, #tpu.memory_space<vmem>>, %arg6: memref<256x128xbf16, #tpu.memory_space<vmem>>, %arg7: memref<1x128xf32, #tpu.memory_space<vmem>>, %arg8: memref<8x128xf32, #tpu.memory_space<vmem>>) attributes {dimension_semantics = [#tpu.dimension_semantics<parallel>], iteration_bounds = array<i64: 1>, scalar_prefetch = 0 : i64, scratch_operands = 0 : i64, tpu.core_type = #tpu.core_type<tc>, window_params = [{transform_indices = @transform_0, window_bounds = array<i64: 8, 3072>}, {pipeline_mode = #tpu.pipeline_mode<synchronous>, transform_indices = @transform_1, window_bounds = array<i64: 3072, 512>}, {pipeline_mode = #tpu.pipeline_mode<synchronous>, transform_indices = @transform_2, window_bounds = array<i64: 1, 512>}, {pipeline_mode = #tpu.pipeline_mode<synchronous>, transform_indices = @transform_3, window_bounds = array<i64: 512, 256>}, {pipeline_mode = #tpu.pipeline_mode<synchronous>, transform_indices = @transform_4, window_bounds = array<i64: 1, 256>}, {pipeline_mode = #tpu.pipeline_mode<synchronous>, transform_indices = @transform_5, window_bounds = array<i64: 256, 128>}, {pipeline_mode = #tpu.pipeline_mode<synchronous>, transform_indices = @transform_6, window_bounds = array<i64: 1, 128>}, {transform_indices = @transform_7, window_bounds = array<i64: 8, 128>}]} {
    %c0 = arith.constant 0 : index
    %c0_0 = arith.constant 0 : index
    %0 = vector.load %arg1[%c0, %c0_0] : memref<8x3072xf32, #tpu.memory_space<vmem>>, vector<8x3072xf32>
    %1 = arith.truncf %0 : vector<8x3072xf32> to vector<8x3072xbf16>
    %c0_1 = arith.constant 0 : index
    %c0_2 = arith.constant 0 : index
    %2 = vector.load %arg2[%c0_1, %c0_2] : memref<3072x512xbf16, #tpu.memory_space<vmem>>, vector<3072x512xbf16>
    %cst = arith.constant dense<0.000000e+00> : vector<8x512xf32>
    %3 = tpu.matmul %1, %2, %cst {dimension_numbers = #tpu.dot_dimension_numbers<[1], [0], [0], [1], [0, 0, 1, 1], [], []>} : vector<8x3072xbf16>, vector<3072x512xbf16>, vector<8x512xf32> -> vector<8x512xf32>
    %c0_3 = arith.constant 0 : index
    %c0_4 = arith.constant 0 : index
    %4 = vector.load %arg3[%c0_3, %c0_4] : memref<1x512xf32, #tpu.memory_space<vmem>>, vector<1x512xf32>
    %5 = vector.broadcast %4 : vector<1x512xf32> to vector<8x512xf32>
    %6 = arith.addf %3, %5 : vector<8x512xf32>
    %cst_5 = arith.constant 0.000000e+00 : f32
    %7 = vector.broadcast %cst_5 : f32 to vector<8x512xf32>
    %8 = arith.maximumf %6, %7 : vector<8x512xf32>
    %9 = arith.truncf %8 : vector<8x512xf32> to vector<8x512xbf16>
    %c0_6 = arith.constant 0 : index
    %c0_7 = arith.constant 0 : index
    %10 = vector.load %arg4[%c0_6, %c0_7] : memref<512x256xbf16, #tpu.memory_space<vmem>>, vector<512x256xbf16>
    %cst_8 = arith.constant dense<0.000000e+00> : vector<8x256xf32>
    %11 = tpu.matmul %9, %10, %cst_8 {dimension_numbers = #tpu.dot_dimension_numbers<[1], [0], [0], [1], [0, 0, 1, 1], [], []>} : vector<8x512xbf16>, vector<512x256xbf16>, vector<8x256xf32> -> vector<8x256xf32>
    %c0_9 = arith.constant 0 : index
    %c0_10 = arith.constant 0 : index
    %12 = vector.load %arg5[%c0_9, %c0_10] : memref<1x256xf32, #tpu.memory_space<vmem>>, vector<1x256xf32>
    %13 = vector.broadcast %12 : vector<1x256xf32> to vector<8x256xf32>
    %14 = arith.addf %11, %13 : vector<8x256xf32>
    %cst_11 = arith.constant 0.000000e+00 : f32
    %15 = vector.broadcast %cst_11 : f32 to vector<8x256xf32>
    %16 = arith.maximumf %14, %15 : vector<8x256xf32>
    %17 = arith.truncf %16 : vector<8x256xf32> to vector<8x256xbf16>
    %c0_12 = arith.constant 0 : index
    %c0_13 = arith.constant 0 : index
    %18 = vector.load %arg6[%c0_12, %c0_13] : memref<256x128xbf16, #tpu.memory_space<vmem>>, vector<256x128xbf16>
    %cst_14 = arith.constant dense<0.000000e+00> : vector<8x128xf32>
    %19 = tpu.matmul %17, %18, %cst_14 {dimension_numbers = #tpu.dot_dimension_numbers<[1], [0], [0], [1], [0, 0, 1, 1], [], []>} : vector<8x256xbf16>, vector<256x128xbf16>, vector<8x128xf32> -> vector<8x128xf32>
    %c0_15 = arith.constant 0 : index
    %c0_16 = arith.constant 0 : index
    %20 = vector.load %arg7[%c0_15, %c0_16] : memref<1x128xf32, #tpu.memory_space<vmem>>, vector<1x128xf32>
    %21 = vector.broadcast %20 : vector<1x128xf32> to vector<8x128xf32>
    %22 = arith.addf %19, %21 : vector<8x128xf32>
    %c0_17 = arith.constant 0 : index
    %c0_18 = arith.constant 0 : index
    %23 = vector.load %arg8[%c0_17, %c0_18] : memref<8x128xf32, #tpu.memory_space<vmem>>, vector<8x128xf32>
    tpu.vector_store %arg8[%c0_17, %c0_18], %22 {strides = array<i32>} : memref<8x128xf32, #tpu.memory_space<vmem>>, vector<8x128xf32>,
    return
  }
  func.func @transform_0(%arg0: i32) -> (i32, i32) {
    %c0_i32 = arith.constant 0 : i32
    %c0_i32_0 = arith.constant 0 : i32
    return %arg0, %c0_i32 : i32, i32
  }
  func.func @transform_1(%arg0: i32) -> (i32, i32) {
    %c0_i32 = arith.constant 0 : i32
    %c0_i32_0 = arith.constant 0 : i32
    %c0_i32_1 = arith.constant 0 : i32
    return %c0_i32, %c0_i32_0 : i32, i32
  }
  func.func @transform_2(%arg0: i32) -> (i32, i32) {
    %c0_i32 = arith.constant 0 : i32
    %c0_i32_0 = arith.constant 0 : i32
    %c0_i32_1 = arith.constant 0 : i32
    return %c0_i32, %c0_i32_0 : i32, i32
  }
  func.func @transform_3(%arg0: i32) -> (i32, i32) {
    %c0_i32 = arith.constant 0 : i32
    %c0_i32_0 = arith.constant 0 : i32
    %c0_i32_1 = arith.constant 0 : i32
    return %c0_i32, %c0_i32_0 : i32, i32
  }
  func.func @transform_4(%arg0: i32) -> (i32, i32) {
    %c0_i32 = arith.constant 0 : i32
    %c0_i32_0 = arith.constant 0 : i32
    %c0_i32_1 = arith.constant 0 : i32
    return %c0_i32, %c0_i32_0 : i32, i32
  }
  func.func @transform_5(%arg0: i32) -> (i32, i32) {
    %c0_i32 = arith.constant 0 : i32
    %c0_i32_0 = arith.constant 0 : i32
    %c0_i32_1 = arith.constant 0 : i32
    return %c0_i32, %c0_i32_0 : i32, i32
  }
  func.func @transform_6(%arg0: i32) -> (i32, i32) {
    %c0_i32 = arith.constant 0 : i32
    %c0_i32_0 = arith.constant 0 : i32
    %c0_i32_1 = arith.constant 0 : i32
    return %c0_i32, %c0_i32_0 : i32, i32
  }
  func.func @transform_7(%arg0: i32) -> (i32, i32) {
    %c0_i32 = arith.constant 0 : i32
    %c0_i32_0 = arith.constant 0 : i32
    return %arg0, %c0_i32 : i32, i32
  }
}

</mosaic_0001>

<bundles_post_ra>
// kernel: tpu_custom_call.1
= control target key start
LH: loop header
LB: loop body
LE: loop exit
PB: predicated region body
PF: predicated region fallthrough
CT: control target
= control target key end

     0   :  { %12 = vsyncpa [#allocation3], 0  ;;  %s11484_s0 = inlined_call_operand.hbm [shape: f32[8,3072], index: 0, kind: input, shape index: {}]   ;;  %s11485_s1 = inlined_call_operand.hbm [shape: bf16[3072,512], index: 1, kind: input, shape index: {}]   ;;  %s11486_s2 = inlined_call_operand.hbm [shape: f32[1,512], index: 2, kind: input, shape index: {}]   ;;  %s11487_s3 = inlined_call_operand.hbm [shape: bf16[512,256], index: 3, kind: input, shape index: {}]   ;;  %s11488_s4 = inlined_call_operand.hbm [shape: f32[1,256], index: 4, kind: input, shape index: {}]   ;;  %s11489_s5 = inlined_call_operand.hbm [shape: bf16[256,128], index: 5, kind: input, shape index: {}]   ;;  %s11490_s6 = inlined_call_operand.hbm [shape: f32[1,128], index: 6, kind: input, shape index: {}]   ;;  %s11491_s7 = inlined_call_operand.hbm [shape: f32[8,128], index: 7, kind: output, shape index: {}]  }
   0x1   :  { %13 = vsyncpa [#allocation6], 0 }
   0x2   :  { %14 = vsyncpa [#allocation9], 0 }
   0x3   :  { %15 = vsyncpa [#allocation12], 0  ;;  %s32_s26 = sshll.u32 %s11485_s1, 4  ;;  %s33_s26 = int_to_ptr.hbm [resolvable:$true] %s32_s26 }
   0x4   :  { %16 = vsyncpa [#allocation4], 0  ;;  %s11187_s27 = smov [#allocation5]   ;;  %s56_s8 = sshll.u32 %s11487_s3, 4  ;;  %s57_s8 = int_to_ptr.hbm [resolvable:$true] %s56_s8 }
   0x5   :  { %s34_s28 = sshll.u32 %s11187_s27, 4  ;;  %s11188_s9 = smov 256   ;;  %s35_s28 = int_to_ptr.vmem [resolvable:$true] %s34_s28 }
   0x6   :  { %s11189_s10 = smov 16   ;;  %s11190_s11 = smov [#allocation8]  }
   0x7   :  { %40 = dma.hbm_to_vmem [thread:$0]  %s33_s26, 98304, %s35_s28, [#allocation6], %s11188_s9, %s11188_s9, %s11189_s10  }
   0x8   :  { %s58_s12 = sshll.u32 %s11190_s11, 4  ;;  %s11191_s13 = smov 128   ;;  %s59_s12 = int_to_ptr.vmem [resolvable:$true] %s58_s12 }
   0x9   :  { %s11192_s14 = smov 8   ;;  %s80_s16 = sshll.u32 %s11489_s5, 4  ;;  %s81_s16 = int_to_ptr.hbm [resolvable:$true] %s80_s16 }
   0xa   :  { %64 = dma.hbm_to_vmem [thread:$0]  %s57_s8, 8192, %s59_s12, [#allocation9], %s11191_s13, %s11191_s13, %s11192_s14  }
   0xb   :  { %s11193_s17 = smov [#allocation11]   ;;  %s22_s20 = sshll.u32 %s11484_s0, 4  ;;  %s23_s20 = int_to_ptr.hbm [resolvable:$true] %s22_s20 }
   0xc   :  { %s82_s18 = sshll.u32 %s11193_s17, 4  ;;  %s11194_s21 = smov 64   ;;  %s83_s18 = int_to_ptr.vmem [resolvable:$true] %s82_s18 }
   0xd   :  { %s11195_s22 = smov 4   ;;  %s11196_s23 = smov [#allocation2]  }
   0xe   :  { %88 = dma.hbm_to_vmem [thread:$0]  %s81_s16, 2048, %s83_s18, [#allocation12], %s11194_s21, %s11194_s21, %s11195_s22  }
   0xf   :  { %s24_s24 = sshll.u32 %s11196_s23, 4  ;;  %s46_s27 = sshll.u32 %s11486_s2, 4  ;;  %s25_s24 = int_to_ptr.vmem [resolvable:$true] %s24_s24  ;;  %s47_s27 = int_to_ptr.hbm [resolvable:$true] %s46_s27 }
  0x10   :  { %27 = dma.hbm_to_vmem [thread:$0]  %s23_s20, 3072, %s25_s24, [#allocation3]  }
  0x11   :  { %s70_s29 = sshll.u32 %s11488_s4, 4  ;;  %s11197_s30 = smov [#allocation7]   ;;  %s71_s29 = int_to_ptr.hbm [resolvable:$true] %s70_s29 }
  0x12   :  { %s48_s8 = sshll.u32 %s11197_s30, 4  ;;  %s11198_s0 = smov [#allocation10]   ;;  %s49_s8 = int_to_ptr.vmem [resolvable:$true] %s48_s8 }
  0x13   :  { %51 = dma.hbm_to_vmem [thread:$0]  %s47_s27, 64, %s49_s8, [#allocation6]  }
  0x14   :  { %s72_s9 = sshll.u32 %s11198_s0, 4  ;;  %s94_s12 = sshll.u32 %s11490_s6, 4  ;;  %s73_s9 = int_to_ptr.vmem [resolvable:$true] %s72_s9  ;;  %s95_s12 = int_to_ptr.hbm [resolvable:$true] %s94_s12 }
  0x15   :  { %75 = dma.hbm_to_vmem [thread:$0]  %s71_s29, 32, %s73_s9, [#allocation9]  }
  0x16   :  { %s11199_s2 = smov [#allocation13]  }
  0x17   :  { %s96_s13 = sshll.u32 %s11199_s2, 4  ;;  %s97_s13 = int_to_ptr.vmem [resolvable:$true] %s96_s13 }
  0x18   :  { %99 = dma.hbm_to_vmem [thread:$0]  %s95_s12, 16, %s97_s13, [#allocation12]  }
  0x19   :  { %11177 = dma.done.wait [#allocation3], 3072  }
  0x1a   :  { %11178 = vsyncadd [#allocation3], 4294964224 }
  0x1b   :  { %11179 = dma.done.wait [#allocation6], 98368  }
  0x1c   :  { %11180 = vsyncadd [#allocation6], 4294868928 }
  0x1d   :  { %11181 = dma.done.wait [#allocation9], 8224  }
  0x1e   :  { %11182 = vsyncadd [#allocation9], 4294959072 }
  0x1f   :  { %11183 = dma.done.wait [#allocation12], 2064  }
  0x20   :  { %11184 = vsyncadd [#allocation12], 4294965232  ;;  %v6841_v0 = vld [vmem:[#allocation5 + $0xe0] sm:$0xf]  ;;  %v10149_v1 = vld [vmem:[#allocation5 + $0xec] sm:$0xf0] }
  0x21   :  { %v6969_v2 = vld [vmem:[#allocation5 + $0x1e0] sm:$0xf]  ;;  %v6842_v3 = vor.u32 %v10149_v1, %v6841_v0  ;;  %v10181_v4 = vld [vmem:[#allocation5 + $0x1ec] sm:$0xf0]  ;;  %s11200_s4 = smov [#allocation14]   ;;  %s6714_s15 = sshll.u32 %s11491_s7, 4  ;;  %s6715_s15 = int_to_ptr.hbm [resolvable:$true] %s6714_s15 }
  0x22   :  { %v7097_v5 = vld [vmem:[#allocation5 + $0x2e0] sm:$0xf]  ;;  %v10213_v6 = vld [vmem:[#allocation5 + $0x2ec] sm:$0xf0]  ;;  %v6970_v7 = vor.u32 %v10181_v4, %v6969_v2  ;;  %s6712_s6 = sshll.u32 %s11200_s4, 4  ;;  %s6713_s6 = int_to_ptr.vmem [resolvable:$true] %s6712_s6 }
  0x23   :  { %v7098_v8 = vor.u32 %v10213_v6, %v7097_v5  ;;  %v7225_v9 = vld [vmem:[#allocation5 + $0x3e0] sm:$0xf]  ;;  %v10245_v10 = vld [vmem:[#allocation5 + $0x3ec] sm:$0xf0]  ;;  %4794 = vmatpush.bf16.msra.mxu0 %v6842_v3 }
  0x24   :  { %v6825_v11 = vld [vmem:[#allocation5 + $0xc0] sm:$0xf]  ;;  %v7226_v12 = vor.u32 %v10245_v10, %v7225_v9  ;;  %v10145_v13 = vld [vmem:[#allocation5 + $0xcc] sm:$0xf0]  ;;  %4807 = vmatpush.bf16.msra.mxu1 %v6970_v7 }
  0x25   :  { %v6953_v14 = vld [vmem:[#allocation5 + $0x1c0] sm:$0xf]  ;;  %v10177_v15 = vld [vmem:[#allocation5 + $0x1cc] sm:$0xf0]  ;;  %4820 = vmatpush.bf16.msra.mxu2 %v7098_v8  ;;  %v6826_v16 = vor.u32 %v10145_v13, %v6825_v11 }
  0x26   :  { %v6954_v17 = vor.u32 %v10177_v15, %v6953_v14  ;;  %v7081_v18 = vld [vmem:[#allocation5 + $0x2c0] sm:$0xf]  ;;  %v10209_v19 = vld [vmem:[#allocation5 + $0x2cc] sm:$0xf0]  ;;  %4833 = vmatpush.bf16.msra.mxu3 %v7226_v12 }
  0x27   :  { %v7209_v20 = vld [vmem:[#allocation5 + $0x3c0] sm:$0xf]  ;;  %v7082_v21 = vor.u32 %v10209_v19, %v7081_v18  ;;  %v10241_v22 = vld [vmem:[#allocation5 + $0x3cc] sm:$0xf0]  ;;  %4795 = vmatpush.bf16.msra.mxu0 %v6826_v16 }
  0x28   :  { %v6809_v23 = vld [vmem:[#allocation5 + $0xa0] sm:$0xf]  ;;  %v10141_v24 = vld [vmem:[#allocation5 + $0xac] sm:$0xf0]  ;;  %v7210_v25 = vor.u32 %v10241_v22, %v7209_v20  ;;  %4808 = vmatpush.bf16.msra.mxu1 %v6954_v17 }
  0x29   :  { %v6937_v26 = vld [vmem:[#allocation5 + $0x1a0] sm:$0xf]  ;;  %v10173_v27 = vld [vmem:[#allocation5 + $0x1ac] sm:$0xf0]  ;;  %v6810_v29 = vor.u32 %v10141_v24, %v6809_v23  ;;  %4821 = vmatpush.bf16.msra.mxu2 %v7082_v21 }
  0x2a   :  { %v7065_v28 = vld [vmem:[#allocation5 + $0x2a0] sm:$0xf]  ;;  %v10205_v30 = vld [vmem:[#allocation5 + $0x2ac] sm:$0xf0]  ;;  %v6938_v33 = vor.u32 %v10173_v27, %v6937_v26  ;;  %4834 = vmatpush.bf16.msra.mxu3 %v7210_v25 }
  0x2b   :  { %v7193_v31 = vld [vmem:[#allocation5 + $0x3a0] sm:$0xf]  ;;  %v10237_v32 = vld [vmem:[#allocation5 + $0x3ac] sm:$0xf0]  ;;  %v7066_v34 = vor.u32 %v10205_v30, %v7065_v28  ;;  %4796 = vmatpush.bf16.msra.mxu0 %v6810_v29 }
  0x2c   :  { %v6793_v35 = vld [vmem:[#allocation5 + $0x80] sm:$0xf]  ;;  %v10137_v36 = vld [vmem:[#allocation5 + $0x8c] sm:$0xf0]  ;;  %v7194_v38 = vor.u32 %v10237_v32, %v7193_v31  ;;  %4809 = vmatpush.bf16.msra.mxu1 %v6938_v33 }
  0x2d   :  { %v6921_v37 = vld [vmem:[#allocation5 + $0x180] sm:$0xf]  ;;  %v10169_v39 = vld [vmem:[#allocation5 + $0x18c] sm:$0xf0]  ;;  %v6794_v44 = vor.u32 %v10137_v36, %v6793_v35  ;;  %4822 = vmatpush.bf16.msra.mxu2 %v7066_v34 }
  0x2e   :  { %v7049_v40 = vld [vmem:[#allocation5 + $0x280] sm:$0xf]  ;;  %v10201_v41 = vld [vmem:[#allocation5 + $0x28c] sm:$0xf0]  ;;  %v6922_v45 = vor.u32 %v10169_v39, %v6921_v37  ;;  %4835 = vmatpush.bf16.msra.mxu3 %v7194_v38 }
  0x2f   :  { %v7177_v42 = vld [vmem:[#allocation5 + $0x380] sm:$0xf]  ;;  %v10233_v43 = vld [vmem:[#allocation5 + $0x38c] sm:$0xf0]  ;;  %v7050_v46 = vor.u32 %v10201_v41, %v7049_v40  ;;  %4797 = vmatpush.bf16.msra.mxu0 %v6794_v44 }
  0x30   :  { %v6777_v47 = vld [vmem:[#allocation5 + $0x60] sm:$0xf]  ;;  %v10133_v48 = vld [vmem:[#allocation5 + $0x6c] sm:$0xf0]  ;;  %v7178_v50 = vor.u32 %v10233_v43, %v7177_v42  ;;  %4810 = vmatpush.bf16.msra.mxu1 %v6922_v45 }
  0x31   :  { %v6905_v49 = vld [vmem:[#allocation5 + $0x160] sm:$0xf]  ;;  %v10165_v51 = vld [vmem:[#allocation5 + $0x16c] sm:$0xf0]  ;;  %v6778_v56 = vor.u32 %v10133_v48, %v6777_v47  ;;  %4823 = vmatpush.bf16.msra.mxu2 %v7050_v46 }
  0x32   :  { %v7033_v52 = vld [vmem:[#allocation5 + $0x260] sm:$0xf]  ;;  %v10197_v53 = vld [vmem:[#allocation5 + $0x26c] sm:$0xf0]  ;;  %v6906_v57 = vor.u32 %v10165_v51, %v6905_v49  ;;  %4836 = vmatpush.bf16.msra.mxu3 %v7178_v50 }
  0x33   :  { %v7161_v54 = vld [vmem:[#allocation5 + $0x360] sm:$0xf]  ;;  %v10229_v55 = vld [vmem:[#allocation5 + $0x36c] sm:$0xf0]  ;;  %v7034_v58 = vor.u32 %v10197_v53, %v7033_v52  ;;  %4798 = vmatpush.bf16.msra.mxu0 %v6778_v56 }
  0x34   :  { %v6761_v59 = vld [vmem:[#allocation5 + $0x40] sm:$0xf]  ;;  %v10129_v60 = vld [vmem:[#allocation5 + $0x4c] sm:$0xf0]  ;;  %v7162_v62 = vor.u32 %v10229_v55, %v7161_v54  ;;  %4811 = vmatpush.bf16.msra.mxu1 %v6906_v57 }
  0x35   :  { %v6889_v61 = vld [vmem:[#allocation5 + $0x140] sm:$0xf]  ;;  %v10161_v63 = vld [vmem:[#allocation5 + $0x14c] sm:$0xf0]  ;;  %v6762_v4 = vor.u32 %v10129_v60, %v6761_v59  ;;  %4824 = vmatpush.bf16.msra.mxu2 %v7034_v58 }
  0x36   :  { %v7017_v0 = vld [vmem:[#allocation5 + $0x240] sm:$0xf]  ;;  %v10193_v1 = vld [vmem:[#allocation5 + $0x24c] sm:$0xf0]  ;;  %v6890_v5 = vor.u32 %v10161_v63, %v6889_v61  ;;  %4837 = vmatpush.bf16.msra.mxu3 %v7162_v62 }
  0x37   :  { %v7145_v2 = vld [vmem:[#allocation5 + $0x340] sm:$0xf]  ;;  %v10225_v3 = vld [vmem:[#allocation5 + $0x34c] sm:$0xf0]  ;;  %v7018_v6 = vor.u32 %v10193_v1, %v7017_v0  ;;  %4799 = vmatpush.bf16.msra.mxu0 %v6762_v4 }
  0x38   :  { %v6745_v7 = vld [vmem:[#allocation5 + $0x20] sm:$0xf]  ;;  %v10125_v8 = vld [vmem:[#allocation5 + $0x2c] sm:$0xf0]  ;;  %v7146_v10 = vor.u32 %v10225_v3, %v7145_v2  ;;  %4812 = vmatpush.bf16.msra.mxu1 %v6890_v5 }
  0x39   :  { %v6873_v9 = vld [vmem:[#allocation5 + $0x120] sm:$0xf]  ;;  %v10157_v11 = vld [vmem:[#allocation5 + $0x12c] sm:$0xf0]  ;;  %v6746_v16 = vor.u32 %v10125_v8, %v6745_v7  ;;  %4825 = vmatpush.bf16.msra.mxu2 %v7018_v6 }
  0x3a   :  { %v7001_v12 = vld [vmem:[#allocation5 + $0x220] sm:$0xf]  ;;  %v10189_v13 = vld [vmem:[#allocation5 + $0x22c] sm:$0xf0]  ;;  %v6874_v19 = vor.u32 %v10157_v11, %v6873_v9  ;;  %4838 = vmatpush.bf16.msra.mxu3 %v7146_v10  ;;  %v131_v10 = vld [vmem:[#allocation2 + $0x18] sm:$0xff] }
  0x3b   :  { %v7129_v14 = vld [vmem:[#allocation5 + $0x320] sm:$0xf]  ;;  %v10221_v15 = vld [vmem:[#allocation5 + $0x32c] sm:$0xf0]  ;;  %v7002_v20 = vor.u32 %v10189_v13, %v7001_v12  ;;  %4800 = vmatpush.bf16.msra.mxu0 %v6746_v16 }
  0x3c   :  { %v6729_v17 = vld [vmem:[#allocation5] sm:$0xf]  ;;  %v10121_v18 = vld [vmem:[#allocation5 + $0xc] sm:$0xf0]  ;;  %v7130_v24 = vor.u32 %v10221_v15, %v7129_v14  ;;  %4813 = vmatpush.bf16.msra.mxu1 %v6874_v19  ;;  %v11266_v15 = vpack.c.bf16 %v131_v10, %v131_v10  ;;  %v129_v19 = vld [vmem:[#allocation2 + $0x8] sm:$0xff] }
  0x3d   :  { %v6857_v21 = vld [vmem:[#allocation5 + $0x100] sm:$0xf]  ;;  %v10153_v22 = vld [vmem:[#allocation5 + $0x10c] sm:$0xf0]  ;;  %v6730_v31 = vor.u32 %v10121_v18, %v6729_v17  ;;  %4826 = vmatpush.bf16.msra.mxu2 %v7002_v20 }
  0x3e   :  { %v6985_v23 = vld [vmem:[#allocation5 + $0x200] sm:$0xf]  ;;  %v10185_v25 = vld [vmem:[#allocation5 + $0x20c] sm:$0xf0]  ;;  %v6858_v35 = vor.u32 %v10153_v22, %v6857_v21  ;;  %4839 = vmatpush.bf16.msra.mxu3 %v7130_v24 }
  0x3f   :  { %v7113_v26 = vld [vmem:[#allocation5 + $0x300] sm:$0xf]  ;;  %v10217_v27 = vld [vmem:[#allocation5 + $0x30c] sm:$0xf0]  ;;  %v6986_v36 = vor.u32 %v10185_v25, %v6985_v23  ;;  %4801 = vmatpush.bf16.msra.mxu0 %v6730_v31  ;;  %v11271_v25 = vpack.c.bf16 %v129_v19, %v129_v19 }
  0x40   :  { %v7353_v28 = vld [vmem:[#allocation5 + $0x4e0] sm:$0xf]  ;;  %v10277_v29 = vld [vmem:[#allocation5 + $0x4ec] sm:$0xf0]  ;;  %v7114_v39 = vor.u32 %v10217_v27, %v7113_v26  ;;  %4814 = vmatpush.bf16.msra.mxu1 %v6858_v35 }
  0x41   :  { %v7481_v30 = vld [vmem:[#allocation5 + $0x5e0] sm:$0xf]  ;;  %v10309_v32 = vld [vmem:[#allocation5 + $0x5ec] sm:$0xf0]  ;;  %v7354_v40 = vor.u32 %v10277_v29, %v7353_v28  ;;  %4827 = vmatpush.bf16.msra.mxu2 %v6986_v36 }
  0x42   :  { %v7609_v33 = vld [vmem:[#allocation5 + $0x6e0] sm:$0xf]  ;;  %v10341_v34 = vld [vmem:[#allocation5 + $0x6ec] sm:$0xf0]  ;;  %v7482_v41 = vor.u32 %v10309_v32, %v7481_v30  ;;  %4840 = vmatpush.bf16.msra.mxu3 %v7114_v39 }
  0x43   :  { %v7737_v37 = vld [vmem:[#allocation5 + $0x7e0] sm:$0xf]  ;;  %v10373_v38 = vld [vmem:[#allocation5 + $0x7ec] sm:$0xf0]  ;;  %v7610_v42 = vor.u32 %v10341_v34, %v7609_v33  ;;  %4846 = vmatpush.bf16.msrb.mxu0 %v7354_v40  ;;  %4815 = vmatmul.bf16.vlgmr.msra.gmra.mxu1 %v11271_v25 }
  0x44   :  { %v7337_v43 = vld [vmem:[#allocation5 + $0x4c0] sm:$0xf]  ;;  %v10273_v44 = vld [vmem:[#allocation5 + $0x4cc] sm:$0xf0]  ;;  %v7738_v46 = vor.u32 %v10373_v38, %v7737_v37  ;;  %4859 = vmatpush.bf16.msrb.mxu1 %v7482_v41 }
  0x45   :  { %v7465_v45 = vld [vmem:[#allocation5 + $0x5c0] sm:$0xf]  ;;  %v10305_v47 = vld [vmem:[#allocation5 + $0x5cc] sm:$0xf0]  ;;  %v7338_v52 = vor.u32 %v10273_v44, %v7337_v43  ;;  %4872 = vmatpush.bf16.msrb.mxu2 %v7610_v42  ;;  %4841 = vmatmul.bf16.vlgmr.msra.gmra.mxu3 %v11266_v15 }
  0x46   :  { %v7593_v48 = vld [vmem:[#allocation5 + $0x6c0] sm:$0xf]  ;;  %v10337_v49 = vld [vmem:[#allocation5 + $0x6cc] sm:$0xf0]  ;;  %v7466_v54 = vor.u32 %v10305_v47, %v7465_v45  ;;  %4885 = vmatpush.bf16.msrb.mxu3 %v7738_v46 }
  0x47   :  { %v7721_v50 = vld [vmem:[#allocation5 + $0x7c0] sm:$0xf]  ;;  %v10369_v51 = vld [vmem:[#allocation5 + $0x7cc] sm:$0xf0]  ;;  %v7594_v55 = vor.u32 %v10337_v49, %v7593_v48  ;;  %4847 = vmatpush.bf16.msrb.mxu0 %v7338_v52 }
  0x48   :  { %v7321_v53 = vld [vmem:[#allocation5 + $0x4a0] sm:$0xf]  ;;  %v10269_v56 = vld [vmem:[#allocation5 + $0x4ac] sm:$0xf0]  ;;  %v7722_v59 = vor.u32 %v10369_v51, %v7721_v50  ;;  %4860 = vmatpush.bf16.msrb.mxu1 %v7466_v54 }
  0x49   :  { %v7449_v57 = vld [vmem:[#allocation5 + $0x5a0] sm:$0xf]  ;;  %v10301_v58 = vld [vmem:[#allocation5 + $0x5ac] sm:$0xf0]  ;;  %v7322_v0 = vor.u32 %v10269_v56, %v7321_v53  ;;  %4873 = vmatpush.bf16.msrb.mxu2 %v7594_v55 }
  0x4a   :  { %v7577_v60 = vld [vmem:[#allocation5 + $0x6a0] sm:$0xf]  ;;  %v10333_v61 = vld [vmem:[#allocation5 + $0x6ac] sm:$0xf0]  ;;  %v7450_v1 = vor.u32 %v10301_v58, %v7449_v57  ;;  %4886 = vmatpush.bf16.msrb.mxu3 %v7722_v59 }
  0x4b   :  { %v7705_v62 = vld [vmem:[#allocation5 + $0x7a0] sm:$0xf]  ;;  %v10365_v63 = vld [vmem:[#allocation5 + $0x7ac] sm:$0xf0]  ;;  %v7578_v5 = vor.u32 %v10333_v61, %v7577_v60  ;;  %4848 = vmatpush.bf16.msrb.mxu0 %v7322_v0 }
  0x4c   :  { %v7305_v2 = vld [vmem:[#allocation5 + $0x480] sm:$0xf]  ;;  %v130_v3 = vld [vmem:[#allocation2 + $0x10] sm:$0xff]  ;;  %v7706_v11 = vor.u32 %v10365_v63, %v7705_v62  ;;  %4861 = vmatpush.bf16.msrb.mxu1 %v7450_v1 }
  0x4d   :  { %v128_v4 = vld [vmem:[#allocation2] sm:$0xff]  ;;  %v10265_v6 = vld [vmem:[#allocation5 + $0x48c] sm:$0xf0]  ;;  %v11262_v8 = vpack.c.bf16 %v130_v3, %v130_v3  ;;  %4874 = vmatpush.bf16.msrb.mxu2 %v7578_v5 }
  0x4e   :  { %v7433_v7 = vld [vmem:[#allocation5 + $0x580] sm:$0xf]  ;;  %v11264_v9 = vpack.c.bf16 %v128_v4, %v128_v4  ;;  %v10297_v12 = vld [vmem:[#allocation5 + $0x58c] sm:$0xf0]  ;;  %v7306_v18 = vor.u32 %v10265_v6, %v7305_v2  ;;  %4887 = vmatpush.bf16.msrb.mxu3 %v7706_v11 }
  0x4f   :  { %v7561_v13 = vld [vmem:[#allocation5 + $0x680] sm:$0xf]  ;;  %v10329_v14 = vld [vmem:[#allocation5 + $0x68c] sm:$0xf0]  ;;  %4828 = vmatmul.bf16.vlgmr.msra.gmra.mxu2 %v11262_v8  ;;  %v7434_v20 = vor.u32 %v10297_v12, %v7433_v7 }
  0x50   :  { %v7689_v16 = vld [vmem:[#allocation5 + $0x780] sm:$0xf]  ;;  %v10361_v17 = vld [vmem:[#allocation5 + $0x78c] sm:$0xf0]  ;;  %4802 = vmatmul.bf16.vlgmr.msra.gmra.mxu0 %v11264_v9  ;;  %v7562_v21 = vor.u32 %v10329_v14, %v7561_v13 }
  0x51   :  { %v7289_v22 = vld [vmem:[#allocation5 + $0x460] sm:$0xf]  ;;  %v10261_v23 = vld [vmem:[#allocation5 + $0x46c] sm:$0xf0]  ;;  %v7690_v26 = vor.u32 %v10361_v17, %v7689_v16  ;;  %4849 = vmatpush.bf16.msrb.mxu0 %v7306_v18  ;;  %4862 = vmatpush.bf16.msrb.mxu1 %v7434_v20 }
  0x52   :  { %v7417_v24 = vld [vmem:[#allocation5 + $0x560] sm:$0xf]  ;;  %v10293_v27 = vld [vmem:[#allocation5 + $0x56c] sm:$0xf0]  ;;  %v7290_v32 = vor.u32 %v10261_v23, %v7289_v22  ;;  %4875 = vmatpush.bf16.msrb.mxu2 %v7562_v21  ;;  %v135_v23 = vld [vmem:[#allocation2 + $0x38] sm:$0xff] }
  0x53   :  { %v7545_v28 = vld [vmem:[#allocation5 + $0x660] sm:$0xf]  ;;  %v10325_v29 = vld [vmem:[#allocation5 + $0x66c] sm:$0xf0]  ;;  %v7418_v33 = vor.u32 %v10293_v27, %v7417_v24  ;;  %4888 = vmatpush.bf16.msrb.mxu3 %v7690_v26 }
  0x54   :  { %v7673_v30 = vld [vmem:[#allocation5 + $0x760] sm:$0xf]  ;;  %v10357_v31 = vld [vmem:[#allocation5 + $0x76c] sm:$0xf0]  ;;  %v7546_v34 = vor.u32 %v10325_v29, %v7545_v28  ;;  %v133_v29 = vld [vmem:[#allocation2 + $0x28] sm:$0xff] }
  0x55   :  { %v7273_v35 = vld [vmem:[#allocation5 + $0x440] sm:$0xf]  ;;  %v10257_v36 = vld [vmem:[#allocation5 + $0x44c] sm:$0xf0]  ;;  %v7674_v38 = vor.u32 %v10357_v31, %v7673_v30  ;;  %4850 = vmatpush.bf16.msrb.mxu0 %v7290_v32  ;;  %4863 = vmatpush.bf16.msrb.mxu1 %v7418_v33 }
  0x56   :  { %v7401_v37 = vld [vmem:[#allocation5 + $0x540] sm:$0xf]  ;;  %v10289_v39 = vld [vmem:[#allocation5 + $0x54c] sm:$0xf0]  ;;  %v7274_v44 = vor.u32 %v10257_v36, %v7273_v35  ;;  %4876 = vmatpush.bf16.msrb.mxu2 %v7546_v34 }
  0x57   :  { %v7529_v40 = vld [vmem:[#allocation5 + $0x640] sm:$0xf]  ;;  %v10321_v41 = vld [vmem:[#allocation5 + $0x64c] sm:$0xf0]  ;;  %v7402_v45 = vor.u32 %v10289_v39, %v7401_v37  ;;  %4889 = vmatpush.bf16.msrb.mxu3 %v7674_v38  ;;  %v11278_v38 = vpack.c.bf16 %v135_v23, %v135_v23 }
  0x58   :  { %v7657_v42 = vld [vmem:[#allocation5 + $0x740] sm:$0xf]  ;;  %v10353_v43 = vld [vmem:[#allocation5 + $0x74c] sm:$0xf0]  ;;  %v7530_v46 = vor.u32 %v10321_v41, %v7529_v40  ;;  %v11280_v40 = vpack.c.bf16 %v133_v29, %v133_v29 }
  0x59   :  { %v7257_v47 = vld [vmem:[#allocation5 + $0x420] sm:$0xf]  ;;  %v10253_v48 = vld [vmem:[#allocation5 + $0x42c] sm:$0xf0]  ;;  %v7658_v50 = vor.u32 %v10353_v43, %v7657_v42  ;;  %4851 = vmatpush.bf16.msrb.mxu0 %v7274_v44  ;;  %4864 = vmatpush.bf16.msrb.mxu1 %v7402_v45 }
  0x5a   :  { %v7385_v49 = vld [vmem:[#allocation5 + $0x520] sm:$0xf]  ;;  %v10285_v51 = vld [vmem:[#allocation5 + $0x52c] sm:$0xf0]  ;;  %v7258_v56 = vor.u32 %v10253_v48, %v7257_v47  ;;  %4877 = vmatpush.bf16.msrb.mxu2 %v7530_v46 }
  0x5b   :  { %v7513_v52 = vld [vmem:[#allocation5 + $0x620] sm:$0xf]  ;;  %v10317_v53 = vld [vmem:[#allocation5 + $0x62c] sm:$0xf0]  ;;  %v7386_v59 = vor.u32 %v10285_v51, %v7385_v49  ;;  %4890 = vmatpush.bf16.msrb.mxu3 %v7658_v50 }
  0x5c   :  { %v7641_v54 = vld [vmem:[#allocation5 + $0x720] sm:$0xf]  ;;  %v10349_v55 = vld [vmem:[#allocation5 + $0x72c] sm:$0xf0]  ;;  %v7514_v60 = vor.u32 %v10317_v53, %v7513_v52 }
  0x5d   :  { %v7241_v57 = vld [vmem:[#allocation5 + $0x400] sm:$0xf]  ;;  %v10249_v58 = vld [vmem:[#allocation5 + $0x40c] sm:$0xf0]  ;;  %v7642_v0 = vor.u32 %v10349_v55, %v7641_v54  ;;  %4852 = vmatpush.bf16.msrb.mxu0 %v7258_v56  ;;  %4865 = vmatpush.bf16.msrb.mxu1 %v7386_v59 }
  0x5e   :  { %v7369_v61 = vld [vmem:[#allocation5 + $0x500] sm:$0xf]  ;;  %v10281_v62 = vld [vmem:[#allocation5 + $0x50c] sm:$0xf0]  ;;  %v7242_v7 = vor.u32 %v10249_v58, %v7241_v57  ;;  %4878 = vmatpush.bf16.msrb.mxu2 %v7514_v60 }
  0x5f   :  { %v7497_v63 = vld [vmem:[#allocation5 + $0x600] sm:$0xf]  ;;  %v10313_v1 = vld [vmem:[#allocation5 + $0x60c] sm:$0xf0]  ;;  %v7370_v13 = vor.u32 %v10281_v62, %v7369_v61  ;;  %4891 = vmatpush.bf16.msrb.mxu3 %v7642_v0 }
  0x60   :  { %v7625_v2 = vld [vmem:[#allocation5 + $0x700] sm:$0xf]  ;;  %v10345_v3 = vld [vmem:[#allocation5 + $0x70c] sm:$0xf0]  ;;  %v7498_v14 = vor.u32 %v10313_v1, %v7497_v63 }
  0x61   :  { %v7865_v4 = vld [vmem:[#allocation5 + $0x8e0] sm:$0xf]  ;;  %v10405_v5 = vld [vmem:[#allocation5 + $0x8ec] sm:$0xf0]  ;;  %v7626_v19 = vor.u32 %v10345_v3, %v7625_v2  ;;  %4853 = vmatpush.bf16.msrb.mxu0 %v7242_v7  ;;  %4866 = vmatpush.bf16.msrb.mxu1 %v7370_v13 }
  0x62   :  { %v7993_v6 = vld [vmem:[#allocation5 + $0x9e0] sm:$0xf]  ;;  %v10437_v10 = vld [vmem:[#allocation5 + $0x9ec] sm:$0xf0]  ;;  %v7866_v20 = vor.u32 %v10405_v5, %v7865_v4  ;;  %4879 = vmatpush.bf16.msrb.mxu2 %v7498_v14 }
  0x63   :  { %v8121_v11 = vld [vmem:[#allocation5 + $0xae0] sm:$0xf]  ;;  %v10469_v12 = vld [vmem:[#allocation5 + $0xaec] sm:$0xf0]  ;;  %v7994_v24 = vor.u32 %v10437_v10, %v7993_v6  ;;  %4892 = vmatpush.bf16.msrb.mxu3 %v7626_v19 }
  0x64   :  { %v8249_v16 = vld [vmem:[#allocation5 + $0xbe0] sm:$0xf]  ;;  %v10501_v17 = vld [vmem:[#allocation5 + $0xbec] sm:$0xf0]  ;;  %v8122_v26 = vor.u32 %v10469_v12, %v8121_v11  ;;  %4867 = vmatmul.bf16.vlgmr.msrb.gmra.mxu1 %v11280_v40 }
  0x65   :  { %v134_v18 = vld [vmem:[#allocation2 + $0x30] sm:$0xff]  ;;  %v7849_v21 = vld [vmem:[#allocation5 + $0x8c0] sm:$0xf]  ;;  %v8250_v30 = vor.u32 %v10501_v17, %v8249_v16  ;;  %4898 = vmatpush.bf16.msra.mxu0 %v7866_v20  ;;  %4911 = vmatpush.bf16.msra.mxu1 %v7994_v24 }
  0x66   :  { %v132_v22 = vld [vmem:[#allocation2 + $0x20] sm:$0xff]  ;;  %v10401_v27 = vld [vmem:[#allocation5 + $0x8cc] sm:$0xf0]  ;;  %v11274_v34 = vpack.c.bf16 %v134_v18, %v134_v18  ;;  %4924 = vmatpush.bf16.msra.mxu2 %v8122_v26  ;;  %4893 = vmatmul.bf16.vlgmr.msrb.gmra.mxu3 %v11278_v38 }
  0x67   :  { %v7977_v28 = vld [vmem:[#allocation5 + $0x9c0] sm:$0xf]  ;;  %v10433_v31 = vld [vmem:[#allocation5 + $0x9cc] sm:$0xf0]  ;;  %v11276_v37 = vpack.c.bf16 %v132_v22, %v132_v22  ;;  %v7850_v39 = vor.u32 %v10401_v27, %v7849_v21  ;;  %4937 = vmatpush.bf16.msra.mxu3 %v8250_v30 }
  0x68   :  { %v8105_v32 = vld [vmem:[#allocation5 + $0xac0] sm:$0xf]  ;;  %v10465_v33 = vld [vmem:[#allocation5 + $0xacc] sm:$0xf0]  ;;  %v7978_v41 = vor.u32 %v10433_v31, %v7977_v28  ;;  %4880 = vmatmul.bf16.vlgmr.msrb.gmra.mxu2 %v11274_v34 }
  0x69   :  { %v8233_v35 = vld [vmem:[#allocation5 + $0xbc0] sm:$0xf]  ;;  %v10497_v36 = vld [vmem:[#allocation5 + $0xbcc] sm:$0xf0]  ;;  %v8106_v42 = vor.u32 %v10465_v33, %v8105_v32  ;;  %4854 = vmatmul.bf16.vlgmr.msrb.gmra.mxu0 %v11276_v37 }
  0x6a   :  { %v7833_v43 = vld [vmem:[#allocation5 + $0x8a0] sm:$0xf]  ;;  %v10397_v44 = vld [vmem:[#allocation5 + $0x8ac] sm:$0xf0]  ;;  %v8234_v46 = vor.u32 %v10497_v36, %v8233_v35  ;;  %4899 = vmatpush.bf16.msra.mxu0 %v7850_v39  ;;  %4912 = vmatpush.bf16.msra.mxu1 %v7978_v41 }
  0x6b   :  { %v7961_v45 = vld [vmem:[#allocation5 + $0x9a0] sm:$0xf]  ;;  %v10429_v47 = vld [vmem:[#allocation5 + $0x9ac] sm:$0xf0]  ;;  %v7834_v52 = vor.u32 %v10397_v44, %v7833_v43  ;;  %4925 = vmatpush.bf16.msra.mxu2 %v8106_v42 }
  0x6c   :  { %v8089_v48 = vld [vmem:[#allocation5 + $0xaa0] sm:$0xf]  ;;  %v10461_v49 = vld [vmem:[#allocation5 + $0xaac] sm:$0xf0]  ;;  %v7962_v53 = vor.u32 %v10429_v47, %v7961_v45  ;;  %4938 = vmatpush.bf16.msra.mxu3 %v8234_v46 }
  0x6d   :  { %v8217_v50 = vld [vmem:[#allocation5 + $0xba0] sm:$0xf]  ;;  %v10493_v51 = vld [vmem:[#allocation5 + $0xbac] sm:$0xf0]  ;;  %v8090_v54 = vor.u32 %v10461_v49, %v8089_v48 }
  0x6e   :  { %v7817_v55 = vld [vmem:[#allocation5 + $0x880] sm:$0xf]  ;;  %v10393_v56 = vld [vmem:[#allocation5 + $0x88c] sm:$0xf0]  ;;  %v8218_v58 = vor.u32 %v10493_v51, %v8217_v50  ;;  %4900 = vmatpush.bf16.msra.mxu0 %v7834_v52  ;;  %4913 = vmatpush.bf16.msra.mxu1 %v7962_v53 }
  0x6f   :  { %v7945_v57 = vld [vmem:[#allocation5 + $0x980] sm:$0xf]  ;;  %v10425_v59 = vld [vmem:[#allocation5 + $0x98c] sm:$0xf0]  ;;  %v7818_v0 = vor.u32 %v10393_v56, %v7817_v55  ;;  %4926 = vmatpush.bf16.msra.mxu2 %v8090_v54 }
  0x70   :  { %v8073_v60 = vld [vmem:[#allocation5 + $0xa80] sm:$0xf]  ;;  %v10457_v61 = vld [vmem:[#allocation5 + $0xa8c] sm:$0xf0]  ;;  %v7946_v1 = vor.u32 %v10425_v59, %v7945_v57  ;;  %4939 = vmatpush.bf16.msra.mxu3 %v8218_v58 }
  0x71   :  { %v8201_v62 = vld [vmem:[#allocation5 + $0xb80] sm:$0xf]  ;;  %v10489_v63 = vld [vmem:[#allocation5 + $0xb8c] sm:$0xf0]  ;;  %v8074_v2 = vor.u32 %v10457_v61, %v8073_v60 }
  0x72   :  { %v7801_v3 = vld [vmem:[#allocation5 + $0x860] sm:$0xf]  ;;  %v10389_v4 = vld [vmem:[#allocation5 + $0x86c] sm:$0xf0]  ;;  %v8202_v6 = vor.u32 %v10489_v63, %v8201_v62  ;;  %4901 = vmatpush.bf16.msra.mxu0 %v7818_v0  ;;  %4914 = vmatpush.bf16.msra.mxu1 %v7946_v1 }
  0x73   :  { %v7929_v5 = vld [vmem:[#allocation5 + $0x960] sm:$0xf]  ;;  %v10421_v7 = vld [vmem:[#allocation5 + $0x96c] sm:$0xf0]  ;;  %v7802_v14 = vor.u32 %v10389_v4, %v7801_v3  ;;  %4927 = vmatpush.bf16.msra.mxu2 %v8074_v2 }
  0x74   :  { %v8057_v10 = vld [vmem:[#allocation5 + $0xa60] sm:$0xf]  ;;  %v10453_v11 = vld [vmem:[#allocation5 + $0xa6c] sm:$0xf0]  ;;  %v7930_v16 = vor.u32 %v10421_v7, %v7929_v5  ;;  %4940 = vmatpush.bf16.msra.mxu3 %v8202_v6  ;;  %v137_v7 = vld [vmem:[#allocation2 + $0x48] sm:$0xff] }
  0x75   :  { %v8185_v12 = vld [vmem:[#allocation5 + $0xb60] sm:$0xf]  ;;  %v10485_v13 = vld [vmem:[#allocation5 + $0xb6c] sm:$0xf0]  ;;  %v8058_v17 = vor.u32 %v10453_v11, %v8057_v10  ;;  %v139_v10 = vld [vmem:[#allocation2 + $0x58] sm:$0xff] }
  0x76   :  { %v7785_v18 = vld [vmem:[#allocation5 + $0x840] sm:$0xf]  ;;  %v10385_v19 = vld [vmem:[#allocation5 + $0x84c] sm:$0xf0]  ;;  %v8186_v21 = vor.u32 %v10485_v13, %v8185_v12  ;;  %4902 = vmatpush.bf16.msra.mxu0 %v7802_v14  ;;  %4915 = vmatpush.bf16.msra.mxu1 %v7930_v16 }
  0x77   :  { %v7913_v20 = vld [vmem:[#allocation5 + $0x940] sm:$0xf]  ;;  %v10417_v22 = vld [vmem:[#allocation5 + $0x94c] sm:$0xf0]  ;;  %v7786_v28 = vor.u32 %v10385_v19, %v7785_v18  ;;  %4928 = vmatpush.bf16.msra.mxu2 %v8058_v17 }
  0x78   :  { %v8041_v23 = vld [vmem:[#allocation5 + $0xa40] sm:$0xf]  ;;  %v10449_v24 = vld [vmem:[#allocation5 + $0xa4c] sm:$0xf0]  ;;  %v7914_v29 = vor.u32 %v10417_v22, %v7913_v20  ;;  %4941 = vmatpush.bf16.msra.mxu3 %v8186_v21 }
  0x79   :  { %v8169_v26 = vld [vmem:[#allocation5 + $0xb40] sm:$0xf]  ;;  %v10481_v27 = vld [vmem:[#allocation5 + $0xb4c] sm:$0xf0]  ;;  %v8042_v30 = vor.u32 %v10449_v24, %v8041_v23  ;;  %v11290_v23 = vpack.c.bf16 %v137_v7, %v137_v7 }
  0x7a   :  { %v7769_v31 = vld [vmem:[#allocation5 + $0x820] sm:$0xf]  ;;  %v10381_v32 = vld [vmem:[#allocation5 + $0x82c] sm:$0xf0]  ;;  %v8170_v35 = vor.u32 %v10481_v27, %v8169_v26  ;;  %4903 = vmatpush.bf16.msra.mxu0 %v7786_v28  ;;  %4916 = vmatpush.bf16.msra.mxu1 %v7914_v29  ;;  %v11292_v27 = vpack.c.bf16 %v139_v10, %v139_v10 }
  0x7b   :  { %v7897_v33 = vld [vmem:[#allocation5 + $0x920] sm:$0xf]  ;;  %v10413_v36 = vld [vmem:[#allocation5 + $0x92c] sm:$0xf0]  ;;  %v7770_v44 = vor.u32 %v10381_v32, %v7769_v31  ;;  %4929 = vmatpush.bf16.msra.mxu2 %v8042_v30 }
  0x7c   :  { %v8025_v39 = vld [vmem:[#allocation5 + $0xa20] sm:$0xf]  ;;  %v10445_v41 = vld [vmem:[#allocation5 + $0xa2c] sm:$0xf0]  ;;  %v7898_v48 = vor.u32 %v10413_v36, %v7897_v33  ;;  %4942 = vmatpush.bf16.msra.mxu3 %v8170_v35 }
  0x7d   :  { %v8153_v42 = vld [vmem:[#allocation5 + $0xb20] sm:$0xf]  ;;  %v10477_v43 = vld [vmem:[#allocation5 + $0xb2c] sm:$0xf0]  ;;  %v8026_v49 = vor.u32 %v10445_v41, %v8025_v39 }
  0x7e   :  { %v7753_v45 = vld [vmem:[#allocation5 + $0x800] sm:$0xf]  ;;  %v10377_v46 = vld [vmem:[#allocation5 + $0x80c] sm:$0xf0]  ;;  %v8154_v53 = vor.u32 %v10477_v43, %v8153_v42  ;;  %4904 = vmatpush.bf16.msra.mxu0 %v7770_v44  ;;  %4917 = vmatpush.bf16.msra.mxu1 %v7898_v48 }
  0x7f   :  { %v7881_v47 = vld [vmem:[#allocation5 + $0x900] sm:$0xf]  ;;  %v10409_v50 = vld [vmem:[#allocation5 + $0x90c] sm:$0xf0]  ;;  %v7754_v59 = vor.u32 %v10377_v46, %v7753_v45  ;;  %4930 = vmatpush.bf16.msra.mxu2 %v8026_v49 }
  0x80   :  { %v8009_v51 = vld [vmem:[#allocation5 + $0xa00] sm:$0xf]  ;;  %v10441_v52 = vld [vmem:[#allocation5 + $0xa0c] sm:$0xf0]  ;;  %v7882_v63 = vor.u32 %v10409_v50, %v7881_v47  ;;  %4943 = vmatpush.bf16.msra.mxu3 %v8154_v53 }
  0x81   :  { %v8137_v54 = vld [vmem:[#allocation5 + $0xb00] sm:$0xf]  ;;  %v10473_v55 = vld [vmem:[#allocation5 + $0xb0c] sm:$0xf0]  ;;  %v8010_v0 = vor.u32 %v10441_v52, %v8009_v51 }
  0x82   :  { %v8377_v56 = vld [vmem:[#allocation5 + $0xce0] sm:$0xf]  ;;  %v10533_v57 = vld [vmem:[#allocation5 + $0xcec] sm:$0xf0]  ;;  %v8138_v4 = vor.u32 %v10473_v55, %v8137_v54  ;;  %4905 = vmatpush.bf16.msra.mxu0 %v7754_v59  ;;  %4918 = vmatpush.bf16.msra.mxu1 %v7882_v63 }
  0x83   :  { %v8505_v58 = vld [vmem:[#allocation5 + $0xde0] sm:$0xf]  ;;  %v10565_v60 = vld [vmem:[#allocation5 + $0xdec] sm:$0xf0]  ;;  %v8378_v5 = vor.u32 %v10533_v57, %v8377_v56  ;;  %4931 = vmatpush.bf16.msra.mxu2 %v8010_v0 }
  0x84   :  { %v8633_v61 = vld [vmem:[#allocation5 + $0xee0] sm:$0xf]  ;;  %v10597_v62 = vld [vmem:[#allocation5 + $0xeec] sm:$0xf0]  ;;  %v8506_v11 = vor.u32 %v10565_v60, %v8505_v58  ;;  %4944 = vmatpush.bf16.msra.mxu3 %v8138_v4 }
  0x85   :  { %v8761_v1 = vld [vmem:[#allocation5 + $0xfe0] sm:$0xf]  ;;  %v10629_v2 = vld [vmem:[#allocation5 + $0xfec] sm:$0xf0]  ;;  %v8634_v12 = vor.u32 %v10597_v62, %v8633_v61  ;;  %4919 = vmatmul.bf16.vlgmr.msra.gmra.mxu1 %v11290_v23 }
  0x86   :  { %v136_v3 = vld [vmem:[#allocation2 + $0x40] sm:$0xff]  ;;  %v138_v6 = vld [vmem:[#allocation2 + $0x50] sm:$0xff]  ;;  %v8762_v17 = vor.u32 %v10629_v2, %v8761_v1  ;;  %4950 = vmatpush.bf16.msrb.mxu0 %v8378_v5  ;;  %4963 = vmatpush.bf16.msrb.mxu1 %v8506_v11 }
  0x87   :  { %v8361_v13 = vld [vmem:[#allocation5 + $0xcc0] sm:$0xf]  ;;  %v10529_v14 = vld [vmem:[#allocation5 + $0xccc] sm:$0xf0]  ;;  %v11286_v18 = vpack.c.bf16 %v136_v3, %v136_v3  ;;  %v11288_v22 = vpack.c.bf16 %v138_v6, %v138_v6  ;;  %4976 = vmatpush.bf16.msrb.mxu2 %v8634_v12  ;;  %4945 = vmatmul.bf16.vlgmr.msra.gmra.mxu3 %v11292_v27 }
  0x88   :  { %v8489_v16 = vld [vmem:[#allocation5 + $0xdc0] sm:$0xf]  ;;  %v10561_v19 = vld [vmem:[#allocation5 + $0xdcc] sm:$0xf0]  ;;  %v8362_v28 = vor.u32 %v10529_v14, %v8361_v13  ;;  %4989 = vmatpush.bf16.msrb.mxu3 %v8762_v17 }
  0x89   :  { %v8617_v20 = vld [vmem:[#allocation5 + $0xec0] sm:$0xf]  ;;  %v10593_v21 = vld [vmem:[#allocation5 + $0xecc] sm:$0xf0]  ;;  %v8490_v29 = vor.u32 %v10561_v19, %v8489_v16  ;;  %4906 = vmatmul.bf16.vlgmr.msra.gmra.mxu0 %v11286_v18  ;;  %4932 = vmatmul.bf16.vlgmr.msra.gmra.mxu2 %v11288_v22 }
  0x8a   :  { %v8745_v24 = vld [vmem:[#allocation5 + $0xfc0] sm:$0xf]  ;;  %v10625_v26 = vld [vmem:[#allocation5 + $0xfcc] sm:$0xf0]  ;;  %v8618_v30 = vor.u32 %v10593_v21, %v8617_v20  ;;  %4951 = vmatpush.bf16.msrb.mxu0 %v8362_v28 }
  0x8b   :  { %v8345_v31 = vld [vmem:[#allocation5 + $0xca0] sm:$0xf]  ;;  %v10525_v32 = vld [vmem:[#allocation5 + $0xcac] sm:$0xf0]  ;;  %v8746_v35 = vor.u32 %v10625_v26, %v8745_v24  ;;  %4964 = vmatpush.bf16.msrb.mxu1 %v8490_v29 }
  0x8c   :  { %v8473_v33 = vld [vmem:[#allocation5 + $0xda0] sm:$0xf]  ;;  %v10557_v36 = vld [vmem:[#allocation5 + $0xdac] sm:$0xf0]  ;;  %v8346_v44 = vor.u32 %v10525_v32, %v8345_v31  ;;  %4977 = vmatpush.bf16.msrb.mxu2 %v8618_v30 }
  0x8d   :  { %v8601_v39 = vld [vmem:[#allocation5 + $0xea0] sm:$0xf]  ;;  %v10589_v41 = vld [vmem:[#allocation5 + $0xeac] sm:$0xf0]  ;;  %v8474_v45 = vor.u32 %v10557_v36, %v8473_v33  ;;  %4990 = vmatpush.bf16.msrb.mxu3 %v8746_v35 }
  0x8e   :  { %v8729_v42 = vld [vmem:[#allocation5 + $0xfa0] sm:$0xf]  ;;  %v10621_v43 = vld [vmem:[#allocation5 + $0xfac] sm:$0xf0]  ;;  %v8602_v46 = vor.u32 %v10589_v41, %v8601_v39  ;;  %4952 = vmatpush.bf16.msrb.mxu0 %v8346_v44 }
  0x8f   :  { %v8329_v47 = vld [vmem:[#allocation5 + $0xc80] sm:$0xf]  ;;  %v10521_v48 = vld [vmem:[#allocation5 + $0xc8c] sm:$0xf0]  ;;  %v8730_v50 = vor.u32 %v10621_v43, %v8729_v42  ;;  %4965 = vmatpush.bf16.msrb.mxu1 %v8474_v45 }
  0x90   :  { %v8457_v49 = vld [vmem:[#allocation5 + $0xd80] sm:$0xf]  ;;  %v10553_v51 = vld [vmem:[#allocation5 + $0xd8c] sm:$0xf0]  ;;  %v8330_v56 = vor.u32 %v10521_v48, %v8329_v47  ;;  %4978 = vmatpush.bf16.msrb.mxu2 %v8602_v46 }
  0x91   :  { %v8585_v52 = vld [vmem:[#allocation5 + $0xe80] sm:$0xf]  ;;  %v10585_v53 = vld [vmem:[#allocation5 + $0xe8c] sm:$0xf0]  ;;  %v8458_v57 = vor.u32 %v10553_v51, %v8457_v49  ;;  %4991 = vmatpush.bf16.msrb.mxu3 %v8730_v50 }
  0x92   :  { %v8713_v54 = vld [vmem:[#allocation5 + $0xf80] sm:$0xf]  ;;  %v10617_v55 = vld [vmem:[#allocation5 + $0xf8c] sm:$0xf0]  ;;  %v8586_v58 = vor.u32 %v10585_v53, %v8585_v52  ;;  %4953 = vmatpush.bf16.msrb.mxu0 %v8330_v56 }
  0x93   :  { %v8313_v59 = vld [vmem:[#allocation5 + $0xc60] sm:$0xf]  ;;  %v10517_v60 = vld [vmem:[#allocation5 + $0xc6c] sm:$0xf0]  ;;  %v8714_v62 = vor.u32 %v10617_v55, %v8713_v54  ;;  %4966 = vmatpush.bf16.msrb.mxu1 %v8458_v57 }
  0x94   :  { %v8441_v61 = vld [vmem:[#allocation5 + $0xd60] sm:$0xf]  ;;  %v10549_v63 = vld [vmem:[#allocation5 + $0xd6c] sm:$0xf0]  ;;  %v8314_v4 = vor.u32 %v10517_v60, %v8313_v59  ;;  %4979 = vmatpush.bf16.msrb.mxu2 %v8586_v58 }
  0x95   :  { %v8569_v0 = vld [vmem:[#allocation5 + $0xe60] sm:$0xf]  ;;  %v10581_v1 = vld [vmem:[#allocation5 + $0xe6c] sm:$0xf0]  ;;  %v8442_v5 = vor.u32 %v10549_v63, %v8441_v61  ;;  %4992 = vmatpush.bf16.msrb.mxu3 %v8714_v62 }
  0x96   :  { %v8697_v2 = vld [vmem:[#allocation5 + $0xf60] sm:$0xf]  ;;  %v10613_v3 = vld [vmem:[#allocation5 + $0xf6c] sm:$0xf0]  ;;  %v8570_v6 = vor.u32 %v10581_v1, %v8569_v0  ;;  %4954 = vmatpush.bf16.msrb.mxu0 %v8314_v4  ;;  %v143_v4 = vld [vmem:[#allocation2 + $0x78] sm:$0xff] }
  0x97   :  { %v8297_v7 = vld [vmem:[#allocation5 + $0xc40] sm:$0xf]  ;;  %v10513_v10 = vld [vmem:[#allocation5 + $0xc4c] sm:$0xf0]  ;;  %v8698_v12 = vor.u32 %v10613_v3, %v8697_v2  ;;  %4967 = vmatpush.bf16.msrb.mxu1 %v8442_v5  ;;  %v141_v3 = vld [vmem:[#allocation2 + $0x68] sm:$0xff] }
  0x98   :  { %v8425_v11 = vld [vmem:[#allocation5 + $0xd40] sm:$0xf]  ;;  %v10545_v13 = vld [vmem:[#allocation5 + $0xd4c] sm:$0xf0]  ;;  %v8298_v20 = vor.u32 %v10513_v10, %v8297_v7  ;;  %4980 = vmatpush.bf16.msrb.mxu2 %v8570_v6 }
  0x99   :  { %v8553_v14 = vld [vmem:[#allocation5 + $0xe40] sm:$0xf]  ;;  %v10577_v16 = vld [vmem:[#allocation5 + $0xe4c] sm:$0xf0]  ;;  %v8426_v21 = vor.u32 %v10545_v13, %v8425_v11  ;;  %4993 = vmatpush.bf16.msrb.mxu3 %v8698_v12 }
  0x9a   :  { %v8681_v17 = vld [vmem:[#allocation5 + $0xf40] sm:$0xf]  ;;  %v10609_v19 = vld [vmem:[#allocation5 + $0xf4c] sm:$0xf0]  ;;  %v8554_v24 = vor.u32 %v10577_v16, %v8553_v14  ;;  %4955 = vmatpush.bf16.msrb.mxu0 %v8298_v20  ;;  %v11302_v20 = vpack.c.bf16 %v141_v3, %v141_v3 }
  0x9b   :  { %v8281_v26 = vld [vmem:[#allocation5 + $0xc20] sm:$0xf]  ;;  %v10509_v28 = vld [vmem:[#allocation5 + $0xc2c] sm:$0xf0]  ;;  %v8682_v30 = vor.u32 %v10609_v19, %v8681_v17  ;;  %4968 = vmatpush.bf16.msrb.mxu1 %v8426_v21 }
  0x9c   :  { %v8409_v29 = vld [vmem:[#allocation5 + $0xd20] sm:$0xf]  ;;  %v10541_v31 = vld [vmem:[#allocation5 + $0xd2c] sm:$0xf0]  ;;  %v8282_v39 = vor.u32 %v10509_v28, %v8281_v26  ;;  %4981 = vmatpush.bf16.msrb.mxu2 %v8554_v24  ;;  %v11304_v26 = vpack.c.bf16 %v143_v4, %v143_v4 }
  0x9d   :  { %v8537_v32 = vld [vmem:[#allocation5 + $0xe20] sm:$0xf]  ;;  %v10573_v33 = vld [vmem:[#allocation5 + $0xe2c] sm:$0xf0]  ;;  %v8410_v43 = vor.u32 %v10541_v31, %v8409_v29  ;;  %4994 = vmatpush.bf16.msrb.mxu3 %v8682_v30 }
  0x9e   :  { %v8665_v35 = vld [vmem:[#allocation5 + $0xf20] sm:$0xf]  ;;  %v10605_v36 = vld [vmem:[#allocation5 + $0xf2c] sm:$0xf0]  ;;  %v8538_v44 = vor.u32 %v10573_v33, %v8537_v32  ;;  %4956 = vmatpush.bf16.msrb.mxu0 %v8282_v39 }
  0x9f   :  { %v8265_v41 = vld [vmem:[#allocation5 + $0xc00] sm:$0xf]  ;;  %v10505_v42 = vld [vmem:[#allocation5 + $0xc0c] sm:$0xf0]  ;;  %v8666_v48 = vor.u32 %v10605_v36, %v8665_v35  ;;  %4969 = vmatpush.bf16.msrb.mxu1 %v8410_v43 }
  0xa0   :  { %v8393_v45 = vld [vmem:[#allocation5 + $0xd00] sm:$0xf]  ;;  %v10537_v46 = vld [vmem:[#allocation5 + $0xd0c] sm:$0xf0]  ;;  %v8266_v55 = vor.u32 %v10505_v42, %v8265_v41  ;;  %4982 = vmatpush.bf16.msrb.mxu2 %v8538_v44 }
  0xa1   :  { %v8521_v47 = vld [vmem:[#allocation5 + $0xe00] sm:$0xf]  ;;  %v10569_v49 = vld [vmem:[#allocation5 + $0xe0c] sm:$0xf0]  ;;  %v8394_v59 = vor.u32 %v10537_v46, %v8393_v45  ;;  %4995 = vmatpush.bf16.msrb.mxu3 %v8666_v48 }
  0xa2   :  { %v8649_v50 = vld [vmem:[#allocation5 + $0xf00] sm:$0xf]  ;;  %v10601_v51 = vld [vmem:[#allocation5 + $0xf0c] sm:$0xf0]  ;;  %v8522_v60 = vor.u32 %v10569_v49, %v8521_v47  ;;  %4957 = vmatpush.bf16.msrb.mxu0 %v8266_v55 }
  0xa3   :  { %v8889_v52 = vld [vmem:[#allocation5 + $0x10e0] sm:$0xf]  ;;  %v10661_v53 = vld [vmem:[#allocation5 + $0x10ec] sm:$0xf0]  ;;  %v8650_v0 = vor.u32 %v10601_v51, %v8649_v50  ;;  %4970 = vmatpush.bf16.msrb.mxu1 %v8394_v59 }
  0xa4   :  { %v9017_v54 = vld [vmem:[#allocation5 + $0x11e0] sm:$0xf]  ;;  %v10693_v56 = vld [vmem:[#allocation5 + $0x11ec] sm:$0xf0]  ;;  %v8890_v1 = vor.u32 %v10661_v53, %v8889_v52  ;;  %4983 = vmatpush.bf16.msrb.mxu2 %v8522_v60 }
  0xa5   :  { %v9145_v57 = vld [vmem:[#allocation5 + $0x12e0] sm:$0xf]  ;;  %v10725_v58 = vld [vmem:[#allocation5 + $0x12ec] sm:$0xf0]  ;;  %v9018_v5 = vor.u32 %v10693_v56, %v9017_v54  ;;  %4996 = vmatpush.bf16.msrb.mxu3 %v8650_v0 }
  0xa6   :  { %v9273_v61 = vld [vmem:[#allocation5 + $0x13e0] sm:$0xf]  ;;  %v10757_v62 = vld [vmem:[#allocation5 + $0x13ec] sm:$0xf0]  ;;  %v9146_v6 = vor.u32 %v10725_v58, %v9145_v57  ;;  %5002 = vmatpush.bf16.msra.mxu0 %v8890_v1  ;;  %4971 = vmatmul.bf16.vlgmr.msrb.gmra.mxu1 %v11302_v20 }
  0xa7   :  { %v140_v63 = vld [vmem:[#allocation2 + $0x60] sm:$0xff]  ;;  %v142_v2 = vld [vmem:[#allocation2 + $0x70] sm:$0xff]  ;;  %v9274_v12 = vor.u32 %v10757_v62, %v9273_v61  ;;  %5015 = vmatpush.bf16.msra.mxu1 %v9018_v5 }
  0xa8   :  { %v8873_v7 = vld [vmem:[#allocation5 + $0x10c0] sm:$0xf]  ;;  %v10657_v10 = vld [vmem:[#allocation5 + $0x10cc] sm:$0xf0]  ;;  %v11298_v13 = vpack.c.bf16 %v140_v63, %v140_v63  ;;  %v11300_v19 = vpack.c.bf16 %v142_v2, %v142_v2  ;;  %5028 = vmatpush.bf16.msra.mxu2 %v9146_v6  ;;  %4997 = vmatmul.bf16.vlgmr.msrb.gmra.mxu3 %v11304_v26 }
  0xa9   :  { %v9001_v11 = vld [vmem:[#allocation5 + $0x11c0] sm:$0xf]  ;;  %v10689_v14 = vld [vmem:[#allocation5 + $0x11cc] sm:$0xf0]  ;;  %v8874_v28 = vor.u32 %v10657_v10, %v8873_v7  ;;  %5041 = vmatpush.bf16.msra.mxu3 %v9274_v12 }
  0xaa   :  { %v9129_v16 = vld [vmem:[#allocation5 + $0x12c0] sm:$0xf]  ;;  %v10721_v17 = vld [vmem:[#allocation5 + $0x12cc] sm:$0xf0]  ;;  %v9002_v29 = vor.u32 %v10689_v14, %v9001_v11  ;;  %4958 = vmatmul.bf16.vlgmr.msrb.gmra.mxu0 %v11298_v13  ;;  %4984 = vmatmul.bf16.vlgmr.msrb.gmra.mxu2 %v11300_v19 }
  0xab   :  { %v9257_v21 = vld [vmem:[#allocation5 + $0x13c0] sm:$0xf]  ;;  %v10753_v24 = vld [vmem:[#allocation5 + $0x13cc] sm:$0xf0]  ;;  %v9130_v30 = vor.u32 %v10721_v17, %v9129_v16  ;;  %5003 = vmatpush.bf16.msra.mxu0 %v8874_v28 }
  0xac   :  { %v8857_v31 = vld [vmem:[#allocation5 + $0x10a0] sm:$0xf]  ;;  %v10653_v32 = vld [vmem:[#allocation5 + $0x10ac] sm:$0xf0]  ;;  %v9258_v35 = vor.u32 %v10753_v24, %v9257_v21  ;;  %5016 = vmatpush.bf16.msra.mxu1 %v9002_v29 }
  0xad   :  { %v8985_v33 = vld [vmem:[#allocation5 + $0x11a0] sm:$0xf]  ;;  %v10685_v36 = vld [vmem:[#allocation5 + $0x11ac] sm:$0xf0]  ;;  %v8858_v44 = vor.u32 %v10653_v32, %v8857_v31  ;;  %5029 = vmatpush.bf16.msra.mxu2 %v9130_v30 }
  0xae   :  { %v9113_v39 = vld [vmem:[#allocation5 + $0x12a0] sm:$0xf]  ;;  %v10717_v41 = vld [vmem:[#allocation5 + $0x12ac] sm:$0xf0]  ;;  %v8986_v45 = vor.u32 %v10685_v36, %v8985_v33  ;;  %5042 = vmatpush.bf16.msra.mxu3 %v9258_v35 }
  0xaf   :  { %v9241_v42 = vld [vmem:[#allocation5 + $0x13a0] sm:$0xf]  ;;  %v10749_v43 = vld [vmem:[#allocation5 + $0x13ac] sm:$0xf0]  ;;  %v9114_v46 = vor.u32 %v10717_v41, %v9113_v39  ;;  %5004 = vmatpush.bf16.msra.mxu0 %v8858_v44 }
  0xb0   :  { %v8841_v47 = vld [vmem:[#allocation5 + $0x1080] sm:$0xf]  ;;  %v10649_v48 = vld [vmem:[#allocation5 + $0x108c] sm:$0xf0]  ;;  %v9242_v50 = vor.u32 %v10749_v43, %v9241_v42  ;;  %5017 = vmatpush.bf16.msra.mxu1 %v8986_v45 }
  0xb1   :  { %v8969_v49 = vld [vmem:[#allocation5 + $0x1180] sm:$0xf]  ;;  %v10681_v51 = vld [vmem:[#allocation5 + $0x118c] sm:$0xf0]  ;;  %v8842_v56 = vor.u32 %v10649_v48, %v8841_v47  ;;  %5030 = vmatpush.bf16.msra.mxu2 %v9114_v46 }
  0xb2   :  { %v9097_v52 = vld [vmem:[#allocation5 + $0x1280] sm:$0xf]  ;;  %v10713_v53 = vld [vmem:[#allocation5 + $0x128c] sm:$0xf0]  ;;  %v8970_v57 = vor.u32 %v10681_v51, %v8969_v49  ;;  %5043 = vmatpush.bf16.msra.mxu3 %v9242_v50 }
  0xb3   :  { %v9225_v54 = vld [vmem:[#allocation5 + $0x1380] sm:$0xf]  ;;  %v10745_v55 = vld [vmem:[#allocation5 + $0x138c] sm:$0xf0]  ;;  %v9098_v58 = vor.u32 %v10713_v53, %v9097_v52  ;;  %5005 = vmatpush.bf16.msra.mxu0 %v8842_v56 }
  0xb4   :  { %v8825_v59 = vld [vmem:[#allocation5 + $0x1060] sm:$0xf]  ;;  %v10645_v60 = vld [vmem:[#allocation5 + $0x106c] sm:$0xf0]  ;;  %v9226_v62 = vor.u32 %v10745_v55, %v9225_v54  ;;  %5018 = vmatpush.bf16.msra.mxu1 %v8970_v57 }
  0xb5   :  { %v8953_v61 = vld [vmem:[#allocation5 + $0x1160] sm:$0xf]  ;;  %v10677_v63 = vld [vmem:[#allocation5 + $0x116c] sm:$0xf0]  ;;  %v8826_v4 = vor.u32 %v10645_v60, %v8825_v59  ;;  %5031 = vmatpush.bf16.msra.mxu2 %v9098_v58 }
  0xb6   :  { %v9081_v0 = vld [vmem:[#allocation5 + $0x1260] sm:$0xf]  ;;  %v10709_v1 = vld [vmem:[#allocation5 + $0x126c] sm:$0xf0]  ;;  %v8954_v5 = vor.u32 %v10677_v63, %v8953_v61  ;;  %5044 = vmatpush.bf16.msra.mxu3 %v9226_v62 }
  0xb7   :  { %v9209_v2 = vld [vmem:[#allocation5 + $0x1360] sm:$0xf]  ;;  %v10741_v3 = vld [vmem:[#allocation5 + $0x136c] sm:$0xf0]  ;;  %v9082_v6 = vor.u32 %v10709_v1, %v9081_v0  ;;  %5006 = vmatpush.bf16.msra.mxu0 %v8826_v4 }
  0xb8   :  { %v8809_v7 = vld [vmem:[#allocation5 + $0x1040] sm:$0xf]  ;;  %v10641_v10 = vld [vmem:[#allocation5 + $0x104c] sm:$0xf0]  ;;  %v9210_v12 = vor.u32 %v10741_v3, %v9209_v2  ;;  %5019 = vmatpush.bf16.msra.mxu1 %v8954_v5 }
  0xb9   :  { %v8937_v11 = vld [vmem:[#allocation5 + $0x1140] sm:$0xf]  ;;  %v10673_v14 = vld [vmem:[#allocation5 + $0x114c] sm:$0xf0]  ;;  %v8810_v28 = vor.u32 %v10641_v10, %v8809_v7  ;;  %5032 = vmatpush.bf16.msra.mxu2 %v9082_v6  ;;  %v145_v7 = vld [vmem:[#allocation2 + $0x88] sm:$0xff] }
  0xba   :  { %v9065_v16 = vld [vmem:[#allocation5 + $0x1240] sm:$0xf]  ;;  %v10705_v17 = vld [vmem:[#allocation5 + $0x124c] sm:$0xf0]  ;;  %v8938_v29 = vor.u32 %v10673_v14, %v8937_v11  ;;  %5045 = vmatpush.bf16.msra.mxu3 %v9210_v12  ;;  %v147_v10 = vld [vmem:[#allocation2 + $0x98] sm:$0xff] }
  0xbb   :  { %v9193_v21 = vld [vmem:[#allocation5 + $0x1340] sm:$0xf]  ;;  %v10737_v24 = vld [vmem:[#allocation5 + $0x134c] sm:$0xf0]  ;;  %v9066_v30 = vor.u32 %v10705_v17, %v9065_v16  ;;  %5007 = vmatpush.bf16.msra.mxu0 %v8810_v28 }
  0xbc   :  { %v8793_v31 = vld [vmem:[#allocation5 + $0x1020] sm:$0xf]  ;;  %v10637_v32 = vld [vmem:[#allocation5 + $0x102c] sm:$0xf0]  ;;  %v9194_v35 = vor.u32 %v10737_v24, %v9193_v21  ;;  %5020 = vmatpush.bf16.msra.mxu1 %v8938_v29 }
  0xbd   :  { %v8921_v33 = vld [vmem:[#allocation5 + $0x1120] sm:$0xf]  ;;  %v10669_v36 = vld [vmem:[#allocation5 + $0x112c] sm:$0xf0]  ;;  %v8794_v44 = vor.u32 %v10637_v32, %v8793_v31  ;;  %5033 = vmatpush.bf16.msra.mxu2 %v9066_v30  ;;  %v11314_v32 = vpack.c.bf16 %v145_v7, %v145_v7 }
  0xbe   :  { %v9049_v39 = vld [vmem:[#allocation5 + $0x1220] sm:$0xf]  ;;  %v10701_v41 = vld [vmem:[#allocation5 + $0x122c] sm:$0xf0]  ;;  %v8922_v47 = vor.u32 %v10669_v36, %v8921_v33  ;;  %5046 = vmatpush.bf16.msra.mxu3 %v9194_v35  ;;  %v11316_v36 = vpack.c.bf16 %v147_v10, %v147_v10 }
  0xbf   :  { %v9177_v42 = vld [vmem:[#allocation5 + $0x1320] sm:$0xf]  ;;  %v10733_v43 = vld [vmem:[#allocation5 + $0x132c] sm:$0xf0]  ;;  %v9050_v48 = vor.u32 %v10701_v41, %v9049_v39  ;;  %5008 = vmatpush.bf16.msra.mxu0 %v8794_v44 }
  0xc0   :  { %v8777_v45 = vld [vmem:[#allocation5 + $0x1000] sm:$0xf]  ;;  %v10633_v46 = vld [vmem:[#allocation5 + $0x100c] sm:$0xf0]  ;;  %v9178_v52 = vor.u32 %v10733_v43, %v9177_v42  ;;  %5021 = vmatpush.bf16.msra.mxu1 %v8922_v47 }
  0xc1   :  { %v8905_v49 = vld [vmem:[#allocation5 + $0x1100] sm:$0xf]  ;;  %v10665_v50 = vld [vmem:[#allocation5 + $0x110c] sm:$0xf0]  ;;  %v8778_v59 = vor.u32 %v10633_v46, %v8777_v45  ;;  %5034 = vmatpush.bf16.msra.mxu2 %v9050_v48 }
  0xc2   :  { %v9033_v51 = vld [vmem:[#allocation5 + $0x1200] sm:$0xf]  ;;  %v10697_v53 = vld [vmem:[#allocation5 + $0x120c] sm:$0xf0]  ;;  %v8906_v63 = vor.u32 %v10665_v50, %v8905_v49  ;;  %5047 = vmatpush.bf16.msra.mxu3 %v9178_v52 }
  0xc3   :  { %v9161_v54 = vld [vmem:[#allocation5 + $0x1300] sm:$0xf]  ;;  %v10729_v55 = vld [vmem:[#allocation5 + $0x130c] sm:$0xf0]  ;;  %v9034_v0 = vor.u32 %v10697_v53, %v9033_v51  ;;  %5009 = vmatpush.bf16.msra.mxu0 %v8778_v59 }
  0xc4   :  { %v9401_v56 = vld [vmem:[#allocation5 + $0x14e0] sm:$0xf]  ;;  %v10789_v57 = vld [vmem:[#allocation5 + $0x14ec] sm:$0xf0]  ;;  %v9162_v4 = vor.u32 %v10729_v55, %v9161_v54  ;;  %5022 = vmatpush.bf16.msra.mxu1 %v8906_v63 }
  0xc5   :  { %v9529_v58 = vld [vmem:[#allocation5 + $0x15e0] sm:$0xf]  ;;  %v10821_v60 = vld [vmem:[#allocation5 + $0x15ec] sm:$0xf0]  ;;  %v9402_v5 = vor.u32 %v10789_v57, %v9401_v56  ;;  %5035 = vmatpush.bf16.msra.mxu2 %v9034_v0 }
  0xc6   :  { %v9657_v61 = vld [vmem:[#allocation5 + $0x16e0] sm:$0xf]  ;;  %v10853_v62 = vld [vmem:[#allocation5 + $0x16ec] sm:$0xf0]  ;;  %v9530_v11 = vor.u32 %v10821_v60, %v9529_v58  ;;  %5048 = vmatpush.bf16.msra.mxu3 %v9162_v4 }
  0xc7   :  { %v9785_v1 = vld [vmem:[#allocation5 + $0x17e0] sm:$0xf]  ;;  %v10885_v2 = vld [vmem:[#allocation5 + $0x17ec] sm:$0xf0]  ;;  %v9658_v12 = vor.u32 %v10853_v62, %v9657_v61  ;;  %5054 = vmatpush.bf16.msrb.mxu0 %v9402_v5  ;;  %5023 = vmatmul.bf16.vlgmr.msra.gmra.mxu1 %v11314_v32 }
  0xc8   :  { %v144_v3 = vld [vmem:[#allocation2 + $0x80] sm:$0xff]  ;;  %v146_v6 = vld [vmem:[#allocation2 + $0x90] sm:$0xff]  ;;  %v9786_v21 = vor.u32 %v10885_v2, %v9785_v1  ;;  %5067 = vmatpush.bf16.msrb.mxu1 %v9530_v11 }
  0xc9   :  { %v9385_v14 = vld [vmem:[#allocation5 + $0x14c0] sm:$0xf]  ;;  %v10785_v16 = vld [vmem:[#allocation5 + $0x14cc] sm:$0xf0]  ;;  %v11310_v24 = vpack.c.bf16 %v144_v3, %v144_v3  ;;  %v11312_v31 = vpack.c.bf16 %v146_v6, %v146_v6  ;;  %5080 = vmatpush.bf16.msrb.mxu2 %v9658_v12  ;;  %5049 = vmatmul.bf16.vlgmr.msra.gmra.mxu3 %v11316_v36 }
  0xca   :  { %v9513_v17 = vld [vmem:[#allocation5 + $0x15c0] sm:$0xf]  ;;  %v10817_v28 = vld [vmem:[#allocation5 + $0x15cc] sm:$0xf0]  ;;  %v9386_v39 = vor.u32 %v10785_v16, %v9385_v14  ;;  %5093 = vmatpush.bf16.msrb.mxu3 %v9786_v21 }
  0xcb   :  { %v9641_v29 = vld [vmem:[#allocation5 + $0x16c0] sm:$0xf]  ;;  %v10849_v30 = vld [vmem:[#allocation5 + $0x16cc] sm:$0xf0]  ;;  %v9514_v41 = vor.u32 %v10817_v28, %v9513_v17  ;;  %5010 = vmatmul.bf16.vlgmr.msra.gmra.mxu0 %v11310_v24  ;;  %5036 = vmatmul.bf16.vlgmr.msra.gmra.mxu2 %v11312_v31 }
  0xcc   :  { %v9769_v33 = vld [vmem:[#allocation5 + $0x17c0] sm:$0xf]  ;;  %v10881_v35 = vld [vmem:[#allocation5 + $0x17cc] sm:$0xf0]  ;;  %v9642_v42 = vor.u32 %v10849_v30, %v9641_v29  ;;  %5055 = vmatpush.bf16.msrb.mxu0 %v9386_v39 }
  0xcd   :  { %v9369_v43 = vld [vmem:[#allocation5 + $0x14a0] sm:$0xf]  ;;  %v10781_v44 = vld [vmem:[#allocation5 + $0x14ac] sm:$0xf0]  ;;  %v9770_v46 = vor.u32 %v10881_v35, %v9769_v33  ;;  %5068 = vmatpush.bf16.msrb.mxu1 %v9514_v41  ;;  %v4803_v28 = vpop.f32.mrf.mxu0 }
  0xce   :  { %v9497_v45 = vld [vmem:[#allocation5 + $0x15a0] sm:$0xf]  ;;  %v10813_v47 = vld [vmem:[#allocation5 + $0x15ac] sm:$0xf0]  ;;  %v9370_v52 = vor.u32 %v10781_v44, %v9369_v43  ;;  %5081 = vmatpush.bf16.msrb.mxu2 %v9642_v42 }
  0xcf   :  { %v9625_v48 = vld [vmem:[#allocation5 + $0x16a0] sm:$0xf]  ;;  %v10845_v49 = vld [vmem:[#allocation5 + $0x16ac] sm:$0xf0]  ;;  %v9498_v54 = vor.u32 %v10813_v47, %v9497_v45  ;;  %5094 = vmatpush.bf16.msrb.mxu3 %v9770_v46 }
  0xd0   :  { %v9753_v50 = vld [vmem:[#allocation5 + $0x17a0] sm:$0xf]  ;;  %v10877_v51 = vld [vmem:[#allocation5 + $0x17ac] sm:$0xf0]  ;;  %v9626_v55 = vor.u32 %v10845_v49, %v9625_v48  ;;  %5056 = vmatpush.bf16.msrb.mxu0 %v9370_v52  ;;  %v4816_v49 = vpop.f32.mrf.mxu1 }
  0xd1   :  { %v9353_v53 = vld [vmem:[#allocation5 + $0x1480] sm:$0xf]  ;;  %v10777_v56 = vld [vmem:[#allocation5 + $0x148c] sm:$0xf0]  ;;  %v9754_v59 = vor.u32 %v10877_v51, %v9753_v50  ;;  %5069 = vmatpush.bf16.msrb.mxu1 %v9498_v54 }
  0xd2   :  { %v9481_v57 = vld [vmem:[#allocation5 + $0x1580] sm:$0xf]  ;;  %v10809_v58 = vld [vmem:[#allocation5 + $0x158c] sm:$0xf0]  ;;  %v9354_v1 = vor.u32 %v10777_v56, %v9353_v53  ;;  %5082 = vmatpush.bf16.msrb.mxu2 %v9626_v55 }
  0xd3   :  { %v9609_v60 = vld [vmem:[#allocation5 + $0x1680] sm:$0xf]  ;;  %v10841_v61 = vld [vmem:[#allocation5 + $0x168c] sm:$0xf0]  ;;  %v9482_v3 = vor.u32 %v10809_v58, %v9481_v57  ;;  %5095 = vmatpush.bf16.msrb.mxu3 %v9754_v59 }
  0xd4   :  { %v944_v62 = vld [vmem:[#allocation7] sm:$0xf]  ;;  %v10873_v0 = vld [vmem:[#allocation5 + $0x178c] sm:$0xf0]  ;;  %v9610_v4 = vor.u32 %v10841_v61, %v9609_v60  ;;  %5057 = vmatpush.bf16.msrb.mxu0 %v9354_v1  ;;  %v4829_v60 = vpop.f32.mrf.mxu2 }
  0xd5   :  { %v9737_v63 = vld [vmem:[#allocation5 + $0x1780] sm:$0xf]  ;;  %v10773_v5 = vld [vmem:[#allocation5 + $0x146c] sm:$0xf0]  ;;  %v946_v7 = vperm.slane %v944_v62, 0  ;;  %5070 = vmatpush.bf16.msrb.mxu1 %v9482_v3 }
  0xd6   :  { %v9337_v2 = vld [vmem:[#allocation5 + $0x1460] sm:$0xf]  ;;  %v9738_v10 = vor.u32 %v10873_v0, %v9737_v63  ;;  %v10805_v11 = vld [vmem:[#allocation5 + $0x156c] sm:$0xf0]  ;;  %5083 = vmatpush.bf16.msrb.mxu2 %v9610_v4  ;;  %v4842_v0 = vpop.f32.mrf.mxu3  ;;  %v4805_v4 = vpop.f32.mrf.mxu0 }
  0xd7   :  { %v9465_v6 = vld [vmem:[#allocation5 + $0x1560] sm:$0xf]  ;;  %v10837_v14 = vld [vmem:[#allocation5 + $0x166c] sm:$0xf0]  ;;  %v9338_v21 = vor.u32 %v10773_v5, %v9337_v2  ;;  %v4804_v41 = vadd.f32 %v4803_v28, %v946_v7  ;;  %v10147_v28 = vld [vmem:[#allocation5 + $0xe4] sm:$0xf] }
  0xd8   :  { %v9593_v12 = vld [vmem:[#allocation5 + $0x1660] sm:$0xf]  ;;  %v10869_v17 = vld [vmem:[#allocation5 + $0x176c] sm:$0xf0]  ;;  %v9466_v29 = vor.u32 %v10805_v11, %v9465_v6  ;;  %5096 = vmatpush.bf16.msrb.mxu3 %v9738_v10  ;;  %v7211_v4 = vld [vmem:[#allocation5 + $0x3d0] sm:$0xf0] }
  0xd9   :  { %v9721_v16 = vld [vmem:[#allocation5 + $0x1760] sm:$0xf]  ;;  %v9594_v30 = vor.u32 %v10837_v14, %v9593_v12  ;;  %v10769_v35 = vld [vmem:[#allocation5 + $0x144c] sm:$0xf0]  ;;  %5058 = vmatpush.bf16.msrb.mxu0 %v9338_v21  ;;  %v4817_v55 = vadd.f32 %v4816_v49, %v4804_v41  ;;  %v7099_v41 = vld [vmem:[#allocation5 + $0x2f0] sm:$0xf0] }
  0xda   :  { %v9321_v33 = vld [vmem:[#allocation5 + $0x1440] sm:$0xf]  ;;  %v9722_v42 = vor.u32 %v10869_v17, %v9721_v16  ;;  %v10801_v43 = vld [vmem:[#allocation5 + $0x154c] sm:$0xf0]  ;;  %5071 = vmatpush.bf16.msrb.mxu1 %v9466_v29  ;;  %v6843_v29 = vld [vmem:[#allocation5 + $0xf0] sm:$0xf0] }
  0xdb   :  { %v9449_v39 = vld [vmem:[#allocation5 + $0x1540] sm:$0xf]  ;;  %v10833_v45 = vld [vmem:[#allocation5 + $0x164c] sm:$0xf0]  ;;  %v9322_v48 = vor.u32 %v10769_v35, %v9321_v33  ;;  %5084 = vmatpush.bf16.msrb.mxu2 %v9594_v30  ;;  %v4830_v63 = vadd.f32 %v4829_v60, %v4817_v55  ;;  %v10179_v30 = vld [vmem:[#allocation5 + $0x1e4] sm:$0xf]  ;;  %v6846_v49 = vor.u32 %v10147_v28, %v6843_v29 }
  0xdc   :  { %v9577_v44 = vld [vmem:[#allocation5 + $0x1640] sm:$0xf]  ;;  %v10865_v47 = vld [vmem:[#allocation5 + $0x174c] sm:$0xf0]  ;;  %v9450_v50 = vor.u32 %v10801_v43, %v9449_v39  ;;  %5097 = vmatpush.bf16.msrb.mxu3 %v9722_v42  ;;  %v6971_v35 = vld [vmem:[#allocation5 + $0x1f0] sm:$0xf0]  ;;  %v4818_v42 = vpop.f32.mrf.mxu1 }
  0xdd   :  { %v9705_v46 = vld [vmem:[#allocation5 + $0x1740] sm:$0xf]  ;;  %v9578_v51 = vor.u32 %v10833_v45, %v9577_v44  ;;  %v10765_v53 = vld [vmem:[#allocation5 + $0x142c] sm:$0xf0]  ;;  %5059 = vmatpush.bf16.msrb.mxu0 %v9322_v48  ;;  %v11322_v12 = vadd.f32 %v4842_v0, %v4830_v63  ;;  %v10211_v39 = vld [vmem:[#allocation5 + $0x2e4] sm:$0xf] }
  0xde   :  { %v9305_v52 = vld [vmem:[#allocation5 + $0x1420] sm:$0xf]  ;;  %v9706_v56 = vor.u32 %v10865_v47, %v9705_v46  ;;  %v10797_v57 = vld [vmem:[#allocation5 + $0x152c] sm:$0xf0]  ;;  %5072 = vmatpush.bf16.msrb.mxu1 %v9450_v50  ;;  %v10243_v45 = vld [vmem:[#allocation5 + $0x3e4] sm:$0xf]  ;;  %v7102_v55 = vor.u32 %v10211_v39, %v7099_v41 }
  0xdf   :  { %v9433_v54 = vld [vmem:[#allocation5 + $0x1520] sm:$0xf]  ;;  %v10829_v59 = vld [vmem:[#allocation5 + $0x162c] sm:$0xf0]  ;;  %v9306_v1 = vor.u32 %v10765_v53, %v9305_v52  ;;  %5085 = vmatpush.bf16.msrb.mxu2 %v9578_v51  ;;  %v7227_v46 = vld [vmem:[#allocation5 + $0x3f0] sm:$0xf0]  ;;  %v4831_v53 = vpop.f32.mrf.mxu2 }
  0xe0   :  { %v9561_v58 = vld [vmem:[#allocation5 + $0x1620] sm:$0xf]  ;;  %v10861_v62 = vld [vmem:[#allocation5 + $0x172c] sm:$0xf0]  ;;  %v9434_v5 = vor.u32 %v10797_v57, %v9433_v54  ;;  %5098 = vmatpush.bf16.msrb.mxu3 %v9706_v56  ;;  %v149_v51 = vld [vmem:[#allocation2 + $0xa8] sm:$0xff]  ;;  %v6974_v54 = vor.u32 %v10179_v30, %v6971_v35  ;;  %v7230_v60 = vor.u32 %v10243_v45, %v7227_v46 }
  0xe1   :  { %v9689_v61 = vld [vmem:[#allocation5 + $0x1720] sm:$0xf]  ;;  %v10761_v3 = vld [vmem:[#allocation5 + $0x140c] sm:$0xf0]  ;;  %v9562_v6 = vor.u32 %v10829_v59, %v9561_v58  ;;  %5060 = vmatpush.bf16.msrb.mxu0 %v9306_v1  ;;  %v151_v52 = vld [vmem:[#allocation2 + $0xb8] sm:$0xff]  ;;  %v4844_v59 = vpop.f32.mrf.mxu3 }
  0xe2   :  { %v9289_v2 = vld [vmem:[#allocation5 + $0x1400] sm:$0xf]  ;;  %v10793_v10 = vld [vmem:[#allocation5 + $0x150c] sm:$0xf0]  ;;  %v9690_v14 = vor.u32 %v10861_v62, %v9689_v61  ;;  %5073 = vmatpush.bf16.msrb.mxu1 %v9434_v5  ;;  %v10143_v56 = vld [vmem:[#allocation5 + $0xc4] sm:$0xf]  ;;  %v11330_v5 = vpack.c.bf16 %v151_v52, %v151_v52 }
  0xe3   :  { %v9417_v7 = vld [vmem:[#allocation5 + $0x1500] sm:$0xf]  ;;  %v10825_v16 = vld [vmem:[#allocation5 + $0x160c] sm:$0xf0]  ;;  %v9290_v33 = vor.u32 %v10761_v3, %v9289_v2  ;;  %5086 = vmatpush.bf16.msrb.mxu2 %v9562_v6  ;;  %v6827_v57 = vld [vmem:[#allocation5 + $0xd0] sm:$0xf0]  ;;  %v11328_v2 = vpack.c.bf16 %v149_v51, %v149_v51 }
  0xe4   :  { %v9545_v11 = vld [vmem:[#allocation5 + $0x1600] sm:$0xf]  ;;  %v10857_v21 = vld [vmem:[#allocation5 + $0x170c] sm:$0xf0]  ;;  %v9418_v43 = vor.u32 %v10793_v10, %v9417_v7  ;;  %5099 = vmatpush.bf16.msrb.mxu3 %v9690_v14  ;;  %v10175_v58 = vld [vmem:[#allocation5 + $0x1c4] sm:$0xf]  ;;  %v6830_v6 = vor.u32 %v10143_v56, %v6827_v57  ;;  %v4868_v59 = vpop.f32.mrf.mxu1 }
  0xe5   :  { %v9673_v17 = vld [vmem:[#allocation5 + $0x1700] sm:$0xf]  ;;  %v9546_v44 = vor.u32 %v10825_v16, %v9545_v11  ;;  %v150_v50 = vld [vmem:[#allocation2 + $0xb0] sm:$0xff]  ;;  %5061 = vmatpush.bf16.msrb.mxu0 %v9290_v33  ;;  %v10207_v63 = vld [vmem:[#allocation5 + $0x2c4] sm:$0xf] }
  0xe6   :  { %v148_v47 = vld [vmem:[#allocation2 + $0xa0] sm:$0xff]  ;;  %v9674_v48 = vor.u32 %v10857_v21, %v9673_v17  ;;  %v6955_v62 = vld [vmem:[#allocation5 + $0x1d0] sm:$0xf0]  ;;  %5074 = vmatpush.bf16.msrb.mxu1 %v9418_v43  ;;  %v11326_v1 = vpack.c.bf16 %v150_v50, %v150_v50  ;;  %v4855_v52 = vpop.f32.mrf.mxu0 }
  0xe7   :  { %v11324_v61 = vpack.c.bf16 %v148_v47, %v148_v47  ;;  %v7083_v0 = vld [vmem:[#allocation5 + $0x2d0] sm:$0xf0]  ;;  %5087 = vmatpush.bf16.msrb.mxu2 %v9546_v44  ;;  %v10239_v3 = vld [vmem:[#allocation5 + $0x3c4] sm:$0xf]  ;;  %v6958_v7 = vor.u32 %v10175_v58, %v6955_v62  ;;  %v4856_v58 = vadd.f32 %v4855_v52, %v11322_v12 }
  0xe8   :  { %5100 = vmatpush.bf16.msrb.mxu3 %v9674_v48  ;;  %v7086_v10 = vor.u32 %v10207_v63, %v7083_v0  ;;  %v10139_v11 = vld [vmem:[#allocation5 + $0xa4] sm:$0xf]  ;;  %v6811_v14 = vld [vmem:[#allocation5 + $0xb0] sm:$0xf0]  ;;  %v7214_v17 = vor.u32 %v10239_v3, %v7211_v4 }
  0xe9   :  { %5106 = vmatpush.bf16.msra.mxu0 %v6846_v49  ;;  %v10171_v16 = vld [vmem:[#allocation5 + $0x1a4] sm:$0xf]  ;;  %v6939_v21 = vld [vmem:[#allocation5 + $0x1b0] sm:$0xf0]  ;;  %5075 = vmatmul.bf16.vlgmr.msrb.gmra.mxu1 %v11328_v2  ;;  %v6814_v35 = vor.u32 %v10139_v11, %v6811_v14 }
  0xea   :  { %5119 = vmatpush.bf16.msra.mxu1 %v6974_v54  ;;  %5062 = vmatmul.bf16.vlgmr.msrb.gmra.mxu0 %v11324_v61  ;;  %v10203_v28 = vld [vmem:[#allocation5 + $0x2a4] sm:$0xf]  ;;  %v7067_v29 = vld [vmem:[#allocation5 + $0x2b0] sm:$0xf0]  ;;  %v6942_v39 = vor.u32 %v10171_v16, %v6939_v21 }
  0xeb   :  { %5132 = vmatpush.bf16.msra.mxu2 %v7102_v55  ;;  %v10235_v30 = vld [vmem:[#allocation5 + $0x3a4] sm:$0xf]  ;;  %v7195_v33 = vld [vmem:[#allocation5 + $0x3b0] sm:$0xf0]  ;;  %5101 = vmatmul.bf16.vlgmr.msrb.gmra.mxu3 %v11330_v5  ;;  %v7070_v41 = vor.u32 %v10203_v28, %v7067_v29  ;;  %v4881_v21 = vpop.f32.mrf.mxu2 }
  0xec   :  { %5145 = vmatpush.bf16.msra.mxu3 %v7230_v60  ;;  %5088 = vmatmul.bf16.vlgmr.msrb.gmra.mxu2 %v11326_v1  ;;  %v10135_v42 = vld [vmem:[#allocation5 + $0x84] sm:$0xf]  ;;  %v6795_v43 = vld [vmem:[#allocation5 + $0x90] sm:$0xf0]  ;;  %v7198_v45 = vor.u32 %v10235_v30, %v7195_v33 }
  0xed   :  { %5107 = vmatpush.bf16.msra.mxu0 %v6830_v6  ;;  %v10167_v44 = vld [vmem:[#allocation5 + $0x184] sm:$0xf]  ;;  %v6923_v46 = vld [vmem:[#allocation5 + $0x190] sm:$0xf0]  ;;  %v6798_v51 = vor.u32 %v10135_v42, %v6795_v43  ;;  %v4869_v6 = vadd.f32 %v4868_v59, %v4856_v58 }
  0xee   :  { %5120 = vmatpush.bf16.msra.mxu1 %v6958_v7  ;;  %v10199_v47 = vld [vmem:[#allocation5 + $0x284] sm:$0xf]  ;;  %v7051_v48 = vld [vmem:[#allocation5 + $0x290] sm:$0xf0]  ;;  %v6926_v53 = vor.u32 %v10167_v44, %v6923_v46  ;;  %v4857_v44 = vpop.f32.mrf.mxu0 }
  0xef   :  { %5133 = vmatpush.bf16.msra.mxu2 %v7086_v10  ;;  %v10231_v49 = vld [vmem:[#allocation5 + $0x384] sm:$0xf]  ;;  %v7179_v50 = vld [vmem:[#allocation5 + $0x390] sm:$0xf0]  ;;  %v7054_v54 = vor.u32 %v10199_v47, %v7051_v48  ;;  %v4882_v33 = vadd.f32 %v4881_v21, %v4869_v6 }
  0xf0   :  { %5146 = vmatpush.bf16.msra.mxu3 %v7214_v17  ;;  %v10131_v55 = vld [vmem:[#allocation5 + $0x64] sm:$0xf]  ;;  %v6779_v56 = vld [vmem:[#allocation5 + $0x70] sm:$0xf0]  ;;  %v7182_v60 = vor.u32 %v10231_v49, %v7179_v50  ;;  %v4870_v50 = vpop.f32.mrf.mxu1 }
  0xf1   :  { %5108 = vmatpush.bf16.msra.mxu0 %v6814_v35  ;;  %v10163_v57 = vld [vmem:[#allocation5 + $0x164] sm:$0xf]  ;;  %v6907_v62 = vld [vmem:[#allocation5 + $0x170] sm:$0xf0]  ;;  %v6782_v7 = vor.u32 %v10131_v55, %v6779_v56  ;;  %v4894_v35 = vpop.f32.mrf.mxu3 }
  0xf2   :  { %5121 = vmatpush.bf16.msra.mxu1 %v6942_v39  ;;  %v10195_v63 = vld [vmem:[#allocation5 + $0x264] sm:$0xf]  ;;  %v7035_v0 = vld [vmem:[#allocation5 + $0x270] sm:$0xf0]  ;;  %v6910_v10 = vor.u32 %v10163_v57, %v6907_v62  ;;  %v11337_v43 = vadd.f32 %v4894_v35, %v4882_v33 }
  0xf3   :  { %5134 = vmatpush.bf16.msra.mxu2 %v7070_v41  ;;  %v10227_v3 = vld [vmem:[#allocation5 + $0x364] sm:$0xf]  ;;  %v7163_v4 = vld [vmem:[#allocation5 + $0x370] sm:$0xf0]  ;;  %v7038_v11 = vor.u32 %v10195_v63, %v7035_v0 }
  0xf4   :  { %5147 = vmatpush.bf16.msra.mxu3 %v7198_v45  ;;  %v10127_v14 = vld [vmem:[#allocation5 + $0x44] sm:$0xf]  ;;  %v6763_v16 = vld [vmem:[#allocation5 + $0x50] sm:$0xf0]  ;;  %v7166_v12 = vor.u32 %v10227_v3, %v7163_v4  ;;  %v4883_v4 = vpop.f32.mrf.mxu2 }
  0xf5   :  { %5109 = vmatpush.bf16.msra.mxu0 %v6798_v51  ;;  %v10159_v17 = vld [vmem:[#allocation5 + $0x144] sm:$0xf]  ;;  %v6891_v28 = vld [vmem:[#allocation5 + $0x150] sm:$0xf0]  ;;  %v6766_v42 = vor.u32 %v10127_v14, %v6763_v16 }
  0xf6   :  { %5122 = vmatpush.bf16.msra.mxu1 %v6926_v53  ;;  %v10191_v29 = vld [vmem:[#allocation5 + $0x244] sm:$0xf]  ;;  %v7019_v30 = vld [vmem:[#allocation5 + $0x250] sm:$0xf0]  ;;  %v6894_v45 = vor.u32 %v10159_v17, %v6891_v28 }
  0xf7   :  { %5135 = vmatpush.bf16.msra.mxu2 %v7054_v54  ;;  %v10223_v39 = vld [vmem:[#allocation5 + $0x344] sm:$0xf]  ;;  %v7147_v41 = vld [vmem:[#allocation5 + $0x350] sm:$0xf0]  ;;  %v7022_v46 = vor.u32 %v10191_v29, %v7019_v30 }
  0xf8   :  { %5148 = vmatpush.bf16.msra.mxu3 %v7182_v60  ;;  %v10123_v47 = vld [vmem:[#allocation5 + $0x24] sm:$0xf]  ;;  %v6747_v48 = vld [vmem:[#allocation5 + $0x30] sm:$0xf0]  ;;  %v7150_v51 = vor.u32 %v10223_v39, %v7147_v41 }
  0xf9   :  { %5110 = vmatpush.bf16.msra.mxu0 %v6782_v7  ;;  %v10155_v49 = vld [vmem:[#allocation5 + $0x124] sm:$0xf]  ;;  %v6875_v52 = vld [vmem:[#allocation5 + $0x130] sm:$0xf0]  ;;  %v6750_v57 = vor.u32 %v10123_v47, %v6747_v48  ;;  %v4896_v14 = vpop.f32.mrf.mxu3 }
  0xfa   :  { %5123 = vmatpush.bf16.msra.mxu1 %v6910_v10  ;;  %v10187_v53 = vld [vmem:[#allocation5 + $0x224] sm:$0xf]  ;;  %v7003_v54 = vld [vmem:[#allocation5 + $0x230] sm:$0xf0]  ;;  %v6878_v60 = vor.u32 %v10155_v49, %v6875_v52 }
  0xfb   :  { %5136 = vmatpush.bf16.msra.mxu2 %v7038_v11  ;;  %v10219_v55 = vld [vmem:[#allocation5 + $0x324] sm:$0xf]  ;;  %v7131_v56 = vld [vmem:[#allocation5 + $0x330] sm:$0xf0]  ;;  %v7006_v62 = vor.u32 %v10187_v53, %v7003_v54 }
  0xfc   :  { %5149 = vmatpush.bf16.msra.mxu3 %v7166_v12  ;;  %v10119_v58 = vld [vmem:[#allocation5 + $0x4] sm:$0xf]  ;;  %v6731_v59 = vld [vmem:[#allocation5 + $0x10] sm:$0xf0]  ;;  %v7134_v6 = vor.u32 %v10219_v55, %v7131_v56 }
  0xfd   :  { %5111 = vmatpush.bf16.msra.mxu0 %v6766_v42  ;;  %v10151_v63 = vld [vmem:[#allocation5 + $0x104] sm:$0xf]  ;;  %v6859_v0 = vld [vmem:[#allocation5 + $0x110] sm:$0xf0]  ;;  %v6734_v12 = vor.u32 %v10119_v58, %v6731_v59 }
  0xfe   :  { %5124 = vmatpush.bf16.msra.mxu1 %v6894_v45  ;;  %v10183_v3 = vld [vmem:[#allocation5 + $0x204] sm:$0xf]  ;;  %v6987_v7 = vld [vmem:[#allocation5 + $0x210] sm:$0xf0]  ;;  %v6862_v33 = vor.u32 %v10151_v63, %v6859_v0 }
  0xff   :  { %5137 = vmatpush.bf16.msra.mxu2 %v7022_v46  ;;  %v10215_v10 = vld [vmem:[#allocation5 + $0x304] sm:$0xf]  ;;  %v7115_v11 = vld [vmem:[#allocation5 + $0x310] sm:$0xf0]  ;;  %v6990_v35 = vor.u32 %v10183_v3, %v6987_v7 }
 0x100   :  { %5150 = vmatpush.bf16.msra.mxu3 %v7150_v51  ;;  %v10275_v16 = vld [vmem:[#allocation5 + $0x4e4] sm:$0xf]  ;;  %v7355_v17 = vld [vmem:[#allocation5 + $0x4f0] sm:$0xf0]  ;;  %v7118_v42 = vor.u32 %v10215_v10, %v7115_v11 }
 0x101   :  { %v10307_v21 = vld [vmem:[#allocation5 + $0x5e4] sm:$0xf]  ;;  %5112 = vmatpush.bf16.msra.mxu0 %v6750_v57  ;;  %v7483_v28 = vld [vmem:[#allocation5 + $0x5f0] sm:$0xf0]  ;;  %v7358_v44 = vor.u32 %v10275_v16, %v7355_v17 }
 0x102   :  { %v10339_v29 = vld [vmem:[#allocation5 + $0x6e4] sm:$0xf]  ;;  %v7611_v30 = vld [vmem:[#allocation5 + $0x6f0] sm:$0xf0]  ;;  %5125 = vmatpush.bf16.msra.mxu1 %v6878_v60  ;;  %v7486_v45 = vor.u32 %v10307_v21, %v7483_v28 }
 0x103   :  { %5138 = vmatpush.bf16.msra.mxu2 %v7006_v62  ;;  %v10371_v39 = vld [vmem:[#allocation5 + $0x7e4] sm:$0xf]  ;;  %v7739_v41 = vld [vmem:[#allocation5 + $0x7f0] sm:$0xf0]  ;;  %v7614_v46 = vor.u32 %v10339_v29, %v7611_v30 }
 0x104   :  { %5151 = vmatpush.bf16.msra.mxu3 %v7134_v6  ;;  %v10271_v47 = vld [vmem:[#allocation5 + $0x4c4] sm:$0xf]  ;;  %v7339_v48 = vld [vmem:[#allocation5 + $0x4d0] sm:$0xf0]  ;;  %v7742_v50 = vor.u32 %v10371_v39, %v7739_v41 }
 0x105   :  { %v10303_v49 = vld [vmem:[#allocation5 + $0x5c4] sm:$0xf]  ;;  %5113 = vmatpush.bf16.msra.mxu0 %v6734_v12  ;;  %v7467_v51 = vld [vmem:[#allocation5 + $0x5d0] sm:$0xf0]  ;;  %v7342_v56 = vor.u32 %v10271_v47, %v7339_v48 }
 0x106   :  { %v10335_v52 = vld [vmem:[#allocation5 + $0x6c4] sm:$0xf]  ;;  %v7595_v53 = vld [vmem:[#allocation5 + $0x6d0] sm:$0xf0]  ;;  %5126 = vmatpush.bf16.msra.mxu1 %v6862_v33  ;;  %v7470_v57 = vor.u32 %v10303_v49, %v7467_v51  ;;  %v4907_v33 = vpop.f32.mrf.mxu0 }
 0x107   :  { %5139 = vmatpush.bf16.msra.mxu2 %v6990_v35  ;;  %v10367_v54 = vld [vmem:[#allocation5 + $0x7c4] sm:$0xf]  ;;  %v7723_v55 = vld [vmem:[#allocation5 + $0x7d0] sm:$0xf0]  ;;  %v7598_v58 = vor.u32 %v10335_v52, %v7595_v53  ;;  %v4908_v41 = vadd.f32 %v4907_v33, %v11337_v43 }
 0x108   :  { %5152 = vmatpush.bf16.msra.mxu3 %v7118_v42  ;;  %v10267_v59 = vld [vmem:[#allocation5 + $0x4a4] sm:$0xf]  ;;  %v7323_v60 = vld [vmem:[#allocation5 + $0x4b0] sm:$0xf0]  ;;  %v7726_v63 = vor.u32 %v10367_v54, %v7723_v55  ;;  %5114 = vmatmul.bf16.vlgmr.msra.gmra.mxu0 %v11264_v9 }
 0x109   :  { %5158 = vmatpush.bf16.msrb.mxu0 %v7358_v44  ;;  %v10299_v62 = vld [vmem:[#allocation5 + $0x5a4] sm:$0xf]  ;;  %v7451_v0 = vld [vmem:[#allocation5 + $0x5b0] sm:$0xf0]  ;;  %v7326_v10 = vor.u32 %v10267_v59, %v7323_v60  ;;  %5127 = vmatmul.bf16.vlgmr.msra.gmra.mxu1 %v11271_v25  ;;  %v4920_v44 = vpop.f32.mrf.mxu1 }
 0x10a   :  { %5171 = vmatpush.bf16.msrb.mxu1 %v7486_v45  ;;  %v10331_v3 = vld [vmem:[#allocation5 + $0x6a4] sm:$0xf]  ;;  %v7579_v4 = vld [vmem:[#allocation5 + $0x6b0] sm:$0xf0]  ;;  %5140 = vmatmul.bf16.vlgmr.msra.gmra.mxu2 %v11262_v8  ;;  %v7454_v11 = vor.u32 %v10299_v62, %v7451_v0  ;;  %v4921_v51 = vadd.f32 %v4920_v44, %v4908_v41 }
 0x10b   :  { %5184 = vmatpush.bf16.msrb.mxu2 %v7614_v46  ;;  %v10363_v6 = vld [vmem:[#allocation5 + $0x7a4] sm:$0xf]  ;;  %v7707_v7 = vld [vmem:[#allocation5 + $0x7b0] sm:$0xf0]  ;;  %5153 = vmatmul.bf16.vlgmr.msra.gmra.mxu3 %v11266_v15  ;;  %v7582_v14 = vor.u32 %v10331_v3, %v7579_v4 }
 0x10c   :  { %5197 = vmatpush.bf16.msrb.mxu3 %v7742_v50  ;;  %v10263_v16 = vld [vmem:[#allocation5 + $0x484] sm:$0xf]  ;;  %v7307_v17 = vld [vmem:[#allocation5 + $0x490] sm:$0xf0]  ;;  %v7710_v12 = vor.u32 %v10363_v6, %v7707_v7  ;;  %v4933_v0 = vpop.f32.mrf.mxu2 }
 0x10d   :  { %5159 = vmatpush.bf16.msrb.mxu0 %v7342_v56  ;;  %v10295_v21 = vld [vmem:[#allocation5 + $0x584] sm:$0xf]  ;;  %v7435_v28 = vld [vmem:[#allocation5 + $0x590] sm:$0xf0]  ;;  %v7310_v42 = vor.u32 %v10263_v16, %v7307_v17  ;;  %v4934_v7 = vadd.f32 %v4933_v0, %v4921_v51 }
 0x10e   :  { %5172 = vmatpush.bf16.msrb.mxu1 %v7470_v57  ;;  %v10327_v29 = vld [vmem:[#allocation5 + $0x684] sm:$0xf]  ;;  %v7563_v30 = vld [vmem:[#allocation5 + $0x690] sm:$0xf0]  ;;  %v7438_v45 = vor.u32 %v10295_v21, %v7435_v28  ;;  %v4909_v16 = vpop.f32.mrf.mxu0 }
 0x10f   :  { %5185 = vmatpush.bf16.msrb.mxu2 %v7598_v58  ;;  %v10359_v35 = vld [vmem:[#allocation5 + $0x784] sm:$0xf]  ;;  %v7691_v39 = vld [vmem:[#allocation5 + $0x790] sm:$0xf0]  ;;  %v7566_v46 = vor.u32 %v10327_v29, %v7563_v30 }
 0x110   :  { %5198 = vmatpush.bf16.msrb.mxu3 %v7726_v63  ;;  %v10259_v47 = vld [vmem:[#allocation5 + $0x464] sm:$0xf]  ;;  %v7291_v48 = vld [vmem:[#allocation5 + $0x470] sm:$0xf0]  ;;  %v7694_v50 = vor.u32 %v10359_v35, %v7691_v39 }
 0x111   :  { %5160 = vmatpush.bf16.msrb.mxu0 %v7326_v10  ;;  %v10291_v49 = vld [vmem:[#allocation5 + $0x564] sm:$0xf]  ;;  %v7419_v52 = vld [vmem:[#allocation5 + $0x570] sm:$0xf0]  ;;  %v7294_v57 = vor.u32 %v10259_v47, %v7291_v48  ;;  %v4946_v10 = vpop.f32.mrf.mxu3  ;;  %v4922_v21 = vpop.f32.mrf.mxu1 }
 0x112   :  { %5173 = vmatpush.bf16.msrb.mxu1 %v7454_v11  ;;  %v10323_v53 = vld [vmem:[#allocation5 + $0x664] sm:$0xf]  ;;  %v7547_v54 = vld [vmem:[#allocation5 + $0x670] sm:$0xf0]  ;;  %v7422_v43 = vor.u32 %v10291_v49, %v7419_v52 }
 0x113   :  { %5186 = vmatpush.bf16.msrb.mxu2 %v7582_v14  ;;  %v10355_v55 = vld [vmem:[#allocation5 + $0x764] sm:$0xf]  ;;  %v7675_v56 = vld [vmem:[#allocation5 + $0x770] sm:$0xf0]  ;;  %v7550_v58 = vor.u32 %v10323_v53, %v7547_v54 }
 0x114   :  { %5199 = vmatpush.bf16.msrb.mxu3 %v7710_v12  ;;  %v10255_v59 = vld [vmem:[#allocation5 + $0x444] sm:$0xf]  ;;  %v7275_v60 = vld [vmem:[#allocation5 + $0x450] sm:$0xf0]  ;;  %v7678_v63 = vor.u32 %v10355_v55, %v7675_v56  ;;  %v11344_v12 = vadd.f32 %v4946_v10, %v4934_v7 }
 0x115   :  { %5161 = vmatpush.bf16.msrb.mxu0 %v7310_v42  ;;  %v10287_v62 = vld [vmem:[#allocation5 + $0x544] sm:$0xf]  ;;  %v7403_v3 = vld [vmem:[#allocation5 + $0x550] sm:$0xf0]  ;;  %v7278_v17 = vor.u32 %v10255_v59, %v7275_v60 }
 0x116   :  { %5174 = vmatpush.bf16.msrb.mxu1 %v7438_v45  ;;  %v10319_v4 = vld [vmem:[#allocation5 + $0x644] sm:$0xf]  ;;  %v7531_v6 = vld [vmem:[#allocation5 + $0x650] sm:$0xf0]  ;;  %v7406_v28 = vor.u32 %v10287_v62, %v7403_v3 }
 0x117   :  { %5187 = vmatpush.bf16.msrb.mxu2 %v7566_v46  ;;  %v10351_v11 = vld [vmem:[#allocation5 + $0x744] sm:$0xf]  ;;  %v7659_v14 = vld [vmem:[#allocation5 + $0x750] sm:$0xf0]  ;;  %v7534_v29 = vor.u32 %v10319_v4, %v7531_v6 }
 0x118   :  { %5200 = vmatpush.bf16.msrb.mxu3 %v7694_v50  ;;  %v10251_v30 = vld [vmem:[#allocation5 + $0x424] sm:$0xf]  ;;  %v7259_v33 = vld [vmem:[#allocation5 + $0x430] sm:$0xf0]  ;;  %v7662_v39 = vor.u32 %v10351_v11, %v7659_v14 }
 0x119   :  { %5162 = vmatpush.bf16.msrb.mxu0 %v7294_v57  ;;  %v10283_v35 = vld [vmem:[#allocation5 + $0x524] sm:$0xf]  ;;  %v7387_v41 = vld [vmem:[#allocation5 + $0x530] sm:$0xf0]  ;;  %v7262_v47 = vor.u32 %v10251_v30, %v7259_v33 }
 0x11a   :  { %5175 = vmatpush.bf16.msrb.mxu1 %v7422_v43  ;;  %v10315_v42 = vld [vmem:[#allocation5 + $0x624] sm:$0xf]  ;;  %v7515_v44 = vld [vmem:[#allocation5 + $0x630] sm:$0xf0]  ;;  %v7390_v50 = vor.u32 %v10283_v35, %v7387_v41 }
 0x11b   :  { %5188 = vmatpush.bf16.msrb.mxu2 %v7550_v58  ;;  %v10347_v45 = vld [vmem:[#allocation5 + $0x724] sm:$0xf]  ;;  %v7643_v46 = vld [vmem:[#allocation5 + $0x730] sm:$0xf0]  ;;  %v7518_v51 = vor.u32 %v10315_v42, %v7515_v44  ;;  %v4935_v58 = vpop.f32.mrf.mxu2 }
 0x11c   :  { %5201 = vmatpush.bf16.msrb.mxu3 %v7678_v63  ;;  %v10247_v48 = vld [vmem:[#allocation5 + $0x404] sm:$0xf]  ;;  %v7243_v49 = vld [vmem:[#allocation5 + $0x410] sm:$0xf0]  ;;  %v7646_v55 = vor.u32 %v10347_v45, %v7643_v46  ;;  %v4948_v63 = vpop.f32.mrf.mxu3 }
 0x11d   :  { %5163 = vmatpush.bf16.msrb.mxu0 %v7278_v17  ;;  %v10279_v52 = vld [vmem:[#allocation5 + $0x504] sm:$0xf]  ;;  %v7371_v53 = vld [vmem:[#allocation5 + $0x510] sm:$0xf0]  ;;  %v7246_v0 = vor.u32 %v10247_v48, %v7243_v49 }
 0x11e   :  { %5176 = vmatpush.bf16.msrb.mxu1 %v7406_v28  ;;  %v10311_v54 = vld [vmem:[#allocation5 + $0x604] sm:$0xf]  ;;  %v7499_v56 = vld [vmem:[#allocation5 + $0x610] sm:$0xf0]  ;;  %v7374_v7 = vor.u32 %v10279_v52, %v7371_v53 }
 0x11f   :  { %5189 = vmatpush.bf16.msrb.mxu2 %v7534_v29  ;;  %v10343_v57 = vld [vmem:[#allocation5 + $0x704] sm:$0xf]  ;;  %v7627_v43 = vld [vmem:[#allocation5 + $0x710] sm:$0xf0]  ;;  %v7502_v10 = vor.u32 %v10311_v54, %v7499_v56 }
 0x120   :  { %5202 = vmatpush.bf16.msrb.mxu3 %v7662_v39  ;;  %v10403_v59 = vld [vmem:[#allocation5 + $0x8e4] sm:$0xf]  ;;  %v7867_v60 = vld [vmem:[#allocation5 + $0x8f0] sm:$0xf0]  ;;  %v7630_v16 = vor.u32 %v10343_v57, %v7627_v43 }
 0x121   :  { %v10435_v62 = vld [vmem:[#allocation5 + $0x9e4] sm:$0xf]  ;;  %5164 = vmatpush.bf16.msrb.mxu0 %v7262_v47  ;;  %v7995_v3 = vld [vmem:[#allocation5 + $0x9f0] sm:$0xf0]  ;;  %v7870_v17 = vor.u32 %v10403_v59, %v7867_v60 }
 0x122   :  { %v10467_v4 = vld [vmem:[#allocation5 + $0xae4] sm:$0xf]  ;;  %v8123_v6 = vld [vmem:[#allocation5 + $0xaf0] sm:$0xf0]  ;;  %5177 = vmatpush.bf16.msrb.mxu1 %v7390_v50  ;;  %v7998_v21 = vor.u32 %v10435_v62, %v7995_v3 }
 0x123   :  { %5190 = vmatpush.bf16.msrb.mxu2 %v7518_v51  ;;  %v10499_v11 = vld [vmem:[#allocation5 + $0xbe4] sm:$0xf]  ;;  %v8251_v14 = vld [vmem:[#allocation5 + $0xbf0] sm:$0xf0]  ;;  %v8126_v28 = vor.u32 %v10467_v4, %v8123_v6 }
 0x124   :  { %5203 = vmatpush.bf16.msrb.mxu3 %v7646_v55  ;;  %v10399_v29 = vld [vmem:[#allocation5 + $0x8c4] sm:$0xf]  ;;  %v7851_v30 = vld [vmem:[#allocation5 + $0x8d0] sm:$0xf0]  ;;  %v8254_v35 = vor.u32 %v10499_v11, %v8251_v14 }
 0x125   :  { %v10431_v33 = vld [vmem:[#allocation5 + $0x9c4] sm:$0xf]  ;;  %5165 = vmatpush.bf16.msrb.mxu0 %v7246_v0  ;;  %v7979_v39 = vld [vmem:[#allocation5 + $0x9d0] sm:$0xf0]  ;;  %v7854_v46 = vor.u32 %v10399_v29, %v7851_v30 }
 0x126   :  { %v10463_v41 = vld [vmem:[#allocation5 + $0xac4] sm:$0xf]  ;;  %v8107_v42 = vld [vmem:[#allocation5 + $0xad0] sm:$0xf0]  ;;  %5178 = vmatpush.bf16.msrb.mxu1 %v7374_v7  ;;  %v7982_v47 = vor.u32 %v10431_v33, %v7979_v39 }
 0x127   :  { %5191 = vmatpush.bf16.msrb.mxu2 %v7502_v10  ;;  %v10495_v44 = vld [vmem:[#allocation5 + $0xbc4] sm:$0xf]  ;;  %v8235_v45 = vld [vmem:[#allocation5 + $0xbd0] sm:$0xf0]  ;;  %v8110_v48 = vor.u32 %v10463_v41, %v8107_v42  ;;  %v4959_v7 = vpop.f32.mrf.mxu0 }
 0x128   :  { %5204 = vmatpush.bf16.msrb.mxu3 %v7630_v16  ;;  %v10395_v49 = vld [vmem:[#allocation5 + $0x8a4] sm:$0xf]  ;;  %v7835_v50 = vld [vmem:[#allocation5 + $0x8b0] sm:$0xf0]  ;;  %v8238_v52 = vor.u32 %v10495_v44, %v8235_v45  ;;  %5166 = vmatmul.bf16.vlgmr.msrb.gmra.mxu0 %v11276_v37  ;;  %v4960_v14 = vadd.f32 %v4959_v7, %v11344_v12 }
 0x129   :  { %5210 = vmatpush.bf16.msra.mxu0 %v7870_v17  ;;  %v10427_v51 = vld [vmem:[#allocation5 + $0x9a4] sm:$0xf]  ;;  %v7963_v53 = vld [vmem:[#allocation5 + $0x9b0] sm:$0xf0]  ;;  %v7838_v43 = vor.u32 %v10395_v49, %v7835_v50  ;;  %5179 = vmatmul.bf16.vlgmr.msrb.gmra.mxu1 %v11280_v40  ;;  %v4972_v17 = vpop.f32.mrf.mxu1 }
 0x12a   :  { %5223 = vmatpush.bf16.msra.mxu1 %v7998_v21  ;;  %5192 = vmatmul.bf16.vlgmr.msrb.gmra.mxu2 %v11274_v34  ;;  %v10459_v54 = vld [vmem:[#allocation5 + $0xaa4] sm:$0xf]  ;;  %v8091_v55 = vld [vmem:[#allocation5 + $0xab0] sm:$0xf0]  ;;  %v7966_v58 = vor.u32 %v10427_v51, %v7963_v53  ;;  %v4973_v39 = vadd.f32 %v4972_v17, %v4960_v14 }
 0x12b   :  { %5236 = vmatpush.bf16.msra.mxu2 %v8126_v28  ;;  %v10491_v56 = vld [vmem:[#allocation5 + $0xba4] sm:$0xf]  ;;  %v8219_v57 = vld [vmem:[#allocation5 + $0xbb0] sm:$0xf0]  ;;  %5205 = vmatmul.bf16.vlgmr.msrb.gmra.mxu3 %v11278_v38  ;;  %v8094_v59 = vor.u32 %v10459_v54, %v8091_v55 }
 0x12c   :  { %5249 = vmatpush.bf16.msra.mxu3 %v8254_v35  ;;  %v10391_v60 = vld [vmem:[#allocation5 + $0x884] sm:$0xf]  ;;  %v7819_v62 = vld [vmem:[#allocation5 + $0x890] sm:$0xf0]  ;;  %v8222_v0 = vor.u32 %v10491_v56, %v8219_v57 }
 0x12d   :  { %5211 = vmatpush.bf16.msra.mxu0 %v7854_v46  ;;  %v10423_v63 = vld [vmem:[#allocation5 + $0x984] sm:$0xf]  ;;  %v7947_v3 = vld [vmem:[#allocation5 + $0x990] sm:$0xf0]  ;;  %v7822_v16 = vor.u32 %v10391_v60, %v7819_v62  ;;  %v4985_v53 = vpop.f32.mrf.mxu2 }
 0x12e   :  { %5224 = vmatpush.bf16.msra.mxu1 %v7982_v47  ;;  %v10455_v4 = vld [vmem:[#allocation5 + $0xa84] sm:$0xf]  ;;  %v8075_v6 = vld [vmem:[#allocation5 + $0xa90] sm:$0xf0]  ;;  %v7950_v21 = vor.u32 %v10423_v63, %v7947_v3  ;;  %v4986_v57 = vadd.f32 %v4985_v53, %v4973_v39 }
 0x12f   :  { %5237 = vmatpush.bf16.msra.mxu2 %v8110_v48  ;;  %v10487_v10 = vld [vmem:[#allocation5 + $0xb84] sm:$0xf]  ;;  %v8203_v11 = vld [vmem:[#allocation5 + $0xb90] sm:$0xf0]  ;;  %v8078_v28 = vor.u32 %v10455_v4, %v8075_v6  ;;  %v4961_v60 = vpop.f32.mrf.mxu0 }
 0x130   :  { %5250 = vmatpush.bf16.msra.mxu3 %v8238_v52  ;;  %v10387_v29 = vld [vmem:[#allocation5 + $0x864] sm:$0xf]  ;;  %v7803_v30 = vld [vmem:[#allocation5 + $0x870] sm:$0xf0]  ;;  %v8206_v35 = vor.u32 %v10487_v10, %v8203_v11 }
 0x131   :  { %5212 = vmatpush.bf16.msra.mxu0 %v7838_v43  ;;  %v10419_v33 = vld [vmem:[#allocation5 + $0x964] sm:$0xf]  ;;  %v7931_v41 = vld [vmem:[#allocation5 + $0x970] sm:$0xf0]  ;;  %v7806_v47 = vor.u32 %v10387_v29, %v7803_v30  ;;  %v4998_v43 = vpop.f32.mrf.mxu3  ;;  %v4974_v63 = vpop.f32.mrf.mxu1 }
 0x132   :  { %5225 = vmatpush.bf16.msra.mxu1 %v7966_v58  ;;  %v10451_v42 = vld [vmem:[#allocation5 + $0xa64] sm:$0xf]  ;;  %v8059_v44 = vld [vmem:[#allocation5 + $0xa70] sm:$0xf0]  ;;  %v7934_v12 = vor.u32 %v10419_v33, %v7931_v41 }
 0x133   :  { %5238 = vmatpush.bf16.msra.mxu2 %v8094_v59  ;;  %v10483_v45 = vld [vmem:[#allocation5 + $0xb64] sm:$0xf]  ;;  %v8187_v46 = vld [vmem:[#allocation5 + $0xb70] sm:$0xf0]  ;;  %v8062_v48 = vor.u32 %v10451_v42, %v8059_v44 }
 0x134   :  { %5251 = vmatpush.bf16.msra.mxu3 %v8222_v0  ;;  %v10383_v49 = vld [vmem:[#allocation5 + $0x844] sm:$0xf]  ;;  %v7787_v50 = vld [vmem:[#allocation5 + $0x850] sm:$0xf0]  ;;  %v8190_v52 = vor.u32 %v10483_v45, %v8187_v46  ;;  %v11351_v0 = vadd.f32 %v4998_v43, %v4986_v57 }
 0x135   :  { %5213 = vmatpush.bf16.msra.mxu0 %v7822_v16  ;;  %v10415_v51 = vld [vmem:[#allocation5 + $0x944] sm:$0xf]  ;;  %v7915_v54 = vld [vmem:[#allocation5 + $0x950] sm:$0xf0]  ;;  %v7790_v62 = vor.u32 %v10383_v49, %v7787_v50 }
 0x136   :  { %5226 = vmatpush.bf16.msra.mxu1 %v7950_v21  ;;  %v10447_v55 = vld [vmem:[#allocation5 + $0xa44] sm:$0xf]  ;;  %v8043_v56 = vld [vmem:[#allocation5 + $0xa50] sm:$0xf0]  ;;  %v7918_v3 = vor.u32 %v10415_v51, %v7915_v54 }
 0x137   :  { %5239 = vmatpush.bf16.msra.mxu2 %v8078_v28  ;;  %v10479_v58 = vld [vmem:[#allocation5 + $0xb44] sm:$0xf]  ;;  %v8171_v59 = vld [vmem:[#allocation5 + $0xb50] sm:$0xf0]  ;;  %v8046_v4 = vor.u32 %v10447_v55, %v8043_v56 }
 0x138   :  { %5252 = vmatpush.bf16.msra.mxu3 %v8206_v35  ;;  %v10379_v6 = vld [vmem:[#allocation5 + $0x824] sm:$0xf]  ;;  %v7771_v7 = vld [vmem:[#allocation5 + $0x830] sm:$0xf0]  ;;  %v8174_v11 = vor.u32 %v10479_v58, %v8171_v59 }
 0x139   :  { %5214 = vmatpush.bf16.msra.mxu0 %v7806_v47  ;;  %v10411_v10 = vld [vmem:[#allocation5 + $0x924] sm:$0xf]  ;;  %v7899_v14 = vld [vmem:[#allocation5 + $0x930] sm:$0xf0]  ;;  %v7774_v29 = vor.u32 %v10379_v6, %v7771_v7 }
 0x13a   :  { %5227 = vmatpush.bf16.msra.mxu1 %v7934_v12  ;;  %v10443_v16 = vld [vmem:[#allocation5 + $0xa24] sm:$0xf]  ;;  %v8027_v17 = vld [vmem:[#allocation5 + $0xa30] sm:$0xf0]  ;;  %v7902_v35 = vor.u32 %v10411_v10, %v7899_v14 }
 0x13b   :  { %5240 = vmatpush.bf16.msra.mxu2 %v8062_v48  ;;  %v10475_v21 = vld [vmem:[#allocation5 + $0xb24] sm:$0xf]  ;;  %v8155_v28 = vld [vmem:[#allocation5 + $0xb30] sm:$0xf0]  ;;  %v8030_v39 = vor.u32 %v10443_v16, %v8027_v17  ;;  %v4987_v48 = vpop.f32.mrf.mxu2 }
 0x13c   :  { %5253 = vmatpush.bf16.msra.mxu3 %v8190_v52  ;;  %v10375_v30 = vld [vmem:[#allocation5 + $0x804] sm:$0xf]  ;;  %v7755_v33 = vld [vmem:[#allocation5 + $0x810] sm:$0xf0]  ;;  %v8158_v45 = vor.u32 %v10475_v21, %v8155_v28  ;;  %v5000_v52 = vpop.f32.mrf.mxu3 }
 0x13d   :  { %5215 = vmatpush.bf16.msra.mxu0 %v7790_v62  ;;  %v10407_v41 = vld [vmem:[#allocation5 + $0x904] sm:$0xf]  ;;  %v7883_v42 = vld [vmem:[#allocation5 + $0x910] sm:$0xf0]  ;;  %v7758_v53 = vor.u32 %v10375_v30, %v7755_v33 }
 0x13e   :  { %5228 = vmatpush.bf16.msra.mxu1 %v7918_v3  ;;  %v10439_v44 = vld [vmem:[#allocation5 + $0xa04] sm:$0xf]  ;;  %v8011_v46 = vld [vmem:[#allocation5 + $0xa10] sm:$0xf0]  ;;  %v7886_v57 = vor.u32 %v10407_v41, %v7883_v42 }
 0x13f   :  { %5241 = vmatpush.bf16.msra.mxu2 %v8046_v4  ;;  %v10471_v47 = vld [vmem:[#allocation5 + $0xb04] sm:$0xf]  ;;  %v8139_v12 = vld [vmem:[#allocation5 + $0xb10] sm:$0xf0]  ;;  %v8014_v43 = vor.u32 %v10439_v44, %v8011_v46 }
 0x140   :  { %5254 = vmatpush.bf16.msra.mxu3 %v8174_v11  ;;  %v10531_v49 = vld [vmem:[#allocation5 + $0xce4] sm:$0xf]  ;;  %v8379_v50 = vld [vmem:[#allocation5 + $0xcf0] sm:$0xf0]  ;;  %v8142_v60 = vor.u32 %v10471_v47, %v8139_v12 }
 0x141   :  { %v10563_v51 = vld [vmem:[#allocation5 + $0xde4] sm:$0xf]  ;;  %5216 = vmatpush.bf16.msra.mxu0 %v7774_v29  ;;  %v8507_v54 = vld [vmem:[#allocation5 + $0xdf0] sm:$0xf0]  ;;  %v8382_v62 = vor.u32 %v10531_v49, %v8379_v50 }
 0x142   :  { %v10595_v55 = vld [vmem:[#allocation5 + $0xee4] sm:$0xf]  ;;  %v8635_v56 = vld [vmem:[#allocation5 + $0xef0] sm:$0xf0]  ;;  %5229 = vmatpush.bf16.msra.mxu1 %v7902_v35  ;;  %v8510_v63 = vor.u32 %v10563_v51, %v8507_v54 }
 0x143   :  { %5242 = vmatpush.bf16.msra.mxu2 %v8030_v39  ;;  %v10627_v58 = vld [vmem:[#allocation5 + $0xfe4] sm:$0xf]  ;;  %v8763_v59 = vld [vmem:[#allocation5 + $0xff0] sm:$0xf0]  ;;  %v8638_v3 = vor.u32 %v10595_v55, %v8635_v56 }
 0x144   :  { %5255 = vmatpush.bf16.msra.mxu3 %v8158_v45  ;;  %v10527_v4 = vld [vmem:[#allocation5 + $0xcc4] sm:$0xf]  ;;  %v8363_v6 = vld [vmem:[#allocation5 + $0xcd0] sm:$0xf0]  ;;  %v8766_v10 = vor.u32 %v10627_v58, %v8763_v59 }
 0x145   :  { %v10559_v7 = vld [vmem:[#allocation5 + $0xdc4] sm:$0xf]  ;;  %5217 = vmatpush.bf16.msra.mxu0 %v7758_v53  ;;  %v8491_v11 = vld [vmem:[#allocation5 + $0xdd0] sm:$0xf0]  ;;  %v8366_v28 = vor.u32 %v10527_v4, %v8363_v6 }
 0x146   :  { %v10591_v14 = vld [vmem:[#allocation5 + $0xec4] sm:$0xf]  ;;  %v8619_v16 = vld [vmem:[#allocation5 + $0xed0] sm:$0xf0]  ;;  %5230 = vmatpush.bf16.msra.mxu1 %v7886_v57  ;;  %v8494_v29 = vor.u32 %v10559_v7, %v8491_v11 }
 0x147   :  { %5243 = vmatpush.bf16.msra.mxu2 %v8014_v43  ;;  %v10623_v17 = vld [vmem:[#allocation5 + $0xfc4] sm:$0xf]  ;;  %v8747_v21 = vld [vmem:[#allocation5 + $0xfd0] sm:$0xf0]  ;;  %v8622_v30 = vor.u32 %v10591_v14, %v8619_v16 }
 0x148   :  { %5256 = vmatpush.bf16.msra.mxu3 %v8142_v60  ;;  %v10523_v33 = vld [vmem:[#allocation5 + $0xca4] sm:$0xf]  ;;  %v8347_v35 = vld [vmem:[#allocation5 + $0xcb0] sm:$0xf0]  ;;  %5218 = vmatmul.bf16.vlgmr.msra.gmra.mxu0 %v11286_v18  ;;  %v8750_v41 = vor.u32 %v10623_v17, %v8747_v21  ;;  %v5011_v57 = vpop.f32.mrf.mxu0 }
 0x149   :  { %5262 = vmatpush.bf16.msrb.mxu0 %v8382_v62  ;;  %v10555_v39 = vld [vmem:[#allocation5 + $0xda4] sm:$0xf]  ;;  %v8475_v42 = vld [vmem:[#allocation5 + $0xdb0] sm:$0xf0]  ;;  %5231 = vmatmul.bf16.vlgmr.msra.gmra.mxu1 %v11290_v23  ;;  %v8350_v12 = vor.u32 %v10523_v33, %v8347_v35  ;;  %v5012_v59 = vadd.f32 %v5011_v57, %v11351_v0  ;;  %v5024_v62 = vpop.f32.mrf.mxu1 }
 0x14a   :  { %5275 = vmatpush.bf16.msrb.mxu1 %v8510_v63  ;;  %v10587_v44 = vld [vmem:[#allocation5 + $0xea4] sm:$0xf]  ;;  %v8603_v45 = vld [vmem:[#allocation5 + $0xeb0] sm:$0xf0]  ;;  %5244 = vmatmul.bf16.vlgmr.msra.gmra.mxu2 %v11288_v22  ;;  %v8478_v48 = vor.u32 %v10555_v39, %v8475_v42 }
 0x14b   :  { %5288 = vmatpush.bf16.msrb.mxu2 %v8638_v3  ;;  %v10619_v46 = vld [vmem:[#allocation5 + $0xfa4] sm:$0xf]  ;;  %v8731_v47 = vld [vmem:[#allocation5 + $0xfb0] sm:$0xf0]  ;;  %5257 = vmatmul.bf16.vlgmr.msra.gmra.mxu3 %v11292_v27  ;;  %v8606_v49 = vor.u32 %v10587_v44, %v8603_v45  ;;  %v5025_v11 = vadd.f32 %v5024_v62, %v5012_v59 }
 0x14c   :  { %5301 = vmatpush.bf16.msrb.mxu3 %v8766_v10  ;;  %v10519_v50 = vld [vmem:[#allocation5 + $0xc84] sm:$0xf]  ;;  %v8331_v51 = vld [vmem:[#allocation5 + $0xc90] sm:$0xf0]  ;;  %v8734_v53 = vor.u32 %v10619_v46, %v8731_v47 }
 0x14d   :  { %5263 = vmatpush.bf16.msrb.mxu0 %v8366_v28  ;;  %v10551_v52 = vld [vmem:[#allocation5 + $0xd84] sm:$0xf]  ;;  %v8459_v54 = vld [vmem:[#allocation5 + $0xd90] sm:$0xf0]  ;;  %v8334_v60 = vor.u32 %v10519_v50, %v8331_v51 }
 0x14e   :  { %5276 = vmatpush.bf16.msrb.mxu1 %v8494_v29  ;;  %v10583_v55 = vld [vmem:[#allocation5 + $0xe84] sm:$0xf]  ;;  %v8587_v56 = vld [vmem:[#allocation5 + $0xe90] sm:$0xf0]  ;;  %v8462_v63 = vor.u32 %v10551_v52, %v8459_v54  ;;  %v5037_v42 = vpop.f32.mrf.mxu2 }
 0x14f   :  { %5289 = vmatpush.bf16.msrb.mxu2 %v8622_v30  ;;  %v10615_v43 = vld [vmem:[#allocation5 + $0xf84] sm:$0xf]  ;;  %v8715_v58 = vld [vmem:[#allocation5 + $0xf90] sm:$0xf0]  ;;  %v8590_v3 = vor.u32 %v10583_v55, %v8587_v56  ;;  %v5038_v47 = vadd.f32 %v5037_v42, %v5025_v11 }
 0x150   :  { %5302 = vmatpush.bf16.msrb.mxu3 %v8750_v41  ;;  %v10515_v4 = vld [vmem:[#allocation5 + $0xc64] sm:$0xf]  ;;  %v8315_v6 = vld [vmem:[#allocation5 + $0xc70] sm:$0xf0]  ;;  %v8718_v10 = vor.u32 %v10615_v43, %v8715_v58  ;;  %v5013_v50 = vpop.f32.mrf.mxu0 }
 0x151   :  { %5264 = vmatpush.bf16.msrb.mxu0 %v8350_v12  ;;  %v10547_v7 = vld [vmem:[#allocation5 + $0xd64] sm:$0xf]  ;;  %v8443_v14 = vld [vmem:[#allocation5 + $0xd70] sm:$0xf0]  ;;  %v8318_v29 = vor.u32 %v10515_v4, %v8315_v6  ;;  %v5050_v12 = vpop.f32.mrf.mxu3  ;;  %v5026_v52 = vpop.f32.mrf.mxu1 }
 0x152   :  { %5277 = vmatpush.bf16.msrb.mxu1 %v8478_v48  ;;  %v10579_v16 = vld [vmem:[#allocation5 + $0xe64] sm:$0xf]  ;;  %v8571_v17 = vld [vmem:[#allocation5 + $0xe70] sm:$0xf0]  ;;  %v8446_v0 = vor.u32 %v10547_v7, %v8443_v14 }
 0x153   :  { %5290 = vmatpush.bf16.msrb.mxu2 %v8606_v49  ;;  %v10611_v21 = vld [vmem:[#allocation5 + $0xf64] sm:$0xf]  ;;  %v8699_v28 = vld [vmem:[#allocation5 + $0xf70] sm:$0xf0]  ;;  %v8574_v30 = vor.u32 %v10579_v16, %v8571_v17 }
 0x154   :  { %5303 = vmatpush.bf16.msrb.mxu3 %v8734_v53  ;;  %v10511_v33 = vld [vmem:[#allocation5 + $0xc44] sm:$0xf]  ;;  %v8299_v35 = vld [vmem:[#allocation5 + $0xc50] sm:$0xf0]  ;;  %v8702_v41 = vor.u32 %v10611_v21, %v8699_v28  ;;  %v11358_v53 = vadd.f32 %v5050_v12, %v5038_v47 }
 0x155   :  { %5265 = vmatpush.bf16.msrb.mxu0 %v8334_v60  ;;  %v10543_v39 = vld [vmem:[#allocation5 + $0xd44] sm:$0xf]  ;;  %v8427_v44 = vld [vmem:[#allocation5 + $0xd50] sm:$0xf0]  ;;  %v8302_v51 = vor.u32 %v10511_v33, %v8299_v35 }
 0x156   :  { %5278 = vmatpush.bf16.msrb.mxu1 %v8462_v63  ;;  %v10575_v45 = vld [vmem:[#allocation5 + $0xe44] sm:$0xf]  ;;  %v8555_v46 = vld [vmem:[#allocation5 + $0xe50] sm:$0xf0]  ;;  %v8430_v54 = vor.u32 %v10543_v39, %v8427_v44 }
 0x157   :  { %5291 = vmatpush.bf16.msrb.mxu2 %v8590_v3  ;;  %v10607_v48 = vld [vmem:[#allocation5 + $0xf44] sm:$0xf]  ;;  %v8683_v49 = vld [vmem:[#allocation5 + $0xf50] sm:$0xf0]  ;;  %v8558_v55 = vor.u32 %v10575_v45, %v8555_v46 }
 0x158   :  { %5304 = vmatpush.bf16.msrb.mxu3 %v8718_v10  ;;  %v10507_v56 = vld [vmem:[#allocation5 + $0xc24] sm:$0xf]  ;;  %v8283_v57 = vld [vmem:[#allocation5 + $0xc30] sm:$0xf0]  ;;  %v8686_v58 = vor.u32 %v10607_v48, %v8683_v49 }
 0x159   :  { %5266 = vmatpush.bf16.msrb.mxu0 %v8318_v29  ;;  %v10539_v43 = vld [vmem:[#allocation5 + $0xd24] sm:$0xf]  ;;  %v8411_v59 = vld [vmem:[#allocation5 + $0xd30] sm:$0xf0]  ;;  %v8286_v4 = vor.u32 %v10507_v56, %v8283_v57 }
 0x15a   :  { %5279 = vmatpush.bf16.msrb.mxu1 %v8446_v0  ;;  %v10571_v60 = vld [vmem:[#allocation5 + $0xe24] sm:$0xf]  ;;  %v8539_v62 = vld [vmem:[#allocation5 + $0xe30] sm:$0xf0]  ;;  %v8414_v10 = vor.u32 %v10539_v43, %v8411_v59 }
 0x15b   :  { %5292 = vmatpush.bf16.msrb.mxu2 %v8574_v30  ;;  %v10603_v63 = vld [vmem:[#allocation5 + $0xf24] sm:$0xf]  ;;  %v8667_v3 = vld [vmem:[#allocation5 + $0xf30] sm:$0xf0]  ;;  %v8542_v11 = vor.u32 %v10571_v60, %v8539_v62  ;;  %v5039_v30 = vpop.f32.mrf.mxu2 }
 0x15c   :  { %5305 = vmatpush.bf16.msrb.mxu3 %v8702_v41  ;;  %v10503_v6 = vld [vmem:[#allocation5 + $0xc04] sm:$0xf]  ;;  %v8267_v7 = vld [vmem:[#allocation5 + $0xc10] sm:$0xf0]  ;;  %v8670_v21 = vor.u32 %v10603_v63, %v8667_v3  ;;  %v5052_v41 = vpop.f32.mrf.mxu3 }
 0x15d   :  { %5267 = vmatpush.bf16.msrb.mxu0 %v8302_v51  ;;  %v10535_v14 = vld [vmem:[#allocation5 + $0xd04] sm:$0xf]  ;;  %v8395_v16 = vld [vmem:[#allocation5 + $0xd10] sm:$0xf0]  ;;  %v8270_v42 = vor.u32 %v10503_v6, %v8267_v7 }
 0x15e   :  { %5280 = vmatpush.bf16.msrb.mxu1 %v8430_v54  ;;  %v10567_v17 = vld [vmem:[#allocation5 + $0xe04] sm:$0xf]  ;;  %v8523_v28 = vld [vmem:[#allocation5 + $0xe10] sm:$0xf0]  ;;  %v8398_v47 = vor.u32 %v10535_v14, %v8395_v16 }
 0x15f   :  { %5293 = vmatpush.bf16.msrb.mxu2 %v8558_v55  ;;  %v10599_v29 = vld [vmem:[#allocation5 + $0xf04] sm:$0xf]  ;;  %v8651_v0 = vld [vmem:[#allocation5 + $0xf10] sm:$0xf0]  ;;  %v8526_v12 = vor.u32 %v10567_v17, %v8523_v28 }
 0x160   :  { %5306 = vmatpush.bf16.msrb.mxu3 %v8686_v58  ;;  %v10659_v33 = vld [vmem:[#allocation5 + $0x10e4] sm:$0xf]  ;;  %v8891_v35 = vld [vmem:[#allocation5 + $0x10f0] sm:$0xf0]  ;;  %v8654_v50 = vor.u32 %v10599_v29, %v8651_v0 }
 0x161   :  { %v10691_v39 = vld [vmem:[#allocation5 + $0x11e4] sm:$0xf]  ;;  %5268 = vmatpush.bf16.msrb.mxu0 %v8286_v4  ;;  %v9019_v44 = vld [vmem:[#allocation5 + $0x11f0] sm:$0xf0]  ;;  %v8894_v51 = vor.u32 %v10659_v33, %v8891_v35 }
 0x162   :  { %v10723_v45 = vld [vmem:[#allocation5 + $0x12e4] sm:$0xf]  ;;  %v9147_v46 = vld [vmem:[#allocation5 + $0x12f0] sm:$0xf0]  ;;  %5281 = vmatpush.bf16.msrb.mxu1 %v8414_v10  ;;  %v9022_v52 = vor.u32 %v10691_v39, %v9019_v44 }
 0x163   :  { %5294 = vmatpush.bf16.msrb.mxu2 %v8542_v11  ;;  %v10755_v48 = vld [vmem:[#allocation5 + $0x13e4] sm:$0xf]  ;;  %v9275_v49 = vld [vmem:[#allocation5 + $0x13f0] sm:$0xf0]  ;;  %v9150_v54 = vor.u32 %v10723_v45, %v9147_v46 }
 0x164   :  { %5307 = vmatpush.bf16.msrb.mxu3 %v8670_v21  ;;  %v10655_v55 = vld [vmem:[#allocation5 + $0x10c4] sm:$0xf]  ;;  %v8875_v56 = vld [vmem:[#allocation5 + $0x10d0] sm:$0xf0]  ;;  %v9278_v43 = vor.u32 %v10755_v48, %v9275_v49 }
 0x165   :  { %v10687_v57 = vld [vmem:[#allocation5 + $0x11c4] sm:$0xf]  ;;  %5269 = vmatpush.bf16.msrb.mxu0 %v8270_v42  ;;  %v9003_v58 = vld [vmem:[#allocation5 + $0x11d0] sm:$0xf0]  ;;  %v8878_v3 = vor.u32 %v10655_v55, %v8875_v56 }
 0x166   :  { %v10719_v59 = vld [vmem:[#allocation5 + $0x12c4] sm:$0xf]  ;;  %v9131_v60 = vld [vmem:[#allocation5 + $0x12d0] sm:$0xf0]  ;;  %5282 = vmatpush.bf16.msrb.mxu1 %v8398_v47  ;;  %v9006_v4 = vor.u32 %v10687_v57, %v9003_v58 }
 0x167   :  { %5295 = vmatpush.bf16.msrb.mxu2 %v8526_v12  ;;  %v10751_v62 = vld [vmem:[#allocation5 + $0x13c4] sm:$0xf]  ;;  %v9259_v63 = vld [vmem:[#allocation5 + $0x13d0] sm:$0xf0]  ;;  %v9134_v6 = vor.u32 %v10719_v59, %v9131_v60  ;;  %v5063_v47 = vpop.f32.mrf.mxu0 }
 0x168   :  { %5308 = vmatpush.bf16.msrb.mxu3 %v8654_v50  ;;  %v10651_v7 = vld [vmem:[#allocation5 + $0x10a4] sm:$0xf]  ;;  %v8859_v10 = vld [vmem:[#allocation5 + $0x10b0] sm:$0xf0]  ;;  %5270 = vmatmul.bf16.vlgmr.msrb.gmra.mxu0 %v11298_v13  ;;  %v9262_v14 = vor.u32 %v10751_v62, %v9259_v63  ;;  %v5064_v49 = vadd.f32 %v5063_v47, %v11358_v53 }
 0x169   :  { %5314 = vmatpush.bf16.msra.mxu0 %v8894_v51  ;;  %v10683_v11 = vld [vmem:[#allocation5 + $0x11a4] sm:$0xf]  ;;  %v8987_v16 = vld [vmem:[#allocation5 + $0x11b0] sm:$0xf0]  ;;  %5283 = vmatmul.bf16.vlgmr.msrb.gmra.mxu1 %v11302_v20  ;;  %v8862_v0 = vor.u32 %v10651_v7, %v8859_v10  ;;  %v5076_v51 = vpop.f32.mrf.mxu1 }
 0x16a   :  { %5327 = vmatpush.bf16.msra.mxu1 %v9022_v52  ;;  %v10715_v17 = vld [vmem:[#allocation5 + $0x12a4] sm:$0xf]  ;;  %v9115_v21 = vld [vmem:[#allocation5 + $0x12b0] sm:$0xf0]  ;;  %5296 = vmatmul.bf16.vlgmr.msrb.gmra.mxu2 %v11300_v19  ;;  %v8990_v30 = vor.u32 %v10683_v11, %v8987_v16  ;;  %v5077_v58 = vadd.f32 %v5076_v51, %v5064_v49 }
 0x16b   :  { %5340 = vmatpush.bf16.msra.mxu2 %v9150_v54  ;;  %v10747_v28 = vld [vmem:[#allocation5 + $0x13a4] sm:$0xf]  ;;  %v9243_v29 = vld [vmem:[#allocation5 + $0x13b0] sm:$0xf0]  ;;  %5309 = vmatmul.bf16.vlgmr.msrb.gmra.mxu3 %v11304_v26  ;;  %v9118_v33 = vor.u32 %v10715_v17, %v9115_v21 }
 0x16c   :  { %5353 = vmatpush.bf16.msra.mxu3 %v9278_v43  ;;  %v10647_v35 = vld [vmem:[#allocation5 + $0x1084] sm:$0xf]  ;;  %v8843_v39 = vld [vmem:[#allocation5 + $0x1090] sm:$0xf0]  ;;  %v9246_v42 = vor.u32 %v10747_v28, %v9243_v29 }
 0x16d   :  { %5315 = vmatpush.bf16.msra.mxu0 %v8878_v3  ;;  %v10679_v41 = vld [vmem:[#allocation5 + $0x1184] sm:$0xf]  ;;  %v8971_v44 = vld [vmem:[#allocation5 + $0x1190] sm:$0xf0]  ;;  %v8846_v50 = vor.u32 %v10647_v35, %v8843_v39 }
 0x16e   :  { %5328 = vmatpush.bf16.msra.mxu1 %v9006_v4  ;;  %v10711_v45 = vld [vmem:[#allocation5 + $0x1284] sm:$0xf]  ;;  %v9099_v46 = vld [vmem:[#allocation5 + $0x1290] sm:$0xf0]  ;;  %v8974_v52 = vor.u32 %v10679_v41, %v8971_v44 }
 0x16f   :  { %5341 = vmatpush.bf16.msra.mxu2 %v9134_v6  ;;  %v10743_v12 = vld [vmem:[#allocation5 + $0x1384] sm:$0xf]  ;;  %v9227_v48 = vld [vmem:[#allocation5 + $0x1390] sm:$0xf0]  ;;  %v9102_v54 = vor.u32 %v10711_v45, %v9099_v46  ;;  %v5089_v16 = vpop.f32.mrf.mxu2  ;;  %v5065_v35 = vpop.f32.mrf.mxu0 }
 0x170   :  { %5354 = vmatpush.bf16.msra.mxu3 %v9262_v14  ;;  %v10643_v55 = vld [vmem:[#allocation5 + $0x1064] sm:$0xf]  ;;  %v8827_v56 = vld [vmem:[#allocation5 + $0x1070] sm:$0xf0]  ;;  %v9230_v43 = vor.u32 %v10743_v12, %v9227_v48  ;;  %v5090_v29 = vadd.f32 %v5089_v16, %v5077_v58 }
 0x171   :  { %5316 = vmatpush.bf16.msra.mxu0 %v8862_v0  ;;  %v10675_v57 = vld [vmem:[#allocation5 + $0x1164] sm:$0xf]  ;;  %v8955_v59 = vld [vmem:[#allocation5 + $0x1170] sm:$0xf0]  ;;  %v8830_v4 = vor.u32 %v10643_v55, %v8827_v56  ;;  %v5102_v0 = vpop.f32.mrf.mxu3  ;;  %v5078_v41 = vpop.f32.mrf.mxu1 }
 0x172   :  { %5329 = vmatpush.bf16.msra.mxu1 %v8990_v30  ;;  %v10707_v60 = vld [vmem:[#allocation5 + $0x1264] sm:$0xf]  ;;  %v9083_v62 = vld [vmem:[#allocation5 + $0x1270] sm:$0xf0]  ;;  %v8958_v53 = vor.u32 %v10675_v57, %v8955_v59 }
 0x173   :  { %5342 = vmatpush.bf16.msra.mxu2 %v9118_v33  ;;  %v10739_v63 = vld [vmem:[#allocation5 + $0x1364] sm:$0xf]  ;;  %v9211_v3 = vld [vmem:[#allocation5 + $0x1370] sm:$0xf0]  ;;  %v9086_v6 = vor.u32 %v10707_v60, %v9083_v62 }
 0x174   :  { %5355 = vmatpush.bf16.msra.mxu3 %v9246_v42  ;;  %v10639_v7 = vld [vmem:[#allocation5 + $0x1044] sm:$0xf]  ;;  %v8811_v10 = vld [vmem:[#allocation5 + $0x1050] sm:$0xf0]  ;;  %v9214_v14 = vor.u32 %v10739_v63, %v9211_v3  ;;  %v11365_v42 = vadd.f32 %v5102_v0, %v5090_v29 }
 0x175   :  { %5317 = vmatpush.bf16.msra.mxu0 %v8846_v50  ;;  %v10671_v11 = vld [vmem:[#allocation5 + $0x1144] sm:$0xf]  ;;  %v8939_v17 = vld [vmem:[#allocation5 + $0x1150] sm:$0xf0]  ;;  %v8814_v39 = vor.u32 %v10639_v7, %v8811_v10 }
 0x176   :  { %5330 = vmatpush.bf16.msra.mxu1 %v8974_v52  ;;  %v10703_v21 = vld [vmem:[#allocation5 + $0x1244] sm:$0xf]  ;;  %v9067_v28 = vld [vmem:[#allocation5 + $0x1250] sm:$0xf0]  ;;  %v8942_v44 = vor.u32 %v10671_v11, %v8939_v17 }
 0x177   :  { %5343 = vmatpush.bf16.msra.mxu2 %v9102_v54  ;;  %v10735_v30 = vld [vmem:[#allocation5 + $0x1344] sm:$0xf]  ;;  %v9195_v33 = vld [vmem:[#allocation5 + $0x1350] sm:$0xf0]  ;;  %v9070_v45 = vor.u32 %v10703_v21, %v9067_v28 }
 0x178   :  { %5356 = vmatpush.bf16.msra.mxu3 %v9230_v43  ;;  %v10635_v46 = vld [vmem:[#allocation5 + $0x1024] sm:$0xf]  ;;  %v8795_v47 = vld [vmem:[#allocation5 + $0x1030] sm:$0xf0]  ;;  %v9198_v48 = vor.u32 %v10735_v30, %v9195_v33 }
 0x179   :  { %5318 = vmatpush.bf16.msra.mxu0 %v8830_v4  ;;  %v10667_v12 = vld [vmem:[#allocation5 + $0x1124] sm:$0xf]  ;;  %v8923_v49 = vld [vmem:[#allocation5 + $0x1130] sm:$0xf0]  ;;  %v8798_v55 = vor.u32 %v10635_v46, %v8795_v47 }
 0x17a   :  { %5331 = vmatpush.bf16.msra.mxu1 %v8958_v53  ;;  %v10699_v50 = vld [vmem:[#allocation5 + $0x1224] sm:$0xf]  ;;  %v9051_v51 = vld [vmem:[#allocation5 + $0x1230] sm:$0xf0]  ;;  %v8926_v43 = vor.u32 %v10667_v12, %v8923_v49 }
 0x17b   :  { %5344 = vmatpush.bf16.msra.mxu2 %v9086_v6  ;;  %v10731_v52 = vld [vmem:[#allocation5 + $0x1324] sm:$0xf]  ;;  %v9179_v54 = vld [vmem:[#allocation5 + $0x1330] sm:$0xf0]  ;;  %v9054_v58 = vor.u32 %v10699_v50, %v9051_v51  ;;  %v5091_v6 = vpop.f32.mrf.mxu2 }
 0x17c   :  { %5357 = vmatpush.bf16.msra.mxu3 %v9214_v14  ;;  %v10631_v56 = vld [vmem:[#allocation5 + $0x1004] sm:$0xf]  ;;  %v8779_v57 = vld [vmem:[#allocation5 + $0x1010] sm:$0xf0]  ;;  %v9182_v63 = vor.u32 %v10731_v52, %v9179_v54  ;;  %v5104_v14 = vpop.f32.mrf.mxu3 }
 0x17d   :  { %5319 = vmatpush.bf16.msra.mxu0 %v8814_v39  ;;  %v10663_v59 = vld [vmem:[#allocation5 + $0x1104] sm:$0xf]  ;;  %v8907_v60 = vld [vmem:[#allocation5 + $0x1110] sm:$0xf0]  ;;  %v8782_v16 = vor.u32 %v10631_v56, %v8779_v57 }
 0x17e   :  { %5332 = vmatpush.bf16.msra.mxu1 %v8942_v44  ;;  %v10695_v62 = vld [vmem:[#allocation5 + $0x1204] sm:$0xf]  ;;  %v9035_v3 = vld [vmem:[#allocation5 + $0x1210] sm:$0xf0]  ;;  %v8910_v29 = vor.u32 %v10663_v59, %v8907_v60 }
 0x17f   :  { %5345 = vmatpush.bf16.msra.mxu2 %v9070_v45  ;;  %v10727_v4 = vld [vmem:[#allocation5 + $0x1304] sm:$0xf]  ;;  %v9163_v53 = vld [vmem:[#allocation5 + $0x1310] sm:$0xf0]  ;;  %v9038_v0 = vor.u32 %v10695_v62, %v9035_v3 }
 0x180   :  { %5358 = vmatpush.bf16.msra.mxu3 %v9198_v48  ;;  %v10787_v7 = vld [vmem:[#allocation5 + $0x14e4] sm:$0xf]  ;;  %v9403_v10 = vld [vmem:[#allocation5 + $0x14f0] sm:$0xf0]  ;;  %v9166_v35 = vor.u32 %v10727_v4, %v9163_v53 }
 0x181   :  { %v10819_v11 = vld [vmem:[#allocation5 + $0x15e4] sm:$0xf]  ;;  %5320 = vmatpush.bf16.msra.mxu0 %v8798_v55  ;;  %v9531_v17 = vld [vmem:[#allocation5 + $0x15f0] sm:$0xf0]  ;;  %v9406_v39 = vor.u32 %v10787_v7, %v9403_v10 }
 0x182   :  { %v10851_v21 = vld [vmem:[#allocation5 + $0x16e4] sm:$0xf]  ;;  %v9659_v28 = vld [vmem:[#allocation5 + $0x16f0] sm:$0xf0]  ;;  %5333 = vmatpush.bf16.msra.mxu1 %v8926_v43  ;;  %v9534_v41 = vor.u32 %v10819_v11, %v9531_v17 }
 0x183   :  { %5346 = vmatpush.bf16.msra.mxu2 %v9054_v58  ;;  %v10883_v30 = vld [vmem:[#allocation5 + $0x17e4] sm:$0xf]  ;;  %v9787_v33 = vld [vmem:[#allocation5 + $0x17f0] sm:$0xf0]  ;;  %v9662_v44 = vor.u32 %v10851_v21, %v9659_v28 }
 0x184   :  { %5359 = vmatpush.bf16.msra.mxu3 %v9182_v63  ;;  %v10783_v45 = vld [vmem:[#allocation5 + $0x14c4] sm:$0xf]  ;;  %v9387_v46 = vld [vmem:[#allocation5 + $0x14d0] sm:$0xf0]  ;;  %v9790_v12 = vor.u32 %v10883_v30, %v9787_v33 }
 0x185   :  { %v10815_v47 = vld [vmem:[#allocation5 + $0x15c4] sm:$0xf]  ;;  %5321 = vmatpush.bf16.msra.mxu0 %v8782_v16  ;;  %v9515_v48 = vld [vmem:[#allocation5 + $0x15d0] sm:$0xf0]  ;;  %v9390_v54 = vor.u32 %v10783_v45, %v9387_v46  ;;  %v10982_v16 = vld [vmem:[#allocation7] sm:$0xf] }
 0x186   :  { %v10847_v49 = vld [vmem:[#allocation5 + $0x16c4] sm:$0xf]  ;;  %v9643_v50 = vld [vmem:[#allocation5 + $0x16d0] sm:$0xf0]  ;;  %5334 = vmatpush.bf16.msra.mxu1 %v8910_v29  ;;  %v9518_v55 = vor.u32 %v10815_v47, %v9515_v48  ;;  %v947_v17 = vperm.slane %v10982_v16, 1  ;;  %v5128_v48 = vpop.f32.mrf.mxu1 }
 0x187   :  { %5347 = vmatpush.bf16.msra.mxu2 %v9038_v0  ;;  %v10879_v51 = vld [vmem:[#allocation5 + $0x17c4] sm:$0xf]  ;;  %v9771_v52 = vld [vmem:[#allocation5 + $0x17d0] sm:$0xf0]  ;;  %v9646_v56 = vor.u32 %v10847_v49, %v9643_v50 }
 0x188   :  { %5360 = vmatpush.bf16.msra.mxu3 %v9166_v35  ;;  %v10779_v57 = vld [vmem:[#allocation5 + $0x14a4] sm:$0xf]  ;;  %v9371_v43 = vld [vmem:[#allocation5 + $0x14b0] sm:$0xf0]  ;;  %5322 = vmatmul.bf16.vlgmr.msra.gmra.mxu0 %v11310_v24  ;;  %v9774_v59 = vor.u32 %v10879_v51, %v9771_v52 }
 0x189   :  { %5366 = vmatpush.bf16.msrb.mxu0 %v9406_v39  ;;  %v10811_v58 = vld [vmem:[#allocation5 + $0x15a4] sm:$0xf]  ;;  %v9499_v60 = vld [vmem:[#allocation5 + $0x15b0] sm:$0xf0]  ;;  %5335 = vmatmul.bf16.vlgmr.msra.gmra.mxu1 %v11314_v32  ;;  %v9374_v53 = vor.u32 %v10779_v57, %v9371_v43  ;;  %v5115_v39 = vpop.f32.mrf.mxu0 }
 0x18a   :  { %5379 = vmatpush.bf16.msrb.mxu1 %v9534_v41  ;;  %v10843_v62 = vld [vmem:[#allocation5 + $0x16a4] sm:$0xf]  ;;  %v9627_v63 = vld [vmem:[#allocation5 + $0x16b0] sm:$0xf0]  ;;  %5348 = vmatmul.bf16.vlgmr.msra.gmra.mxu2 %v11312_v31  ;;  %v9502_v7 = vor.u32 %v10811_v58, %v9499_v60 }
 0x18b   :  { %5392 = vmatpush.bf16.msrb.mxu2 %v9662_v44  ;;  %v10875_v3 = vld [vmem:[#allocation5 + $0x17a4] sm:$0xf]  ;;  %v9755_v4 = vld [vmem:[#allocation5 + $0x17b0] sm:$0xf0]  ;;  %5361 = vmatmul.bf16.vlgmr.msra.gmra.mxu3 %v11316_v36  ;;  %v9630_v10 = vor.u32 %v10843_v62, %v9627_v63 }
 0x18c   :  { %5405 = vmatpush.bf16.msrb.mxu3 %v9790_v12  ;;  %v10775_v6 = vld [vmem:[#allocation5 + $0x1484] sm:$0xf]  ;;  %v9355_v11 = vld [vmem:[#allocation5 + $0x1490] sm:$0xf0]  ;;  %v9758_v21 = vor.u32 %v10875_v3, %v9755_v4  ;;  %v5116_v12 = vadd.f32 %v5115_v39, %v947_v17 }
 0x18d   :  { %5367 = vmatpush.bf16.msrb.mxu0 %v9390_v54  ;;  %v10807_v14 = vld [vmem:[#allocation5 + $0x1584] sm:$0xf]  ;;  %v9483_v28 = vld [vmem:[#allocation5 + $0x1590] sm:$0xf0]  ;;  %v9358_v35 = vor.u32 %v10775_v6, %v9355_v11  ;;  %v5141_v63 = vpop.f32.mrf.mxu2 }
 0x18e   :  { %5380 = vmatpush.bf16.msrb.mxu1 %v9518_v55  ;;  %v10839_v29 = vld [vmem:[#allocation5 + $0x1684] sm:$0xf]  ;;  %v9611_v0 = vld [vmem:[#allocation5 + $0x1690] sm:$0xf0]  ;;  %v9486_v41 = vor.u32 %v10807_v14, %v9483_v28 }
 0x18f   :  { %5393 = vmatpush.bf16.msrb.mxu2 %v9646_v56  ;;  %v10871_v30 = vld [vmem:[#allocation5 + $0x1784] sm:$0xf]  ;;  %v9739_v33 = vld [vmem:[#allocation5 + $0x1790] sm:$0xf0]  ;;  %v9614_v44 = vor.u32 %v10839_v29, %v9611_v0  ;;  %v5129_v56 = vadd.f32 %v5128_v48, %v5116_v12 }
 0x190   :  { %5406 = vmatpush.bf16.msrb.mxu3 %v9774_v59  ;;  %v10771_v45 = vld [vmem:[#allocation5 + $0x1464] sm:$0xf]  ;;  %v9339_v46 = vld [vmem:[#allocation5 + $0x1470] sm:$0xf0]  ;;  %v9742_v49 = vor.u32 %v10871_v30, %v9739_v33 }
 0x191   :  { %5368 = vmatpush.bf16.msrb.mxu0 %v9374_v53  ;;  %v10803_v47 = vld [vmem:[#allocation5 + $0x1564] sm:$0xf]  ;;  %v9467_v50 = vld [vmem:[#allocation5 + $0x1570] sm:$0xf0]  ;;  %v9342_v57 = vor.u32 %v10771_v45, %v9339_v46 }
 0x192   :  { %5381 = vmatpush.bf16.msrb.mxu1 %v9502_v7  ;;  %v10835_v51 = vld [vmem:[#allocation5 + $0x1664] sm:$0xf]  ;;  %v9595_v52 = vld [vmem:[#allocation5 + $0x1670] sm:$0xf0]  ;;  %v9470_v43 = vor.u32 %v10803_v47, %v9467_v50  ;;  %v5142_v7 = vadd.f32 %v5141_v63, %v5129_v56  ;;  %v10150_v63 = vld [vmem:[#allocation5 + $0xf4] sm:$0xf0] }
 0x193   :  { %5394 = vmatpush.bf16.msrb.mxu2 %v9630_v10  ;;  %v10867_v54 = vld [vmem:[#allocation5 + $0x1764] sm:$0xf]  ;;  %v9723_v55 = vld [vmem:[#allocation5 + $0x1770] sm:$0xf0]  ;;  %v9598_v58 = vor.u32 %v10835_v51, %v9595_v52  ;;  %v5154_v10 = vpop.f32.mrf.mxu3 }
 0x194   :  { %5407 = vmatpush.bf16.msrb.mxu3 %v9758_v21  ;;  %v10767_v59 = vld [vmem:[#allocation5 + $0x1444] sm:$0xf]  ;;  %v9323_v60 = vld [vmem:[#allocation5 + $0x1450] sm:$0xf0]  ;;  %v9726_v3 = vor.u32 %v10867_v54, %v9723_v55  ;;  %v11371_v17 = vadd.f32 %v5154_v10, %v5142_v7  ;;  %v5117_v21 = vpop.f32.mrf.mxu0  ;;  %v10214_v7 = vld [vmem:[#allocation5 + $0x2f4] sm:$0xf0] }
 0x195   :  { %5369 = vmatpush.bf16.msrb.mxu0 %v9358_v35  ;;  %v10799_v62 = vld [vmem:[#allocation5 + $0x1544] sm:$0xf]  ;;  %v9451_v4 = vld [vmem:[#allocation5 + $0x1550] sm:$0xf0]  ;;  %v9326_v16 = vor.u32 %v10767_v59, %v9323_v60  ;;  %v5130_v35 = vpop.f32.mrf.mxu1  ;;  %v5143_v56 = vpop.f32.mrf.mxu2 }
 0x196   :  { %5382 = vmatpush.bf16.msrb.mxu1 %v9486_v41  ;;  %v10831_v53 = vld [vmem:[#allocation5 + $0x1644] sm:$0xf]  ;;  %v9579_v6 = vld [vmem:[#allocation5 + $0x1650] sm:$0xf0]  ;;  %v9454_v28 = vor.u32 %v10799_v62, %v9451_v4  ;;  %v6849_v62 = vld [vmem:[#allocation5 + $0xe8] sm:$0xf] }
 0x197   :  { %5395 = vmatpush.bf16.msrb.mxu2 %v9614_v44  ;;  %v10863_v11 = vld [vmem:[#allocation5 + $0x1744] sm:$0xf]  ;;  %v9707_v14 = vld [vmem:[#allocation5 + $0x1750] sm:$0xf0]  ;;  %v9582_v29 = vor.u32 %v10831_v53, %v9579_v6  ;;  %v10182_v53 = vld [vmem:[#allocation5 + $0x1f4] sm:$0xf0] }
 0x198   :  { %5408 = vmatpush.bf16.msrb.mxu3 %v9742_v49  ;;  %v10763_v0 = vld [vmem:[#allocation5 + $0x1424] sm:$0xf]  ;;  %v9307_v30 = vld [vmem:[#allocation5 + $0x1430] sm:$0xf0]  ;;  %v9710_v39 = vor.u32 %v10863_v11, %v9707_v14  ;;  %v7105_v6 = vld [vmem:[#allocation5 + $0x2e8] sm:$0xf] }
 0x199   :  { %5370 = vmatpush.bf16.msrb.mxu0 %v9342_v57  ;;  %v10795_v33 = vld [vmem:[#allocation5 + $0x1524] sm:$0xf]  ;;  %v9435_v41 = vld [vmem:[#allocation5 + $0x1530] sm:$0xf0]  ;;  %v9310_v12 = vor.u32 %v10763_v0, %v9307_v30  ;;  %v7233_v14 = vld [vmem:[#allocation5 + $0x3e8] sm:$0xf]  ;;  %v7106_v0 = vor.u32 %v10214_v7, %v7105_v6 }
 0x19a   :  { %5383 = vmatpush.bf16.msrb.mxu1 %v9470_v43  ;;  %v10827_v44 = vld [vmem:[#allocation5 + $0x1624] sm:$0xf]  ;;  %v9563_v45 = vld [vmem:[#allocation5 + $0x1630] sm:$0xf0]  ;;  %v9438_v50 = vor.u32 %v10795_v33, %v9435_v41  ;;  %v6833_v30 = vld [vmem:[#allocation5 + $0xc8] sm:$0xf] }
 0x19b   :  { %5396 = vmatpush.bf16.msrb.mxu2 %v9598_v58  ;;  %v10859_v46 = vld [vmem:[#allocation5 + $0x1724] sm:$0xf]  ;;  %v9691_v47 = vld [vmem:[#allocation5 + $0x1730] sm:$0xf0]  ;;  %v9566_v51 = vor.u32 %v10827_v44, %v9563_v45  ;;  %v5156_v60 = vpop.f32.mrf.mxu3  ;;  %v10146_v33 = vld [vmem:[#allocation5 + $0xd4] sm:$0xf0] }
 0x19c   :  { %5409 = vmatpush.bf16.msrb.mxu3 %v9726_v3  ;;  %v10759_v48 = vld [vmem:[#allocation5 + $0x1404] sm:$0xf]  ;;  %v9291_v49 = vld [vmem:[#allocation5 + $0x1410] sm:$0xf0]  ;;  %v9694_v57 = vor.u32 %v10859_v46, %v9691_v47  ;;  %v6977_v3 = vld [vmem:[#allocation5 + $0x1e8] sm:$0xf] }
 0x19d   :  { %5371 = vmatpush.bf16.msrb.mxu0 %v9326_v16  ;;  %v10791_v52 = vld [vmem:[#allocation5 + $0x1504] sm:$0xf]  ;;  %v9419_v54 = vld [vmem:[#allocation5 + $0x1510] sm:$0xf0]  ;;  %v9294_v4 = vor.u32 %v10759_v48, %v9291_v49  ;;  %v10246_v16 = vld [vmem:[#allocation5 + $0x3f4] sm:$0xf0] }
 0x19e   :  { %5384 = vmatpush.bf16.msrb.mxu1 %v9454_v28  ;;  %v10823_v55 = vld [vmem:[#allocation5 + $0x1604] sm:$0xf]  ;;  %v9547_v43 = vld [vmem:[#allocation5 + $0x1610] sm:$0xf0]  ;;  %v9422_v10 = vor.u32 %v10791_v52, %v9419_v54  ;;  %v6850_v28 = vor.u32 %v10150_v63, %v6849_v62  ;;  %v6961_v35 = vld [vmem:[#allocation5 + $0x1c8] sm:$0xf] }
 0x19f   :  { %5397 = vmatpush.bf16.msrb.mxu2 %v9582_v29  ;;  %v10855_v58 = vld [vmem:[#allocation5 + $0x1704] sm:$0xf]  ;;  %v9675_v59 = vld [vmem:[#allocation5 + $0x1710] sm:$0xf0]  ;;  %v9550_v11 = vor.u32 %v10823_v55, %v9547_v43  ;;  %v6978_v29 = vor.u32 %v10182_v53, %v6977_v3  ;;  %v10178_v41 = vld [vmem:[#allocation5 + $0x1d4] sm:$0xf0] }
 0x1a0   :  { %5410 = vmatpush.bf16.msrb.mxu3 %v9710_v39  ;;  %v9678_v21 = vor.u32 %v10855_v58, %v9675_v59  ;;  %v7234_v39 = vor.u32 %v10246_v16, %v7233_v14  ;;  %v7089_v44 = vld [vmem:[#allocation5 + $0x2c8] sm:$0xf]  ;;  %v10210_v45 = vld [vmem:[#allocation5 + $0x2d4] sm:$0xf0]  ;;  %v6962_v48 = vor.u32 %v10178_v41, %v6961_v35 }
 0x1a1   :  { %5372 = vmatpush.bf16.msrb.mxu0 %v9310_v12  ;;  %v7217_v46 = vld [vmem:[#allocation5 + $0x3c8] sm:$0xf]  ;;  %v10242_v47 = vld [vmem:[#allocation5 + $0x3d4] sm:$0xf0]  ;;  %v6834_v12 = vor.u32 %v10146_v33, %v6833_v30  ;;  %v7090_v49 = vor.u32 %v10210_v45, %v7089_v44 }
 0x1a2   :  { %5385 = vmatpush.bf16.msrb.mxu1 %v9438_v50  ;;  %v6817_v50 = vld [vmem:[#allocation5 + $0xa8] sm:$0xf]  ;;  %v7218_v54 = vor.u32 %v10242_v47, %v7217_v46  ;;  %v10174_v55 = vld [vmem:[#allocation5 + $0x1b4] sm:$0xf0] }
 0x1a3   :  { %5398 = vmatpush.bf16.msrb.mxu2 %v9566_v51  ;;  %v10142_v51 = vld [vmem:[#allocation5 + $0xb4] sm:$0xf0]  ;;  %v6945_v52 = vld [vmem:[#allocation5 + $0x1a8] sm:$0xf] }
 0x1a4   :  { %5411 = vmatpush.bf16.msrb.mxu3 %v9694_v57  ;;  %v7073_v56 = vld [vmem:[#allocation5 + $0x2a8] sm:$0xf]  ;;  %v10206_v57 = vld [vmem:[#allocation5 + $0x2b4] sm:$0xf0]  ;;  %v6818_v59 = vor.u32 %v10142_v51, %v6817_v50  ;;  %v6946_v60 = vor.u32 %v10174_v55, %v6945_v52 }
 0x1a5   :  { %5373 = vmatpush.bf16.msrb.mxu0 %v9294_v4  ;;  %v7201_v43 = vld [vmem:[#allocation5 + $0x3a8] sm:$0xf]  ;;  %v10238_v58 = vld [vmem:[#allocation5 + $0x3b4] sm:$0xf0]  ;;  %v7074_v62 = vor.u32 %v10206_v57, %v7073_v56 }
 0x1a6   :  { %5386 = vmatpush.bf16.msrb.mxu1 %v9422_v10  ;;  %v6801_v63 = vld [vmem:[#allocation5 + $0x88] sm:$0xf]  ;;  %v10138_v3 = vld [vmem:[#allocation5 + $0x94] sm:$0xf0]  ;;  %v7202_v53 = vor.u32 %v10238_v58, %v7201_v43 }
 0x1a7   :  { %5399 = vmatpush.bf16.msrb.mxu2 %v9550_v11  ;;  %v6929_v4 = vld [vmem:[#allocation5 + $0x188] sm:$0xf]  ;;  %v10170_v6 = vld [vmem:[#allocation5 + $0x194] sm:$0xf0]  ;;  %v6802_v16 = vor.u32 %v10138_v3, %v6801_v63 }
 0x1a8   :  { %5412 = vmatpush.bf16.msrb.mxu3 %v9678_v21  ;;  %5374 = vmatmul.bf16.vlgmr.msrb.gmra.mxu0 %v11324_v61  ;;  %v7057_v7 = vld [vmem:[#allocation5 + $0x288] sm:$0xf]  ;;  %v10202_v10 = vld [vmem:[#allocation5 + $0x294] sm:$0xf0]  ;;  %v5167_v21 = vpop.f32.mrf.mxu0 }
 0x1a9   :  { %5418 = vmatpush.bf16.msra.mxu0 %v6850_v28  ;;  %5387 = vmatmul.bf16.vlgmr.msrb.gmra.mxu1 %v11328_v2  ;;  %v7185_v11 = vld [vmem:[#allocation5 + $0x388] sm:$0xf]  ;;  %v10234_v14 = vld [vmem:[#allocation5 + $0x394] sm:$0xf0]  ;;  %v6930_v28 = vor.u32 %v10170_v6, %v6929_v4  ;;  %v5168_v35 = vadd.f32 %v5167_v21, %v11371_v17 }
 0x1aa   :  { %5431 = vmatpush.bf16.msra.mxu1 %v6978_v29  ;;  %5400 = vmatmul.bf16.vlgmr.msrb.gmra.mxu2 %v11326_v1  ;;  %v7058_v29 = vor.u32 %v10202_v10, %v7057_v7  ;;  %v10134_v30 = vld [vmem:[#allocation5 + $0x74] sm:$0xf0]  ;;  %v6913_v33 = vld [vmem:[#allocation5 + $0x168] sm:$0xf]  ;;  %v7186_v41 = vor.u32 %v10234_v14, %v7185_v11 }
 0x1ab   :  { %5444 = vmatpush.bf16.msra.mxu2 %v7106_v0  ;;  %5413 = vmatmul.bf16.vlgmr.msrb.gmra.mxu3 %v11330_v5  ;;  %v6785_v0 = vld [vmem:[#allocation5 + $0x68] sm:$0xf]  ;;  %v10166_v44 = vld [vmem:[#allocation5 + $0x174] sm:$0xf0] }
 0x1ac   :  { %5457 = vmatpush.bf16.msra.mxu3 %v7234_v39  ;;  %v5180_v39 = vpop.f32.mrf.mxu1  ;;  %v7041_v45 = vld [vmem:[#allocation5 + $0x268] sm:$0xf]  ;;  %v10198_v46 = vld [vmem:[#allocation5 + $0x274] sm:$0xf0]  ;;  %v6914_v50 = vor.u32 %v10166_v44, %v6913_v33 }
 0x1ad   :  { %5419 = vmatpush.bf16.msra.mxu0 %v6834_v12  ;;  %v7169_v47 = vld [vmem:[#allocation5 + $0x368] sm:$0xf]  ;;  %v10230_v12 = vld [vmem:[#allocation5 + $0x374] sm:$0xf0]  ;;  %v7042_v51 = vor.u32 %v10198_v46, %v7041_v45  ;;  %v5193_v56 = vpop.f32.mrf.mxu2 }
 0x1ae   :  { %5432 = vmatpush.bf16.msra.mxu1 %v6962_v48  ;;  %v5181_v48 = vadd.f32 %v5180_v39, %v5168_v35  ;;  %v6769_v52 = vld [vmem:[#allocation5 + $0x48] sm:$0xf]  ;;  %v7170_v17 = vor.u32 %v10230_v12, %v7169_v47  ;;  %v10162_v57 = vld [vmem:[#allocation5 + $0x154] sm:$0xf0] }
 0x1af   :  { %5445 = vmatpush.bf16.msra.mxu2 %v7090_v49  ;;  %v6786_v49 = vor.u32 %v10134_v30, %v6785_v0  ;;  %v6897_v55 = vld [vmem:[#allocation5 + $0x148] sm:$0xf]  ;;  %v10194_v58 = vld [vmem:[#allocation5 + $0x254] sm:$0xf0] }
 0x1b0   :  { %5458 = vmatpush.bf16.msra.mxu3 %v7218_v54  ;;  %v10130_v54 = vld [vmem:[#allocation5 + $0x54] sm:$0xf0]  ;;  %v7025_v43 = vld [vmem:[#allocation5 + $0x248] sm:$0xf]  ;;  %v6898_v6 = vor.u32 %v10162_v57, %v6897_v55 }
 0x1b1   :  { %5420 = vmatpush.bf16.msra.mxu0 %v6818_v59  ;;  %v5194_v59 = vadd.f32 %v5193_v56, %v5181_v48  ;;  %v10226_v63 = vld [vmem:[#allocation5 + $0x354] sm:$0xf0]  ;;  %v6770_v3 = vor.u32 %v10130_v54, %v6769_v52  ;;  %v7026_v7 = vor.u32 %v10194_v58, %v7025_v43  ;;  %v6753_v10 = vld [vmem:[#allocation5 + $0x28] sm:$0xf] }
 0x1b2   :  { %5433 = vmatpush.bf16.msra.mxu1 %v6946_v60  ;;  %v5206_v60 = vpop.f32.mrf.mxu3  ;;  %v10126_v11 = vld [vmem:[#allocation5 + $0x34] sm:$0xf0]  ;;  %v6881_v14 = vld [vmem:[#allocation5 + $0x128] sm:$0xf] }
 0x1b3   :  { %5446 = vmatpush.bf16.msra.mxu2 %v7074_v62  ;;  %v7153_v62 = vld [vmem:[#allocation5 + $0x348] sm:$0xf]  ;;  %v11378_v4 = vadd.f32 %v5206_v60, %v5194_v59  ;;  %v10190_v0 = vld [vmem:[#allocation5 + $0x234] sm:$0xf0]  ;;  %v6754_v35 = vor.u32 %v10126_v11, %v6753_v10 }
 0x1b4   :  { %5459 = vmatpush.bf16.msra.mxu3 %v7202_v53  ;;  %v5169_v53 = vpop.f32.mrf.mxu0  ;;  %v7154_v21 = vor.u32 %v10226_v63, %v7153_v62  ;;  %v7137_v30 = vld [vmem:[#allocation5 + $0x328] sm:$0xf]  ;;  %v10222_v33 = vld [vmem:[#allocation5 + $0x334] sm:$0xf0] }
 0x1b5   :  { %5421 = vmatpush.bf16.msra.mxu0 %v6802_v16  ;;  %v5182_v16 = vpop.f32.mrf.mxu1  ;;  %v6737_v39 = vld [vmem:[#allocation5 + $0x8] sm:$0xf]  ;;  %v10154_v47 = vld [vmem:[#allocation5 + $0x114] sm:$0xf0]  ;;  %v5195_v48 = vpop.f32.mrf.mxu2 }
 0x1b6   :  { %5434 = vmatpush.bf16.msra.mxu1 %v6930_v28  ;;  %v10158_v28 = vld [vmem:[#allocation5 + $0x134] sm:$0xf0]  ;;  %v6865_v46 = vld [vmem:[#allocation5 + $0x108] sm:$0xf] }
 0x1b7   :  { %5447 = vmatpush.bf16.msra.mxu2 %v7058_v29  ;;  %v7009_v29 = vld [vmem:[#allocation5 + $0x228] sm:$0xf]  ;;  %v6882_v44 = vor.u32 %v10158_v28, %v6881_v14  ;;  %v10218_v52 = vld [vmem:[#allocation5 + $0x314] sm:$0xf0]  ;;  %v6866_v60 = vor.u32 %v10154_v47, %v6865_v46 }
 0x1b8   :  { %5460 = vmatpush.bf16.msra.mxu3 %v7186_v41  ;;  %v10122_v41 = vld [vmem:[#allocation5 + $0x14] sm:$0xf0]  ;;  %v7010_v45 = vor.u32 %v10190_v0, %v7009_v29  ;;  %v6993_v12 = vld [vmem:[#allocation5 + $0x208] sm:$0xf] }
 0x1b9   :  { %5422 = vmatpush.bf16.msra.mxu0 %v6786_v49  ;;  %v7138_v49 = vor.u32 %v10222_v33, %v7137_v30  ;;  %v7361_v55 = vld [vmem:[#allocation5 + $0x4e8] sm:$0xf]  ;;  %v10278_v56 = vld [vmem:[#allocation5 + $0x4f4] sm:$0xf0]  ;;  %v6738_v57 = vor.u32 %v10122_v41, %v6737_v39 }
 0x1ba   :  { %5435 = vmatpush.bf16.msra.mxu1 %v6914_v50  ;;  %v10186_v50 = vld [vmem:[#allocation5 + $0x214] sm:$0xf0]  ;;  %v5208_v54 = vpop.f32.mrf.mxu3  ;;  %v7617_v58 = vld [vmem:[#allocation5 + $0x6e8] sm:$0xf] }
 0x1bb   :  { %5448 = vmatpush.bf16.msra.mxu2 %v7042_v51  ;;  %v7121_v51 = vld [vmem:[#allocation5 + $0x308] sm:$0xf]  ;;  %v10310_v43 = vld [vmem:[#allocation5 + $0x5f4] sm:$0xf0]  ;;  %v6994_v62 = vor.u32 %v10186_v50, %v6993_v12 }
 0x1bc   :  { %5461 = vmatpush.bf16.msra.mxu3 %v7170_v17  ;;  %v7489_v17 = vld [vmem:[#allocation5 + $0x5e8] sm:$0xf]  ;;  %v10342_v59 = vld [vmem:[#allocation5 + $0x6f4] sm:$0xf0]  ;;  %v7122_v53 = vor.u32 %v10218_v52, %v7121_v51 }
 0x1bd   :  { %5423 = vmatpush.bf16.msra.mxu0 %v6770_v3  ;;  %v7745_v63 = vld [vmem:[#allocation5 + $0x7e8] sm:$0xf]  ;;  %v10374_v3 = vld [vmem:[#allocation5 + $0x7f4] sm:$0xf0]  ;;  %v7618_v10 = vor.u32 %v10342_v59, %v7617_v58 }
 0x1be   :  { %5436 = vmatpush.bf16.msra.mxu1 %v6898_v6  ;;  %v7362_v6 = vor.u32 %v10278_v56, %v7361_v55  ;;  %v7345_v11 = vld [vmem:[#allocation5 + $0x4c8] sm:$0xf]  ;;  %v10274_v14 = vld [vmem:[#allocation5 + $0x4d4] sm:$0xf0] }
 0x1bf   :  { %5449 = vmatpush.bf16.msra.mxu2 %v7026_v7  ;;  %v7490_v7 = vor.u32 %v10310_v43, %v7489_v17  ;;  %v7473_v16 = vld [vmem:[#allocation5 + $0x5c8] sm:$0xf]  ;;  %v10306_v28 = vld [vmem:[#allocation5 + $0x5d4] sm:$0xf0] }
 0x1c0   :  { %5462 = vmatpush.bf16.msra.mxu3 %v7154_v21  ;;  %v7746_v21 = vor.u32 %v10374_v3, %v7745_v63  ;;  %v7601_v29 = vld [vmem:[#allocation5 + $0x6c8] sm:$0xf]  ;;  %v10338_v0 = vld [vmem:[#allocation5 + $0x6d4] sm:$0xf0]  ;;  %v7474_v39 = vor.u32 %v10306_v28, %v7473_v16 }
 0x1c1   :  { %5424 = vmatpush.bf16.msra.mxu0 %v6754_v35  ;;  %v7729_v30 = vld [vmem:[#allocation5 + $0x7c8] sm:$0xf]  ;;  %v10370_v33 = vld [vmem:[#allocation5 + $0x7d4] sm:$0xf0]  ;;  %v7346_v35 = vor.u32 %v10274_v14, %v7345_v11  ;;  %v7602_v41 = vor.u32 %v10338_v0, %v7601_v29 }
 0x1c2   :  { %5437 = vmatpush.bf16.msra.mxu1 %v6882_v44  ;;  %v7329_v44 = vld [vmem:[#allocation5 + $0x4a8] sm:$0xf]  ;;  %v7730_v47 = vor.u32 %v10370_v33, %v7729_v30  ;;  %v10302_v12 = vld [vmem:[#allocation5 + $0x5b4] sm:$0xf0] }
 0x1c3   :  { %5450 = vmatpush.bf16.msra.mxu2 %v7010_v45  ;;  %v10270_v45 = vld [vmem:[#allocation5 + $0x4b4] sm:$0xf0]  ;;  %v7457_v46 = vld [vmem:[#allocation5 + $0x5a8] sm:$0xf] }
 0x1c4   :  { %5463 = vmatpush.bf16.msra.mxu3 %v7138_v49  ;;  %v7585_v48 = vld [vmem:[#allocation5 + $0x6a8] sm:$0xf]  ;;  %v10334_v49 = vld [vmem:[#allocation5 + $0x6b4] sm:$0xf0]  ;;  %v7330_v52 = vor.u32 %v10270_v45, %v7329_v44  ;;  %v7458_v54 = vor.u32 %v10302_v12, %v7457_v46 }
 0x1c5   :  { %5425 = vmatpush.bf16.msra.mxu0 %v6738_v57  ;;  %v7713_v50 = vld [vmem:[#allocation5 + $0x7a8] sm:$0xf]  ;;  %v10366_v51 = vld [vmem:[#allocation5 + $0x7b4] sm:$0xf0]  ;;  %v7586_v55 = vor.u32 %v10334_v49, %v7585_v48 }
 0x1c6   :  { %5438 = vmatpush.bf16.msra.mxu1 %v6866_v60  ;;  %v7313_v56 = vld [vmem:[#allocation5 + $0x488] sm:$0xf]  ;;  %v10266_v17 = vld [vmem:[#allocation5 + $0x494] sm:$0xf0]  ;;  %v7714_v43 = vor.u32 %v10366_v51, %v7713_v50 }
 0x1c7   :  { %5451 = vmatpush.bf16.msra.mxu2 %v6994_v62  ;;  %v7441_v57 = vld [vmem:[#allocation5 + $0x588] sm:$0xf]  ;;  %v10298_v58 = vld [vmem:[#allocation5 + $0x594] sm:$0xf0]  ;;  %v5219_v62 = vpop.f32.mrf.mxu0 }
 0x1c8   :  { %5464 = vmatpush.bf16.msra.mxu3 %v7122_v53  ;;  %5426 = vmatmul.bf16.vlgmr.msra.gmra.mxu0 %v11264_v9  ;;  %v7569_v59 = vld [vmem:[#allocation5 + $0x688] sm:$0xf]  ;;  %v10330_v60 = vld [vmem:[#allocation5 + $0x694] sm:$0xf0]  ;;  %v5220_v53 = vadd.f32 %v5219_v62, %v11378_v4 }
 0x1c9   :  { %5470 = vmatpush.bf16.msrb.mxu0 %v7362_v6  ;;  %5439 = vmatmul.bf16.vlgmr.msra.gmra.mxu1 %v11271_v25  ;;  %v7697_v63 = vld [vmem:[#allocation5 + $0x788] sm:$0xf]  ;;  %v10362_v3 = vld [vmem:[#allocation5 + $0x794] sm:$0xf0]  ;;  %v7314_v6 = vor.u32 %v10266_v17, %v7313_v56  ;;  %v7570_v11 = vor.u32 %v10330_v60, %v7569_v59 }
 0x1ca   :  { %5483 = vmatpush.bf16.msrb.mxu1 %v7490_v7  ;;  %5452 = vmatmul.bf16.vlgmr.msra.gmra.mxu2 %v11262_v8  ;;  %v5232_v7 = vpop.f32.mrf.mxu1  ;;  %v7297_v14 = vld [vmem:[#allocation5 + $0x468] sm:$0xf]  ;;  %v10262_v16 = vld [vmem:[#allocation5 + $0x474] sm:$0xf0]  ;;  %v7698_v28 = vor.u32 %v10362_v3, %v7697_v63 }
 0x1cb   :  { %5496 = vmatpush.bf16.msrb.mxu2 %v7618_v10  ;;  %5465 = vmatmul.bf16.vlgmr.msra.gmra.mxu3 %v11266_v15  ;;  %v7442_v10 = vor.u32 %v10298_v58, %v7441_v57  ;;  %v5233_v29 = vadd.f32 %v5232_v7, %v5220_v53  ;;  %v10294_v0 = vld [vmem:[#allocation5 + $0x574] sm:$0xf0]  ;;  %v7553_v30 = vld [vmem:[#allocation5 + $0x668] sm:$0xf] }
 0x1cc   :  { %5509 = vmatpush.bf16.msrb.mxu3 %v7746_v21  ;;  %v7425_v21 = vld [vmem:[#allocation5 + $0x568] sm:$0xf]  ;;  %v10326_v33 = vld [vmem:[#allocation5 + $0x674] sm:$0xf0] }
 0x1cd   :  { %5471 = vmatpush.bf16.msrb.mxu0 %v7346_v35  ;;  %v7681_v35 = vld [vmem:[#allocation5 + $0x768] sm:$0xf]  ;;  %v7426_v4 = vor.u32 %v10294_v0, %v7425_v21  ;;  %v7554_v44 = vor.u32 %v10326_v33, %v7553_v30  ;;  %v10258_v46 = vld [vmem:[#allocation5 + $0x454] sm:$0xf0]  ;;  %v5245_v48 = vpop.f32.mrf.mxu2 }
 0x1ce   :  { %5484 = vmatpush.bf16.msrb.mxu1 %v7474_v39  ;;  %v10358_v39 = vld [vmem:[#allocation5 + $0x774] sm:$0xf0]  ;;  %v7281_v45 = vld [vmem:[#allocation5 + $0x448] sm:$0xf] }
 0x1cf   :  { %5497 = vmatpush.bf16.msrb.mxu2 %v7602_v41  ;;  %v7298_v41 = vor.u32 %v10262_v16, %v7297_v14  ;;  %v7682_v12 = vor.u32 %v10358_v39, %v7681_v35  ;;  %v10290_v49 = vld [vmem:[#allocation5 + $0x554] sm:$0xf0]  ;;  %v7537_v50 = vld [vmem:[#allocation5 + $0x648] sm:$0xf]  ;;  %v5221_v17 = vpop.f32.mrf.mxu0  ;;  %v7282_v57 = vor.u32 %v10258_v46, %v7281_v45 }
 0x1d0   :  { %5510 = vmatpush.bf16.msrb.mxu3 %v7730_v47  ;;  %v7409_v47 = vld [vmem:[#allocation5 + $0x548] sm:$0xf]  ;;  %v10322_v51 = vld [vmem:[#allocation5 + $0x654] sm:$0xf0] }
 0x1d1   :  { %5472 = vmatpush.bf16.msrb.mxu0 %v7330_v52  ;;  %v5246_v52 = vadd.f32 %v5245_v48, %v5233_v29  ;;  %v10354_v56 = vld [vmem:[#allocation5 + $0x754] sm:$0xf0]  ;;  %v7410_v59 = vor.u32 %v10290_v49, %v7409_v47  ;;  %v7538_v60 = vor.u32 %v10322_v51, %v7537_v50  ;;  %v7265_v62 = vld [vmem:[#allocation5 + $0x428] sm:$0xf] }
 0x1d2   :  { %5485 = vmatpush.bf16.msrb.mxu1 %v7458_v54  ;;  %v5258_v54 = vpop.f32.mrf.mxu3  ;;  %v10254_v63 = vld [vmem:[#allocation5 + $0x434] sm:$0xf0]  ;;  %v7393_v3 = vld [vmem:[#allocation5 + $0x528] sm:$0xf] }
 0x1d3   :  { %5498 = vmatpush.bf16.msrb.mxu2 %v7586_v55  ;;  %v7665_v55 = vld [vmem:[#allocation5 + $0x748] sm:$0xf]  ;;  %v11385_v58 = vadd.f32 %v5258_v54, %v5246_v52  ;;  %v10350_v14 = vld [vmem:[#allocation5 + $0x734] sm:$0xf0]  ;;  %v7266_v16 = vor.u32 %v10254_v63, %v7265_v62 }
 0x1d4   :  { %5511 = vmatpush.bf16.msrb.mxu3 %v7714_v43  ;;  %v5234_v43 = vpop.f32.mrf.mxu1  ;;  %v7666_v53 = vor.u32 %v10354_v56, %v7665_v55  ;;  %v7521_v7 = vld [vmem:[#allocation5 + $0x628] sm:$0xf]  ;;  %v10282_v33 = vld [vmem:[#allocation5 + $0x514] sm:$0xf0] }
 0x1d5   :  { %5473 = vmatpush.bf16.msrb.mxu0 %v7314_v6  ;;  %v10286_v6 = vld [vmem:[#allocation5 + $0x534] sm:$0xf0]  ;;  %v7249_v21 = vld [vmem:[#allocation5 + $0x408] sm:$0xf]  ;;  %v5247_v45 = vpop.f32.mrf.mxu2 }
 0x1d6   :  { %5486 = vmatpush.bf16.msrb.mxu1 %v7442_v10  ;;  %v10318_v10 = vld [vmem:[#allocation5 + $0x634] sm:$0xf0]  ;;  %v7394_v29 = vor.u32 %v10286_v6, %v7393_v3  ;;  %v7377_v30 = vld [vmem:[#allocation5 + $0x508] sm:$0xf] }
 0x1d7   :  { %5499 = vmatpush.bf16.msrb.mxu2 %v7570_v11  ;;  %v7649_v11 = vld [vmem:[#allocation5 + $0x728] sm:$0xf]  ;;  %v7522_v0 = vor.u32 %v10318_v10, %v7521_v7  ;;  %v10406_v47 = vld [vmem:[#allocation5 + $0x8f4] sm:$0xf0]  ;;  %v7378_v54 = vor.u32 %v10282_v33, %v7377_v30 }
 0x1d8   :  { %5512 = vmatpush.bf16.msrb.mxu3 %v7698_v28  ;;  %v10250_v28 = vld [vmem:[#allocation5 + $0x414] sm:$0xf0]  ;;  %v7505_v35 = vld [vmem:[#allocation5 + $0x608] sm:$0xf]  ;;  %v7650_v39 = vor.u32 %v10350_v14, %v7649_v11 }
 0x1d9   :  { %5474 = vmatpush.bf16.msrb.mxu0 %v7298_v41  ;;  %v10314_v41 = vld [vmem:[#allocation5 + $0x614] sm:$0xf0]  ;;  %v7873_v46 = vld [vmem:[#allocation5 + $0x8e8] sm:$0xf]  ;;  %v7250_v49 = vor.u32 %v10250_v28, %v7249_v21 }
 0x1da   :  { %5487 = vmatpush.bf16.msrb.mxu1 %v7426_v4  ;;  %v7633_v4 = vld [vmem:[#allocation5 + $0x708] sm:$0xf]  ;;  %v5260_v48 = vpop.f32.mrf.mxu3  ;;  %v10438_v50 = vld [vmem:[#allocation5 + $0x9f4] sm:$0xf0]  ;;  %v7506_v55 = vor.u32 %v10314_v41, %v7505_v35  ;;  %v7874_v43 = vor.u32 %v10406_v47, %v7873_v46 }
 0x1db   :  { %5500 = vmatpush.bf16.msrb.mxu2 %v7554_v44  ;;  %v10346_v44 = vld [vmem:[#allocation5 + $0x714] sm:$0xf0]  ;;  %v8129_v51 = vld [vmem:[#allocation5 + $0xae8] sm:$0xf] }
 0x1dc   :  { %5513 = vmatpush.bf16.msrb.mxu3 %v7682_v12  ;;  %v8001_v12 = vld [vmem:[#allocation5 + $0x9e8] sm:$0xf]  ;;  %v10470_v52 = vld [vmem:[#allocation5 + $0xaf4] sm:$0xf0] }
 0x1dd   :  { %5475 = vmatpush.bf16.msrb.mxu0 %v7282_v57  ;;  %v8257_v56 = vld [vmem:[#allocation5 + $0xbe8] sm:$0xf]  ;;  %v10502_v17 = vld [vmem:[#allocation5 + $0xbf4] sm:$0xf0]  ;;  %v7634_v57 = vor.u32 %v10346_v44, %v7633_v4 }
 0x1de   :  { %5488 = vmatpush.bf16.msrb.mxu1 %v7410_v59  ;;  %v8002_v59 = vor.u32 %v10438_v50, %v8001_v12  ;;  %v7857_v62 = vld [vmem:[#allocation5 + $0x8c8] sm:$0xf]  ;;  %v10402_v63 = vld [vmem:[#allocation5 + $0x8d4] sm:$0xf0] }
 0x1df   :  { %5501 = vmatpush.bf16.msrb.mxu2 %v7538_v60  ;;  %v8130_v60 = vor.u32 %v10470_v52, %v8129_v51  ;;  %v7985_v3 = vld [vmem:[#allocation5 + $0x9c8] sm:$0xf]  ;;  %v10434_v6 = vld [vmem:[#allocation5 + $0x9d4] sm:$0xf0] }
 0x1e0   :  { %5514 = vmatpush.bf16.msrb.mxu3 %v7666_v53  ;;  %v8258_v53 = vor.u32 %v10502_v17, %v8257_v56  ;;  %v8113_v7 = vld [vmem:[#allocation5 + $0xac8] sm:$0xf]  ;;  %v10466_v10 = vld [vmem:[#allocation5 + $0xad4] sm:$0xf0]  ;;  %v7986_v21 = vor.u32 %v10434_v6, %v7985_v3 }
 0x1e1   :  { %5476 = vmatpush.bf16.msrb.mxu0 %v7266_v16  ;;  %v8241_v11 = vld [vmem:[#allocation5 + $0xbc8] sm:$0xf]  ;;  %v10498_v14 = vld [vmem:[#allocation5 + $0xbd4] sm:$0xf0]  ;;  %v7858_v16 = vor.u32 %v10402_v63, %v7857_v62  ;;  %v8114_v28 = vor.u32 %v10466_v10, %v8113_v7 }
 0x1e2   :  { %5489 = vmatpush.bf16.msrb.mxu1 %v7394_v29  ;;  %v7841_v29 = vld [vmem:[#allocation5 + $0x8a8] sm:$0xf]  ;;  %v8242_v33 = vor.u32 %v10498_v14, %v8241_v11  ;;  %v10430_v35 = vld [vmem:[#allocation5 + $0x9b4] sm:$0xf0] }
 0x1e3   :  { %5502 = vmatpush.bf16.msrb.mxu2 %v7522_v0  ;;  %v10398_v0 = vld [vmem:[#allocation5 + $0x8b4] sm:$0xf0]  ;;  %v7969_v30 = vld [vmem:[#allocation5 + $0x9a8] sm:$0xf] }
 0x1e4   :  { %5515 = vmatpush.bf16.msrb.mxu3 %v7650_v39  ;;  %v8097_v39 = vld [vmem:[#allocation5 + $0xaa8] sm:$0xf]  ;;  %v10462_v41 = vld [vmem:[#allocation5 + $0xab4] sm:$0xf0]  ;;  %v7842_v45 = vor.u32 %v10398_v0, %v7841_v29  ;;  %v7970_v46 = vor.u32 %v10430_v35, %v7969_v30 }
 0x1e5   :  { %5477 = vmatpush.bf16.msrb.mxu0 %v7250_v49  ;;  %v8225_v4 = vld [vmem:[#allocation5 + $0xba8] sm:$0xf]  ;;  %v10494_v44 = vld [vmem:[#allocation5 + $0xbb4] sm:$0xf0]  ;;  %v8098_v47 = vor.u32 %v10462_v41, %v8097_v39 }
 0x1e6   :  { %5490 = vmatpush.bf16.msrb.mxu1 %v7378_v54  ;;  %v7825_v12 = vld [vmem:[#allocation5 + $0x888] sm:$0xf]  ;;  %v10394_v48 = vld [vmem:[#allocation5 + $0x894] sm:$0xf0]  ;;  %v8226_v50 = vor.u32 %v10494_v44, %v8225_v4 }
 0x1e7   :  { %5503 = vmatpush.bf16.msrb.mxu2 %v7506_v55  ;;  %v7953_v49 = vld [vmem:[#allocation5 + $0x988] sm:$0xf]  ;;  %v10426_v51 = vld [vmem:[#allocation5 + $0x994] sm:$0xf0]  ;;  %v5271_v55 = vpop.f32.mrf.mxu0 }
 0x1e8   :  { %5516 = vmatpush.bf16.msrb.mxu3 %v7634_v57  ;;  %5478 = vmatmul.bf16.vlgmr.msrb.gmra.mxu0 %v11276_v37  ;;  %v8081_v52 = vld [vmem:[#allocation5 + $0xa88] sm:$0xf]  ;;  %v10458_v54 = vld [vmem:[#allocation5 + $0xa94] sm:$0xf0]  ;;  %v5272_v57 = vadd.f32 %v5271_v55, %v11385_v58 }
 0x1e9   :  { %5522 = vmatpush.bf16.msra.mxu0 %v7874_v43  ;;  %5491 = vmatmul.bf16.vlgmr.msrb.gmra.mxu1 %v11280_v40  ;;  %v8209_v56 = vld [vmem:[#allocation5 + $0xb88] sm:$0xf]  ;;  %v10490_v17 = vld [vmem:[#allocation5 + $0xb94] sm:$0xf0]  ;;  %v7826_v43 = vor.u32 %v10394_v48, %v7825_v12  ;;  %v8082_v62 = vor.u32 %v10458_v54, %v8081_v52 }
 0x1ea   :  { %5535 = vmatpush.bf16.msra.mxu1 %v8002_v59  ;;  %5504 = vmatmul.bf16.vlgmr.msrb.gmra.mxu2 %v11274_v34  ;;  %v5284_v59 = vpop.f32.mrf.mxu1  ;;  %v7809_v63 = vld [vmem:[#allocation5 + $0x868] sm:$0xf]  ;;  %v10390_v3 = vld [vmem:[#allocation5 + $0x874] sm:$0xf0]  ;;  %v8210_v6 = vor.u32 %v10490_v17, %v8209_v56 }
 0x1eb   :  { %5548 = vmatpush.bf16.msra.mxu2 %v8130_v60  ;;  %5517 = vmatmul.bf16.vlgmr.msrb.gmra.mxu3 %v11278_v38  ;;  %v7954_v60 = vor.u32 %v10426_v51, %v7953_v49  ;;  %v5285_v7 = vadd.f32 %v5284_v59, %v5272_v57  ;;  %v10422_v10 = vld [vmem:[#allocation5 + $0x974] sm:$0xf0]  ;;  %v8065_v11 = vld [vmem:[#allocation5 + $0xa68] sm:$0xf] }
 0x1ec   :  { %5561 = vmatpush.bf16.msra.mxu3 %v8258_v53  ;;  %v7937_v53 = vld [vmem:[#allocation5 + $0x968] sm:$0xf]  ;;  %v10454_v14 = vld [vmem:[#allocation5 + $0xa74] sm:$0xf0] }
 0x1ed   :  { %5523 = vmatpush.bf16.msra.mxu0 %v7858_v16  ;;  %v8193_v16 = vld [vmem:[#allocation5 + $0xb68] sm:$0xf]  ;;  %v7938_v58 = vor.u32 %v10422_v10, %v7937_v53  ;;  %v8066_v29 = vor.u32 %v10454_v14, %v8065_v11  ;;  %v10386_v30 = vld [vmem:[#allocation5 + $0x854] sm:$0xf0]  ;;  %v5297_v39 = vpop.f32.mrf.mxu2 }
 0x1ee   :  { %5536 = vmatpush.bf16.msra.mxu1 %v7986_v21  ;;  %v10486_v21 = vld [vmem:[#allocation5 + $0xb74] sm:$0xf0]  ;;  %v7793_v0 = vld [vmem:[#allocation5 + $0x848] sm:$0xf] }
 0x1ef   :  { %5549 = vmatpush.bf16.msra.mxu2 %v8114_v28  ;;  %v7810_v28 = vor.u32 %v10390_v3, %v7809_v63  ;;  %v8194_v35 = vor.u32 %v10486_v21, %v8193_v16  ;;  %v10418_v41 = vld [vmem:[#allocation5 + $0x954] sm:$0xf0]  ;;  %v8049_v4 = vld [vmem:[#allocation5 + $0xa48] sm:$0xf]  ;;  %v5273_v48 = vpop.f32.mrf.mxu0  ;;  %v7794_v49 = vor.u32 %v10386_v30, %v7793_v0 }
 0x1f0   :  { %5562 = vmatpush.bf16.msra.mxu3 %v8242_v33  ;;  %v7921_v33 = vld [vmem:[#allocation5 + $0x948] sm:$0xf]  ;;  %v10450_v44 = vld [vmem:[#allocation5 + $0xa54] sm:$0xf0] }
 0x1f1   :  { %5524 = vmatpush.bf16.msra.mxu0 %v7842_v45  ;;  %v5298_v45 = vadd.f32 %v5297_v39, %v5285_v7  ;;  %v10482_v12 = vld [vmem:[#allocation5 + $0xb54] sm:$0xf0]  ;;  %v7922_v52 = vor.u32 %v10418_v41, %v7921_v33  ;;  %v8050_v54 = vor.u32 %v10450_v44, %v8049_v4  ;;  %v7777_v55 = vld [vmem:[#allocation5 + $0x828] sm:$0xf] }
 0x1f2   :  { %5537 = vmatpush.bf16.msra.mxu1 %v7970_v46  ;;  %v5310_v46 = vpop.f32.mrf.mxu3  ;;  %v10382_v56 = vld [vmem:[#allocation5 + $0x834] sm:$0xf0]  ;;  %v7905_v17 = vld [vmem:[#allocation5 + $0x928] sm:$0xf] }
 0x1f3   :  { %5550 = vmatpush.bf16.msra.mxu2 %v8098_v47  ;;  %v8177_v47 = vld [vmem:[#allocation5 + $0xb48] sm:$0xf]  ;;  %v11392_v51 = vadd.f32 %v5310_v46, %v5298_v45  ;;  %v10478_v63 = vld [vmem:[#allocation5 + $0xb34] sm:$0xf0]  ;;  %v7778_v3 = vor.u32 %v10382_v56, %v7777_v55 }
 0x1f4   :  { %5563 = vmatpush.bf16.msra.mxu3 %v8226_v50  ;;  %v5286_v50 = vpop.f32.mrf.mxu1  ;;  %v8178_v57 = vor.u32 %v10482_v12, %v8177_v47  ;;  %v8033_v59 = vld [vmem:[#allocation5 + $0xa28] sm:$0xf]  ;;  %v10410_v14 = vld [vmem:[#allocation5 + $0x914] sm:$0xf0] }
 0x1f5   :  { %5525 = vmatpush.bf16.msra.mxu0 %v7826_v43  ;;  %v10414_v43 = vld [vmem:[#allocation5 + $0x934] sm:$0xf0]  ;;  %v7761_v53 = vld [vmem:[#allocation5 + $0x808] sm:$0xf]  ;;  %v5299_v0 = vpop.f32.mrf.mxu2 }
 0x1f6   :  { %5538 = vmatpush.bf16.msra.mxu1 %v7954_v60  ;;  %v10446_v60 = vld [vmem:[#allocation5 + $0xa34] sm:$0xf0]  ;;  %v7906_v7 = vor.u32 %v10414_v43, %v7905_v17  ;;  %v7889_v11 = vld [vmem:[#allocation5 + $0x908] sm:$0xf] }
 0x1f7   :  { %5551 = vmatpush.bf16.msra.mxu2 %v8082_v62  ;;  %v8161_v62 = vld [vmem:[#allocation5 + $0xb28] sm:$0xf]  ;;  %v8034_v10 = vor.u32 %v10446_v60, %v8033_v59  ;;  %v10534_v33 = vld [vmem:[#allocation5 + $0xcf4] sm:$0xf0]  ;;  %v7890_v46 = vor.u32 %v10410_v14, %v7889_v11 }
 0x1f8   :  { %5564 = vmatpush.bf16.msra.mxu3 %v8210_v6  ;;  %v10378_v6 = vld [vmem:[#allocation5 + $0x814] sm:$0xf0]  ;;  %v8017_v16 = vld [vmem:[#allocation5 + $0xa08] sm:$0xf]  ;;  %v8162_v21 = vor.u32 %v10478_v63, %v8161_v62 }
 0x1f9   :  { %5526 = vmatpush.bf16.msra.mxu0 %v7810_v28  ;;  %v10442_v28 = vld [vmem:[#allocation5 + $0xa14] sm:$0xf0]  ;;  %v8385_v30 = vld [vmem:[#allocation5 + $0xce8] sm:$0xf]  ;;  %v7762_v41 = vor.u32 %v10378_v6, %v7761_v53 }
 0x1fa   :  { %5539 = vmatpush.bf16.msra.mxu1 %v7938_v58  ;;  %v8145_v58 = vld [vmem:[#allocation5 + $0xb08] sm:$0xf]  ;;  %v5312_v39 = vpop.f32.mrf.mxu3  ;;  %v10566_v4 = vld [vmem:[#allocation5 + $0xdf4] sm:$0xf0]  ;;  %v8018_v47 = vor.u32 %v10442_v28, %v8017_v16  ;;  %v8386_v50 = vor.u32 %v10534_v33, %v8385_v30 }
 0x1fb   :  { %5552 = vmatpush.bf16.msra.mxu2 %v8066_v29  ;;  %v10474_v29 = vld [vmem:[#allocation5 + $0xb14] sm:$0xf0]  ;;  %v8641_v44 = vld [vmem:[#allocation5 + $0xee8] sm:$0xf] }
 0x1fc   :  { %5565 = vmatpush.bf16.msra.mxu3 %v8194_v35  ;;  %v8513_v35 = vld [vmem:[#allocation5 + $0xde8] sm:$0xf]  ;;  %v10598_v45 = vld [vmem:[#allocation5 + $0xef4] sm:$0xf0] }
 0x1fd   :  { %5527 = vmatpush.bf16.msra.mxu0 %v7794_v49  ;;  %v8769_v12 = vld [vmem:[#allocation5 + $0xfe8] sm:$0xf]  ;;  %v10630_v48 = vld [vmem:[#allocation5 + $0xff4] sm:$0xf0]  ;;  %v8146_v49 = vor.u32 %v10474_v29, %v8145_v58 }
 0x1fe   :  { %5540 = vmatpush.bf16.msra.mxu1 %v7922_v52  ;;  %v8514_v52 = vor.u32 %v10566_v4, %v8513_v35  ;;  %v8369_v55 = vld [vmem:[#allocation5 + $0xcc8] sm:$0xf]  ;;  %v10530_v56 = vld [vmem:[#allocation5 + $0xcd4] sm:$0xf0] }
 0x1ff   :  { %5553 = vmatpush.bf16.msra.mxu2 %v8050_v54  ;;  %v8642_v54 = vor.u32 %v10598_v45, %v8641_v44  ;;  %v8497_v17 = vld [vmem:[#allocation5 + $0xdc8] sm:$0xf]  ;;  %v10562_v43 = vld [vmem:[#allocation5 + $0xdd4] sm:$0xf0] }
 0x200   :  { %5566 = vmatpush.bf16.msra.mxu3 %v8178_v57  ;;  %v8770_v57 = vor.u32 %v10630_v48, %v8769_v12  ;;  %v8625_v59 = vld [vmem:[#allocation5 + $0xec8] sm:$0xf]  ;;  %v10594_v60 = vld [vmem:[#allocation5 + $0xed4] sm:$0xf0]  ;;  %v8498_v53 = vor.u32 %v10562_v43, %v8497_v17 }
 0x201   :  { %5528 = vmatpush.bf16.msra.mxu0 %v7778_v3  ;;  %v8753_v62 = vld [vmem:[#allocation5 + $0xfc8] sm:$0xf]  ;;  %v10626_v63 = vld [vmem:[#allocation5 + $0xfd4] sm:$0xf0]  ;;  %v8370_v3 = vor.u32 %v10530_v56, %v8369_v55  ;;  %v8626_v6 = vor.u32 %v10594_v60, %v8625_v59 }
 0x202   :  { %5541 = vmatpush.bf16.msra.mxu1 %v7906_v7  ;;  %v8353_v7 = vld [vmem:[#allocation5 + $0xca8] sm:$0xf]  ;;  %v8754_v14 = vor.u32 %v10626_v63, %v8753_v62  ;;  %v10558_v16 = vld [vmem:[#allocation5 + $0xdb4] sm:$0xf0] }
 0x203   :  { %5554 = vmatpush.bf16.msra.mxu2 %v8034_v10  ;;  %v10526_v10 = vld [vmem:[#allocation5 + $0xcb4] sm:$0xf0]  ;;  %v8481_v11 = vld [vmem:[#allocation5 + $0xda8] sm:$0xf] }
 0x204   :  { %5567 = vmatpush.bf16.msra.mxu3 %v8162_v21  ;;  %v8609_v21 = vld [vmem:[#allocation5 + $0xea8] sm:$0xf]  ;;  %v10590_v28 = vld [vmem:[#allocation5 + $0xeb4] sm:$0xf0]  ;;  %v8354_v0 = vor.u32 %v10526_v10, %v8353_v7  ;;  %v8482_v30 = vor.u32 %v10558_v16, %v8481_v11 }
 0x205   :  { %5529 = vmatpush.bf16.msra.mxu0 %v7762_v41  ;;  %v8737_v58 = vld [vmem:[#allocation5 + $0xfa8] sm:$0xf]  ;;  %v10622_v29 = vld [vmem:[#allocation5 + $0xfb4] sm:$0xf0]  ;;  %v8610_v33 = vor.u32 %v10590_v28, %v8609_v21 }
 0x206   :  { %5542 = vmatpush.bf16.msra.mxu1 %v7890_v46  ;;  %v8337_v35 = vld [vmem:[#allocation5 + $0xc88] sm:$0xf]  ;;  %v10522_v39 = vld [vmem:[#allocation5 + $0xc94] sm:$0xf0]  ;;  %v8738_v4 = vor.u32 %v10622_v29, %v8737_v58 }
 0x207   :  { %5555 = vmatpush.bf16.msra.mxu2 %v8018_v47  ;;  %v8465_v41 = vld [vmem:[#allocation5 + $0xd88] sm:$0xf]  ;;  %v10554_v44 = vld [vmem:[#allocation5 + $0xd94] sm:$0xf0]  ;;  %v5323_v47 = vpop.f32.mrf.mxu0 }
 0x208   :  { %5568 = vmatpush.bf16.msra.mxu3 %v8146_v49  ;;  %5530 = vmatmul.bf16.vlgmr.msra.gmra.mxu0 %v11286_v18  ;;  %v8593_v45 = vld [vmem:[#allocation5 + $0xe88] sm:$0xf]  ;;  %v10586_v46 = vld [vmem:[#allocation5 + $0xe94] sm:$0xf0]  ;;  %v5324_v49 = vadd.f32 %v5323_v47, %v11392_v51 }
 0x209   :  { %5574 = vmatpush.bf16.msrb.mxu0 %v8386_v50  ;;  %5543 = vmatmul.bf16.vlgmr.msra.gmra.mxu1 %v11290_v23  ;;  %v8721_v12 = vld [vmem:[#allocation5 + $0xf88] sm:$0xf]  ;;  %v10618_v48 = vld [vmem:[#allocation5 + $0xf94] sm:$0xf0]  ;;  %v8338_v50 = vor.u32 %v10522_v39, %v8337_v35  ;;  %v8594_v55 = vor.u32 %v10586_v46, %v8593_v45 }
 0x20a   :  { %5587 = vmatpush.bf16.msrb.mxu1 %v8514_v52  ;;  %5556 = vmatmul.bf16.vlgmr.msra.gmra.mxu2 %v11288_v22  ;;  %v5336_v52 = vpop.f32.mrf.mxu1  ;;  %v8321_v56 = vld [vmem:[#allocation5 + $0xc68] sm:$0xf]  ;;  %v10518_v17 = vld [vmem:[#allocation5 + $0xc74] sm:$0xf0]  ;;  %v8722_v43 = vor.u32 %v10618_v48, %v8721_v12 }
 0x20b   :  { %5600 = vmatpush.bf16.msrb.mxu2 %v8642_v54  ;;  %5569 = vmatmul.bf16.vlgmr.msra.gmra.mxu3 %v11292_v27  ;;  %v8466_v54 = vor.u32 %v10554_v44, %v8465_v41  ;;  %v5337_v59 = vadd.f32 %v5336_v52, %v5324_v49  ;;  %v10550_v60 = vld [vmem:[#allocation5 + $0xd74] sm:$0xf0]  ;;  %v8577_v62 = vld [vmem:[#allocation5 + $0xe68] sm:$0xf] }
 0x20c   :  { %5613 = vmatpush.bf16.msrb.mxu3 %v8770_v57  ;;  %v8449_v57 = vld [vmem:[#allocation5 + $0xd68] sm:$0xf]  ;;  %v10582_v63 = vld [vmem:[#allocation5 + $0xe74] sm:$0xf0] }
 0x20d   :  { %5575 = vmatpush.bf16.msrb.mxu0 %v8370_v3  ;;  %v8705_v3 = vld [vmem:[#allocation5 + $0xf68] sm:$0xf]  ;;  %v8450_v51 = vor.u32 %v10550_v60, %v8449_v57  ;;  %v8578_v7 = vor.u32 %v10582_v63, %v8577_v62  ;;  %v10514_v11 = vld [vmem:[#allocation5 + $0xc54] sm:$0xf0]  ;;  %v5349_v21 = vpop.f32.mrf.mxu2 }
 0x20e   :  { %5588 = vmatpush.bf16.msrb.mxu1 %v8498_v53  ;;  %v10614_v53 = vld [vmem:[#allocation5 + $0xf74] sm:$0xf0]  ;;  %v8305_v10 = vld [vmem:[#allocation5 + $0xc48] sm:$0xf] }
 0x20f   :  { %5601 = vmatpush.bf16.msrb.mxu2 %v8626_v6  ;;  %v8322_v6 = vor.u32 %v10518_v17, %v8321_v56  ;;  %v8706_v16 = vor.u32 %v10614_v53, %v8705_v3  ;;  %v10546_v28 = vld [vmem:[#allocation5 + $0xd54] sm:$0xf0]  ;;  %v8561_v58 = vld [vmem:[#allocation5 + $0xe48] sm:$0xf]  ;;  %v5325_v39 = vpop.f32.mrf.mxu0  ;;  %v8306_v41 = vor.u32 %v10514_v11, %v8305_v10 }
 0x210   :  { %5614 = vmatpush.bf16.msrb.mxu3 %v8754_v14  ;;  %v8433_v14 = vld [vmem:[#allocation5 + $0xd48] sm:$0xf]  ;;  %v10578_v29 = vld [vmem:[#allocation5 + $0xe54] sm:$0xf0] }
 0x211   :  { %5576 = vmatpush.bf16.msrb.mxu0 %v8354_v0  ;;  %v5350_v0 = vadd.f32 %v5349_v21, %v5337_v59  ;;  %v10610_v35 = vld [vmem:[#allocation5 + $0xf54] sm:$0xf0]  ;;  %v8434_v45 = vor.u32 %v10546_v28, %v8433_v14  ;;  %v8562_v46 = vor.u32 %v10578_v29, %v8561_v58  ;;  %v8289_v47 = vld [vmem:[#allocation5 + $0xc28] sm:$0xf] }
 0x212   :  { %5589 = vmatpush.bf16.msrb.mxu1 %v8482_v30  ;;  %v5362_v30 = vpop.f32.mrf.mxu3  ;;  %v10510_v12 = vld [vmem:[#allocation5 + $0xc34] sm:$0xf0]  ;;  %v8417_v48 = vld [vmem:[#allocation5 + $0xd28] sm:$0xf] }
 0x213   :  { %5602 = vmatpush.bf16.msrb.mxu2 %v8610_v33  ;;  %v8689_v33 = vld [vmem:[#allocation5 + $0xf48] sm:$0xf]  ;;  %v11399_v44 = vadd.f32 %v5362_v30, %v5350_v0  ;;  %v10606_v56 = vld [vmem:[#allocation5 + $0xf34] sm:$0xf0]  ;;  %v8290_v17 = vor.u32 %v10510_v12, %v8289_v47 }
 0x214   :  { %5615 = vmatpush.bf16.msrb.mxu3 %v8738_v4  ;;  %v5338_v4 = vpop.f32.mrf.mxu1  ;;  %v8690_v49 = vor.u32 %v10610_v35, %v8689_v33  ;;  %v8545_v52 = vld [vmem:[#allocation5 + $0xe28] sm:$0xf]  ;;  %v10538_v63 = vld [vmem:[#allocation5 + $0xd14] sm:$0xf0] }
 0x215   :  { %5577 = vmatpush.bf16.msrb.mxu0 %v8338_v50  ;;  %v10542_v50 = vld [vmem:[#allocation5 + $0xd34] sm:$0xf0]  ;;  %v8273_v57 = vld [vmem:[#allocation5 + $0xc08] sm:$0xf]  ;;  %v5351_v10 = vpop.f32.mrf.mxu2 }
 0x216   :  { %5590 = vmatpush.bf16.msrb.mxu1 %v8466_v54  ;;  %v10574_v54 = vld [vmem:[#allocation5 + $0xe34] sm:$0xf0]  ;;  %v8418_v59 = vor.u32 %v10542_v50, %v8417_v48  ;;  %v8401_v62 = vld [vmem:[#allocation5 + $0xd08] sm:$0xf] }
 0x217   :  { %5603 = vmatpush.bf16.msrb.mxu2 %v8594_v55  ;;  %v8673_v55 = vld [vmem:[#allocation5 + $0xf28] sm:$0xf]  ;;  %v8546_v60 = vor.u32 %v10574_v54, %v8545_v52  ;;  %v10662_v14 = vld [vmem:[#allocation5 + $0x10f4] sm:$0xf0]  ;;  %v8402_v30 = vor.u32 %v10538_v63, %v8401_v62 }
 0x218   :  { %5616 = vmatpush.bf16.msrb.mxu3 %v8722_v43  ;;  %v10506_v43 = vld [vmem:[#allocation5 + $0xc14] sm:$0xf0]  ;;  %v8529_v3 = vld [vmem:[#allocation5 + $0xe08] sm:$0xf]  ;;  %v8674_v53 = vor.u32 %v10606_v56, %v8673_v55 }
 0x219   :  { %5578 = vmatpush.bf16.msrb.mxu0 %v8322_v6  ;;  %v10570_v6 = vld [vmem:[#allocation5 + $0xe14] sm:$0xf0]  ;;  %v8897_v11 = vld [vmem:[#allocation5 + $0x10e8] sm:$0xf]  ;;  %v8274_v28 = vor.u32 %v10506_v43, %v8273_v57 }
 0x21a   :  { %5591 = vmatpush.bf16.msrb.mxu1 %v8450_v51  ;;  %v8657_v51 = vld [vmem:[#allocation5 + $0xf08] sm:$0xf]  ;;  %v5364_v21 = vpop.f32.mrf.mxu3  ;;  %v10694_v58 = vld [vmem:[#allocation5 + $0x11f4] sm:$0xf0]  ;;  %v8530_v33 = vor.u32 %v10570_v6, %v8529_v3  ;;  %v8898_v4 = vor.u32 %v10662_v14, %v8897_v11 }
 0x21b   :  { %5604 = vmatpush.bf16.msrb.mxu2 %v8578_v7  ;;  %v10602_v7 = vld [vmem:[#allocation5 + $0xf14] sm:$0xf0]  ;;  %v9153_v29 = vld [vmem:[#allocation5 + $0x12e8] sm:$0xf] }
 0x21c   :  { %5617 = vmatpush.bf16.msrb.mxu3 %v8706_v16  ;;  %v9025_v16 = vld [vmem:[#allocation5 + $0x11e8] sm:$0xf]  ;;  %v10726_v0 = vld [vmem:[#allocation5 + $0x12f4] sm:$0xf0] }
 0x21d   :  { %5579 = vmatpush.bf16.msrb.mxu0 %v8306_v41  ;;  %v9281_v35 = vld [vmem:[#allocation5 + $0x13e8] sm:$0xf]  ;;  %v10758_v39 = vld [vmem:[#allocation5 + $0x13f4] sm:$0xf0]  ;;  %v8658_v41 = vor.u32 %v10602_v7, %v8657_v51 }
 0x21e   :  { %5592 = vmatpush.bf16.msrb.mxu1 %v8434_v45  ;;  %v9026_v45 = vor.u32 %v10694_v58, %v9025_v16  ;;  %v8881_v47 = vld [vmem:[#allocation5 + $0x10c8] sm:$0xf]  ;;  %v10658_v12 = vld [vmem:[#allocation5 + $0x10d4] sm:$0xf0] }
 0x21f   :  { %5605 = vmatpush.bf16.msrb.mxu2 %v8562_v46  ;;  %v9154_v46 = vor.u32 %v10726_v0, %v9153_v29  ;;  %v9009_v48 = vld [vmem:[#allocation5 + $0x11c8] sm:$0xf]  ;;  %v10690_v50 = vld [vmem:[#allocation5 + $0x11d4] sm:$0xf0] }
 0x220   :  { %5618 = vmatpush.bf16.msrb.mxu3 %v8690_v49  ;;  %v9282_v49 = vor.u32 %v10758_v39, %v9281_v35  ;;  %v9137_v52 = vld [vmem:[#allocation5 + $0x12c8] sm:$0xf]  ;;  %v10722_v54 = vld [vmem:[#allocation5 + $0x12d4] sm:$0xf0]  ;;  %v9010_v57 = vor.u32 %v10690_v50, %v9009_v48 }
 0x221   :  { %5580 = vmatpush.bf16.msrb.mxu0 %v8290_v17  ;;  %v9265_v55 = vld [vmem:[#allocation5 + $0x13c8] sm:$0xf]  ;;  %v10754_v56 = vld [vmem:[#allocation5 + $0x13d4] sm:$0xf0]  ;;  %v8882_v17 = vor.u32 %v10658_v12, %v8881_v47  ;;  %v9138_v43 = vor.u32 %v10722_v54, %v9137_v52 }
 0x222   :  { %5593 = vmatpush.bf16.msrb.mxu1 %v8418_v59  ;;  %v8865_v59 = vld [vmem:[#allocation5 + $0x10a8] sm:$0xf]  ;;  %v9266_v63 = vor.u32 %v10754_v56, %v9265_v55  ;;  %v10686_v3 = vld [vmem:[#allocation5 + $0x11b4] sm:$0xf0] }
 0x223   :  { %5606 = vmatpush.bf16.msrb.mxu2 %v8546_v60  ;;  %v10654_v60 = vld [vmem:[#allocation5 + $0x10b4] sm:$0xf0]  ;;  %v8993_v62 = vld [vmem:[#allocation5 + $0x11a8] sm:$0xf] }
 0x224   :  { %5619 = vmatpush.bf16.msrb.mxu3 %v8674_v53  ;;  %v9121_v53 = vld [vmem:[#allocation5 + $0x12a8] sm:$0xf]  ;;  %v10718_v6 = vld [vmem:[#allocation5 + $0x12b4] sm:$0xf0]  ;;  %v8866_v10 = vor.u32 %v10654_v60, %v8865_v59  ;;  %v8994_v11 = vor.u32 %v10686_v3, %v8993_v62 }
 0x225   :  { %5581 = vmatpush.bf16.msrb.mxu0 %v8274_v28  ;;  %v9249_v51 = vld [vmem:[#allocation5 + $0x13a8] sm:$0xf]  ;;  %v10750_v7 = vld [vmem:[#allocation5 + $0x13b4] sm:$0xf0]  ;;  %v9122_v14 = vor.u32 %v10718_v6, %v9121_v53 }
 0x226   :  { %5594 = vmatpush.bf16.msrb.mxu1 %v8402_v30  ;;  %v8849_v16 = vld [vmem:[#allocation5 + $0x1088] sm:$0xf]  ;;  %v10650_v21 = vld [vmem:[#allocation5 + $0x1094] sm:$0xf0]  ;;  %v9250_v58 = vor.u32 %v10750_v7, %v9249_v51 }
 0x227   :  { %5607 = vmatpush.bf16.msrb.mxu2 %v8530_v33  ;;  %v8977_v28 = vld [vmem:[#allocation5 + $0x1188] sm:$0xf]  ;;  %v10682_v29 = vld [vmem:[#allocation5 + $0x1194] sm:$0xf0]  ;;  %v5375_v33 = vpop.f32.mrf.mxu0 }
 0x228   :  { %5620 = vmatpush.bf16.msrb.mxu3 %v8658_v41  ;;  %5582 = vmatmul.bf16.vlgmr.msrb.gmra.mxu0 %v11298_v13  ;;  %v9105_v0 = vld [vmem:[#allocation5 + $0x1288] sm:$0xf]  ;;  %v10714_v30 = vld [vmem:[#allocation5 + $0x1294] sm:$0xf0]  ;;  %v5376_v41 = vadd.f32 %v5375_v33, %v11399_v44 }
 0x229   :  { %5626 = vmatpush.bf16.msra.mxu0 %v8898_v4  ;;  %5595 = vmatmul.bf16.vlgmr.msrb.gmra.mxu1 %v11302_v20  ;;  %v9233_v35 = vld [vmem:[#allocation5 + $0x1388] sm:$0xf]  ;;  %v10746_v39 = vld [vmem:[#allocation5 + $0x1394] sm:$0xf0]  ;;  %v8850_v4 = vor.u32 %v10650_v21, %v8849_v16  ;;  %v9106_v47 = vor.u32 %v10714_v30, %v9105_v0 }
 0x22a   :  { %5639 = vmatpush.bf16.msra.mxu1 %v9026_v45  ;;  %5608 = vmatmul.bf16.vlgmr.msrb.gmra.mxu2 %v11300_v19  ;;  %v5388_v45 = vpop.f32.mrf.mxu1  ;;  %v8833_v12 = vld [vmem:[#allocation5 + $0x1068] sm:$0xf]  ;;  %v10646_v48 = vld [vmem:[#allocation5 + $0x1074] sm:$0xf0]  ;;  %v9234_v50 = vor.u32 %v10746_v39, %v9233_v35 }
 0x22b   :  { %5652 = vmatpush.bf16.msra.mxu2 %v9154_v46  ;;  %5621 = vmatmul.bf16.vlgmr.msrb.gmra.mxu3 %v11304_v26  ;;  %v8978_v46 = vor.u32 %v10682_v29, %v8977_v28  ;;  %v5389_v52 = vadd.f32 %v5388_v45, %v5376_v41  ;;  %v10678_v54 = vld [vmem:[#allocation5 + $0x1174] sm:$0xf0]  ;;  %v9089_v55 = vld [vmem:[#allocation5 + $0x1268] sm:$0xf] }
 0x22c   :  { %5665 = vmatpush.bf16.msra.mxu3 %v9282_v49  ;;  %v8961_v49 = vld [vmem:[#allocation5 + $0x1168] sm:$0xf]  ;;  %v10710_v56 = vld [vmem:[#allocation5 + $0x1274] sm:$0xf0] }
 0x22d   :  { %5627 = vmatpush.bf16.msra.mxu0 %v8882_v17  ;;  %v9217_v17 = vld [vmem:[#allocation5 + $0x1368] sm:$0xf]  ;;  %v8962_v44 = vor.u32 %v10678_v54, %v8961_v49  ;;  %v9090_v59 = vor.u32 %v10710_v56, %v9089_v55  ;;  %v10642_v62 = vld [vmem:[#allocation5 + $0x1054] sm:$0xf0]  ;;  %v5401_v53 = vpop.f32.mrf.mxu2 }
 0x22e   :  { %5640 = vmatpush.bf16.msra.mxu1 %v9010_v57  ;;  %v10742_v57 = vld [vmem:[#allocation5 + $0x1374] sm:$0xf0]  ;;  %v8817_v60 = vld [vmem:[#allocation5 + $0x1048] sm:$0xf] }
 0x22f   :  { %5653 = vmatpush.bf16.msra.mxu2 %v9138_v43  ;;  %v8834_v43 = vor.u32 %v10646_v48, %v8833_v12  ;;  %v9218_v3 = vor.u32 %v10742_v57, %v9217_v17  ;;  %v10674_v6 = vld [vmem:[#allocation5 + $0x1154] sm:$0xf0]  ;;  %v9073_v51 = vld [vmem:[#allocation5 + $0x1248] sm:$0xf]  ;;  %v5377_v21 = vpop.f32.mrf.mxu0  ;;  %v8818_v28 = vor.u32 %v10642_v62, %v8817_v60 }
 0x230   :  { %5666 = vmatpush.bf16.msra.mxu3 %v9266_v63  ;;  %v8945_v63 = vld [vmem:[#allocation5 + $0x1148] sm:$0xf]  ;;  %v10706_v7 = vld [vmem:[#allocation5 + $0x1254] sm:$0xf0] }
 0x231   :  { %5628 = vmatpush.bf16.msra.mxu0 %v8866_v10  ;;  %v5402_v10 = vadd.f32 %v5401_v53, %v5389_v52  ;;  %v10738_v16 = vld [vmem:[#allocation5 + $0x1354] sm:$0xf0]  ;;  %v8946_v0 = vor.u32 %v10674_v6, %v8945_v63  ;;  %v9074_v30 = vor.u32 %v10706_v7, %v9073_v51  ;;  %v8801_v33 = vld [vmem:[#allocation5 + $0x1028] sm:$0xf] }
 0x232   :  { %5641 = vmatpush.bf16.msra.mxu1 %v8994_v11  ;;  %v5414_v11 = vpop.f32.mrf.mxu3  ;;  %v10638_v35 = vld [vmem:[#allocation5 + $0x1034] sm:$0xf0]  ;;  %v8929_v39 = vld [vmem:[#allocation5 + $0x1128] sm:$0xf] }
 0x233   :  { %5654 = vmatpush.bf16.msra.mxu2 %v9122_v14  ;;  %v9201_v14 = vld [vmem:[#allocation5 + $0x1348] sm:$0xf]  ;;  %v11406_v29 = vadd.f32 %v5414_v11, %v5402_v10  ;;  %v10734_v12 = vld [vmem:[#allocation5 + $0x1334] sm:$0xf0]  ;;  %v8802_v48 = vor.u32 %v10638_v35, %v8801_v33 }
 0x234   :  { %5667 = vmatpush.bf16.msra.mxu3 %v9250_v58  ;;  %v5390_v58 = vpop.f32.mrf.mxu1  ;;  %v9202_v41 = vor.u32 %v10738_v16, %v9201_v14  ;;  %v9057_v45 = vld [vmem:[#allocation5 + $0x1228] sm:$0xf]  ;;  %v10666_v56 = vld [vmem:[#allocation5 + $0x1114] sm:$0xf0] }
 0x235   :  { %5629 = vmatpush.bf16.msra.mxu0 %v8850_v4  ;;  %v10670_v4 = vld [vmem:[#allocation5 + $0x1134] sm:$0xf0]  ;;  %v8785_v49 = vld [vmem:[#allocation5 + $0x1008] sm:$0xf]  ;;  %v5403_v60 = vpop.f32.mrf.mxu2 }
 0x236   :  { %5642 = vmatpush.bf16.msra.mxu1 %v8978_v46  ;;  %v10702_v46 = vld [vmem:[#allocation5 + $0x1234] sm:$0xf0]  ;;  %v8930_v52 = vor.u32 %v10670_v4, %v8929_v39  ;;  %v8913_v55 = vld [vmem:[#allocation5 + $0x1108] sm:$0xf] }
 0x237   :  { %5655 = vmatpush.bf16.msra.mxu2 %v9106_v47  ;;  %v9185_v47 = vld [vmem:[#allocation5 + $0x1328] sm:$0xf]  ;;  %v9058_v54 = vor.u32 %v10702_v46, %v9057_v45  ;;  %v10790_v63 = vld [vmem:[#allocation5 + $0x14f4] sm:$0xf0]  ;;  %v8914_v11 = vor.u32 %v10666_v56, %v8913_v55 }
 0x238   :  { %5668 = vmatpush.bf16.msra.mxu3 %v9234_v50  ;;  %v10634_v50 = vld [vmem:[#allocation5 + $0x1014] sm:$0xf0]  ;;  %v9041_v17 = vld [vmem:[#allocation5 + $0x1208] sm:$0xf]  ;;  %v9186_v57 = vor.u32 %v10734_v12, %v9185_v47 }
 0x239   :  { %5630 = vmatpush.bf16.msra.mxu0 %v8834_v43  ;;  %v10698_v43 = vld [vmem:[#allocation5 + $0x1214] sm:$0xf0]  ;;  %v9409_v62 = vld [vmem:[#allocation5 + $0x14e8] sm:$0xf]  ;;  %v8786_v6 = vor.u32 %v10634_v50, %v8785_v49 }
 0x23a   :  { %5643 = vmatpush.bf16.msra.mxu1 %v8962_v44  ;;  %v9169_v44 = vld [vmem:[#allocation5 + $0x1308] sm:$0xf]  ;;  %v5416_v53 = vpop.f32.mrf.mxu3  ;;  %v10822_v51 = vld [vmem:[#allocation5 + $0x15f4] sm:$0xf0]  ;;  %v9042_v14 = vor.u32 %v10698_v43, %v9041_v17  ;;  %v9410_v58 = vor.u32 %v10790_v63, %v9409_v62 }
 0x23b   :  { %5656 = vmatpush.bf16.msra.mxu2 %v9090_v59  ;;  %v10730_v59 = vld [vmem:[#allocation5 + $0x1314] sm:$0xf0]  ;;  %v9665_v7 = vld [vmem:[#allocation5 + $0x16e8] sm:$0xf] }
 0x23c   :  { %5669 = vmatpush.bf16.msra.mxu3 %v9218_v3  ;;  %v9537_v3 = vld [vmem:[#allocation5 + $0x15e8] sm:$0xf]  ;;  %v10854_v10 = vld [vmem:[#allocation5 + $0x16f4] sm:$0xf0] }
 0x23d   :  { %5631 = vmatpush.bf16.msra.mxu0 %v8818_v28  ;;  %v9793_v16 = vld [vmem:[#allocation5 + $0x17e8] sm:$0xf]  ;;  %v10886_v21 = vld [vmem:[#allocation5 + $0x17f4] sm:$0xf0]  ;;  %v9170_v28 = vor.u32 %v10730_v59, %v9169_v44 }
 0x23e   :  { %5644 = vmatpush.bf16.msra.mxu1 %v8946_v0  ;;  %v9538_v0 = vor.u32 %v10822_v51, %v9537_v3  ;;  %v9393_v33 = vld [vmem:[#allocation5 + $0x14c8] sm:$0xf]  ;;  %v10786_v35 = vld [vmem:[#allocation5 + $0x14d4] sm:$0xf0]  ;;  %v10983_v51 = vld [vmem:[#allocation7] sm:$0xf] }
 0x23f   :  { %5657 = vmatpush.bf16.msra.mxu2 %v9074_v30  ;;  %v9666_v30 = vor.u32 %v10854_v10, %v9665_v7  ;;  %v9521_v39 = vld [vmem:[#allocation5 + $0x15c8] sm:$0xf]  ;;  %v10818_v4 = vld [vmem:[#allocation5 + $0x15d4] sm:$0xf0]  ;;  %v948_v7 = vperm.slane %v10983_v51, 2 }
 0x240   :  { %5670 = vmatpush.bf16.msra.mxu3 %v9202_v41  ;;  %v9794_v41 = vor.u32 %v10886_v21, %v9793_v16  ;;  %v9649_v45 = vld [vmem:[#allocation5 + $0x16c8] sm:$0xf]  ;;  %v10850_v46 = vld [vmem:[#allocation5 + $0x16d4] sm:$0xf0]  ;;  %v9522_v49 = vor.u32 %v10818_v4, %v9521_v39 }
 0x241   :  { %5632 = vmatpush.bf16.msra.mxu0 %v8802_v48  ;;  %v9777_v47 = vld [vmem:[#allocation5 + $0x17c8] sm:$0xf]  ;;  %v10882_v12 = vld [vmem:[#allocation5 + $0x17d4] sm:$0xf0]  ;;  %v9394_v48 = vor.u32 %v10786_v35, %v9393_v33  ;;  %v9650_v50 = vor.u32 %v10850_v46, %v9649_v45 }
 0x242   :  { %5645 = vmatpush.bf16.msra.mxu1 %v8930_v52  ;;  %v9377_v52 = vld [vmem:[#allocation5 + $0x14a8] sm:$0xf]  ;;  %v9778_v56 = vor.u32 %v10882_v12, %v9777_v47  ;;  %v10814_v17 = vld [vmem:[#allocation5 + $0x15b4] sm:$0xf0] }
 0x243   :  { %5658 = vmatpush.bf16.msra.mxu2 %v9058_v54  ;;  %v10782_v54 = vld [vmem:[#allocation5 + $0x14b4] sm:$0xf0]  ;;  %v9505_v55 = vld [vmem:[#allocation5 + $0x15a8] sm:$0xf] }
 0x244   :  { %5671 = vmatpush.bf16.msra.mxu3 %v9186_v57  ;;  %v9633_v57 = vld [vmem:[#allocation5 + $0x16a8] sm:$0xf]  ;;  %v10846_v43 = vld [vmem:[#allocation5 + $0x16b4] sm:$0xf0]  ;;  %v9378_v60 = vor.u32 %v10782_v54, %v9377_v52  ;;  %v9506_v63 = vor.u32 %v10814_v17, %v9505_v55 }
 0x245   :  { %5633 = vmatpush.bf16.msra.mxu0 %v8786_v6  ;;  %v9761_v44 = vld [vmem:[#allocation5 + $0x17a8] sm:$0xf]  ;;  %v10878_v59 = vld [vmem:[#allocation5 + $0x17b4] sm:$0xf0]  ;;  %v9634_v3 = vor.u32 %v10846_v43, %v9633_v57 }
 0x246   :  { %5646 = vmatpush.bf16.msra.mxu1 %v8914_v11  ;;  %v9361_v62 = vld [vmem:[#allocation5 + $0x1488] sm:$0xf]  ;;  %v10778_v53 = vld [vmem:[#allocation5 + $0x1494] sm:$0xf0]  ;;  %v9762_v10 = vor.u32 %v10878_v59, %v9761_v44  ;;  %v5440_v45 = vpop.f32.mrf.mxu1 }
 0x247   :  { %5659 = vmatpush.bf16.msra.mxu2 %v9042_v14  ;;  %v9489_v6 = vld [vmem:[#allocation5 + $0x1588] sm:$0xf]  ;;  %v10810_v11 = vld [vmem:[#allocation5 + $0x1594] sm:$0xf0] }
 0x248   :  { %5672 = vmatpush.bf16.msra.mxu3 %v9170_v28  ;;  %5634 = vmatmul.bf16.vlgmr.msra.gmra.mxu0 %v11310_v24  ;;  %v9617_v14 = vld [vmem:[#allocation5 + $0x1688] sm:$0xf]  ;;  %v10842_v16 = vld [vmem:[#allocation5 + $0x1694] sm:$0xf0] }
 0x249   :  { %5678 = vmatpush.bf16.msrb.mxu0 %v9410_v58  ;;  %5647 = vmatmul.bf16.vlgmr.msra.gmra.mxu1 %v11314_v32  ;;  %v9745_v21 = vld [vmem:[#allocation5 + $0x1788] sm:$0xf]  ;;  %v10874_v28 = vld [vmem:[#allocation5 + $0x1794] sm:$0xf0]  ;;  %v9362_v58 = vor.u32 %v10778_v53, %v9361_v62  ;;  %v9618_v33 = vor.u32 %v10842_v16, %v9617_v14 }
 0x24a   :  { %5691 = vmatpush.bf16.msrb.mxu1 %v9538_v0  ;;  %5660 = vmatmul.bf16.vlgmr.msra.gmra.mxu2 %v11312_v31  ;;  %v5427_v0 = vpop.f32.mrf.mxu0  ;;  %v9345_v35 = vld [vmem:[#allocation5 + $0x1468] sm:$0xf]  ;;  %v10774_v39 = vld [vmem:[#allocation5 + $0x1474] sm:$0xf0]  ;;  %v9746_v46 = vor.u32 %v10874_v28, %v9745_v21 }
 0x24b   :  { %5704 = vmatpush.bf16.msrb.mxu2 %v9666_v30  ;;  %5673 = vmatmul.bf16.vlgmr.msra.gmra.mxu3 %v11316_v36  ;;  %v9490_v30 = vor.u32 %v10810_v11, %v9489_v6  ;;  %v5428_v4 = vadd.f32 %v5427_v0, %v948_v7  ;;  %v10806_v47 = vld [vmem:[#allocation5 + $0x1574] sm:$0xf0]  ;;  %v9601_v12 = vld [vmem:[#allocation5 + $0x1668] sm:$0xf]  ;;  %v9346_v54 = vor.u32 %v10774_v39, %v9345_v35 }
 0x24c   :  { %5717 = vmatpush.bf16.msrb.mxu3 %v9794_v41  ;;  %v9473_v41 = vld [vmem:[#allocation5 + $0x1568] sm:$0xf]  ;;  %v10770_v57 = vld [vmem:[#allocation5 + $0x1454] sm:$0xf0] }
 0x24d   :  { %5679 = vmatpush.bf16.msrb.mxu0 %v9394_v48  ;;  %v10838_v48 = vld [vmem:[#allocation5 + $0x1674] sm:$0xf0]  ;;  %v5441_v52 = vadd.f32 %v5440_v45, %v5428_v4  ;;  %v9474_v55 = vor.u32 %v10806_v47, %v9473_v41  ;;  %v9329_v17 = vld [vmem:[#allocation5 + $0x1448] sm:$0xf]  ;;  %v5453_v44 = vpop.f32.mrf.mxu2 }
 0x24e   :  { %5692 = vmatpush.bf16.msrb.mxu1 %v9522_v49  ;;  %v9729_v49 = vld [vmem:[#allocation5 + $0x1768] sm:$0xf]  ;;  %v5466_v53 = vpop.f32.mrf.mxu3  ;;  %v10866_v51 = vld [vmem:[#allocation5 + $0x1754] sm:$0xf0]  ;;  %v9330_v7 = vor.u32 %v10770_v57, %v9329_v17  ;;  %v5442_v0 = vpop.f32.mrf.mxu1 }
 0x24f   :  { %5705 = vmatpush.bf16.msrb.mxu2 %v9650_v50  ;;  %v10870_v50 = vld [vmem:[#allocation5 + $0x1774] sm:$0xf0]  ;;  %v9457_v43 = vld [vmem:[#allocation5 + $0x1548] sm:$0xf]  ;;  %v6835_v0 = vld [vmem:[#allocation5 + $0xd8] sm:$0xf0] }
 0x250   :  { %5718 = vmatpush.bf16.msrb.mxu3 %v9778_v56  ;;  %v9602_v56 = vor.u32 %v10838_v48, %v9601_v12  ;;  %v9730_v59 = vor.u32 %v10870_v50, %v9729_v49  ;;  %v9585_v62 = vld [vmem:[#allocation5 + $0x1648] sm:$0xf]  ;;  %v10766_v28 = vld [vmem:[#allocation5 + $0x1434] sm:$0xf0] }
 0x251   :  { %5680 = vmatpush.bf16.msrb.mxu0 %v9378_v60  ;;  %v10802_v60 = vld [vmem:[#allocation5 + $0x1554] sm:$0xf0]  ;;  %v9713_v6 = vld [vmem:[#allocation5 + $0x1748] sm:$0xf] }
 0x252   :  { %5693 = vmatpush.bf16.msrb.mxu1 %v9506_v63  ;;  %v10834_v63 = vld [vmem:[#allocation5 + $0x1654] sm:$0xf0]  ;;  %v5429_v11 = vpop.f32.mrf.mxu0  ;;  %v9458_v14 = vor.u32 %v10802_v60, %v9457_v43  ;;  %v9313_v21 = vld [vmem:[#allocation5 + $0x1428] sm:$0xf]  ;;  %v10180_v60 = vld [vmem:[#allocation5 + $0x1ec] sm:$0xf] }
 0x253   :  { %5706 = vmatpush.bf16.msrb.mxu2 %v9634_v3  ;;  %v5454_v3 = vadd.f32 %v5453_v44, %v5441_v52  ;;  %v9586_v16 = vor.u32 %v10834_v63, %v9585_v62  ;;  %v9569_v35 = vld [vmem:[#allocation5 + $0x1628] sm:$0xf]  ;;  %v10830_v39 = vld [vmem:[#allocation5 + $0x1634] sm:$0xf0]  ;;  %v9314_v45 = vor.u32 %v10766_v28, %v9313_v21  ;;  %v10148_v44 = vld [vmem:[#allocation5 + $0xec] sm:$0xf] }
 0x254   :  { %5719 = vmatpush.bf16.msrb.mxu3 %v9762_v10  ;;  %v9697_v41 = vld [vmem:[#allocation5 + $0x1728] sm:$0xf]  ;;  %v10862_v4 = vld [vmem:[#allocation5 + $0x1734] sm:$0xf0]  ;;  %v9570_v48 = vor.u32 %v10830_v39, %v9569_v35  ;;  %v6979_v63 = vld [vmem:[#allocation5 + $0x1f8] sm:$0xf0] }
 0x255   :  { %5681 = vmatpush.bf16.msrb.mxu0 %v9362_v58  ;;  %v11412_v10 = vadd.f32 %v5466_v53, %v5454_v3  ;;  %v9441_v58 = vld [vmem:[#allocation5 + $0x1528] sm:$0xf]  ;;  %v10762_v47 = vld [vmem:[#allocation5 + $0x1414] sm:$0xf0]  ;;  %v10212_v3 = vld [vmem:[#allocation5 + $0x2ec] sm:$0xf]  ;;  %v6982_v21 = vor.u32 %v10180_v60, %v6979_v63 }
 0x256   :  { %5694 = vmatpush.bf16.msrb.mxu1 %v9490_v30  ;;  %v9714_v30 = vor.u32 %v10866_v51, %v9713_v6  ;;  %v9425_v49 = vld [vmem:[#allocation5 + $0x1508] sm:$0xf]  ;;  %v10794_v50 = vld [vmem:[#allocation5 + $0x1514] sm:$0xf0]  ;;  %v5468_v43 = vpop.f32.mrf.mxu3  ;;  %v7107_v53 = vld [vmem:[#allocation5 + $0x2f8] sm:$0xf0] }
 0x257   :  { %5707 = vmatpush.bf16.msrb.mxu2 %v9618_v33  ;;  %v10798_v33 = vld [vmem:[#allocation5 + $0x1534] sm:$0xf0]  ;;  %v9553_v52 = vld [vmem:[#allocation5 + $0x1608] sm:$0xf]  ;;  %v9426_v6 = vor.u32 %v10794_v50, %v9425_v49  ;;  %v7235_v11 = vld [vmem:[#allocation5 + $0x3f8] sm:$0xf0]  ;;  %v7110_v28 = vor.u32 %v10212_v3, %v7107_v53 }
 0x258   :  { %5720 = vmatpush.bf16.msrb.mxu3 %v9746_v46  ;;  %v9297_v46 = vld [vmem:[#allocation5 + $0x1408] sm:$0xf]  ;;  %v9442_v12 = vor.u32 %v10798_v33, %v9441_v58  ;;  %v10858_v57 = vld [vmem:[#allocation5 + $0x1714] sm:$0xf0]  ;;  %v10144_v58 = vld [vmem:[#allocation5 + $0xcc] sm:$0xf] }
 0x259   :  { %5682 = vmatpush.bf16.msrb.mxu0 %v9346_v54  ;;  %v5455_v54 = vpop.f32.mrf.mxu2  ;;  %v9681_v17 = vld [vmem:[#allocation5 + $0x1708] sm:$0xf]  ;;  %v9298_v62 = vor.u32 %v10762_v47, %v9297_v46  ;;  %v6963_v35 = vld [vmem:[#allocation5 + $0x1d8] sm:$0xf0]  ;;  %v10208_v39 = vld [vmem:[#allocation5 + $0x2cc] sm:$0xf]  ;;  %v6838_v46 = vor.u32 %v10144_v58, %v6835_v0 }
 0x25a   :  { %5695 = vmatpush.bf16.msrb.mxu1 %v9474_v55  ;;  %v9698_v55 = vor.u32 %v10862_v4, %v9697_v41  ;;  %v7091_v41 = vld [vmem:[#allocation5 + $0x2d8] sm:$0xf0]  ;;  %v10240_v4 = vld [vmem:[#allocation5 + $0x3cc] sm:$0xf] }
 0x25b   :  { %5708 = vmatpush.bf16.msrb.mxu2 %v9602_v56  ;;  %v10826_v56 = vld [vmem:[#allocation5 + $0x1614] sm:$0xf0]  ;;  %v6819_v49 = vld [vmem:[#allocation5 + $0xb8] sm:$0xf0]  ;;  %v10172_v50 = vld [vmem:[#allocation5 + $0x1ac] sm:$0xf] }
 0x25c   :  { %5721 = vmatpush.bf16.msrb.mxu3 %v9730_v59  ;;  %v6851_v59 = vld [vmem:[#allocation5 + $0xf8] sm:$0xf0]  ;;  %v9554_v51 = vor.u32 %v10826_v56, %v9553_v52  ;;  %v10136_v60 = vld [vmem:[#allocation5 + $0x8c] sm:$0xf] }
 0x25d   :  { %5683 = vmatpush.bf16.msrb.mxu0 %v9330_v7  ;;  %v10244_v7 = vld [vmem:[#allocation5 + $0x3ec] sm:$0xf]  ;;  %v6947_v54 = vld [vmem:[#allocation5 + $0x1b8] sm:$0xf0] }
 0x25e   :  { %5696 = vmatpush.bf16.msrb.mxu1 %v9458_v14  ;;  %v9682_v14 = vor.u32 %v10858_v57, %v9681_v17  ;;  %v7238_v33 = vor.u32 %v10244_v7, %v7235_v11  ;;  %v7075_v56 = vld [vmem:[#allocation5 + $0x2b8] sm:$0xf0]  ;;  %v10236_v17 = vld [vmem:[#allocation5 + $0x3ac] sm:$0xf] }
 0x25f   :  { %5709 = vmatpush.bf16.msrb.mxu2 %v9586_v16  ;;  %v6854_v16 = vor.u32 %v10148_v44, %v6851_v59  ;;  %v7203_v57 = vld [vmem:[#allocation5 + $0x3b8] sm:$0xf0]  ;;  %v6950_v44 = vor.u32 %v10172_v50, %v6947_v54  ;;  %v10168_v63 = vld [vmem:[#allocation5 + $0x18c] sm:$0xf] }
 0x260   :  { %5722 = vmatpush.bf16.msrb.mxu3 %v9714_v30  ;;  %v10176_v30 = vld [vmem:[#allocation5 + $0x1cc] sm:$0xf]  ;;  %v7206_v3 = vor.u32 %v10236_v17, %v7203_v57  ;;  %v6931_v53 = vld [vmem:[#allocation5 + $0x198] sm:$0xf0] }
 0x261   :  { %5684 = vmatpush.bf16.msrb.mxu0 %v9314_v45  ;;  %v7219_v45 = vld [vmem:[#allocation5 + $0x3d8] sm:$0xf0]  ;;  %v6966_v47 = vor.u32 %v10176_v30, %v6963_v35  ;;  %v10232_v7 = vld [vmem:[#allocation5 + $0x38c] sm:$0xf] }
 0x262   :  { %5697 = vmatpush.bf16.msrb.mxu1 %v9442_v12  ;;  %v7094_v12 = vor.u32 %v10208_v39, %v7091_v41  ;;  %v7222_v52 = vor.u32 %v10240_v4, %v7219_v45  ;;  %v7187_v11 = vld [vmem:[#allocation5 + $0x398] sm:$0xf0]  ;;  %v10132_v58 = vld [vmem:[#allocation5 + $0x6c] sm:$0xf] }
 0x263   :  { %5710 = vmatpush.bf16.msrb.mxu2 %v9570_v48  ;;  %v10140_v48 = vld [vmem:[#allocation5 + $0xac] sm:$0xf]  ;;  %v6787_v0 = vld [vmem:[#allocation5 + $0x78] sm:$0xf0]  ;;  %v7190_v39 = vor.u32 %v10232_v7, %v7187_v11 }
 0x264   :  { %5723 = vmatpush.bf16.msrb.mxu3 %v9698_v55  ;;  %v10204_v55 = vld [vmem:[#allocation5 + $0x2ac] sm:$0xf]  ;;  %v6822_v43 = vor.u32 %v10140_v48, %v6819_v49  ;;  %v6915_v41 = vld [vmem:[#allocation5 + $0x178] sm:$0xf0]  ;;  %v6790_v48 = vor.u32 %v10132_v58, %v6787_v0 }
 0x265   :  { %5685 = vmatpush.bf16.msrb.mxu0 %v9298_v62  ;;  %v7078_v59 = vor.u32 %v10204_v55, %v7075_v56  ;;  %v6803_v62 = vld [vmem:[#allocation5 + $0x98] sm:$0xf0]  ;;  %v10164_v30 = vld [vmem:[#allocation5 + $0x16c] sm:$0xf] }
 0x266   :  { %5698 = vmatpush.bf16.msrb.mxu1 %v9426_v6  ;;  %v10200_v6 = vld [vmem:[#allocation5 + $0x28c] sm:$0xf]  ;;  %v5492_v35 = vpop.f32.mrf.mxu1  ;;  %v7043_v45 = vld [vmem:[#allocation5 + $0x278] sm:$0xf0]  ;;  %v6918_v49 = vor.u32 %v10164_v30, %v6915_v41 }
 0x267   :  { %5711 = vmatpush.bf16.msrb.mxu2 %v9554_v51  ;;  %v7059_v51 = vld [vmem:[#allocation5 + $0x298] sm:$0xf0]  ;;  %v10196_v4 = vld [vmem:[#allocation5 + $0x26c] sm:$0xf] }
 0x268   :  { %5724 = vmatpush.bf16.msrb.mxu3 %v9682_v14  ;;  %5686 = vmatmul.bf16.vlgmr.msrb.gmra.mxu0 %v11324_v61  ;;  %v6806_v14 = vor.u32 %v10136_v60, %v6803_v62  ;;  %v7046_v50 = vor.u32 %v10196_v4, %v7043_v45  ;;  %v6771_v54 = vld [vmem:[#allocation5 + $0x58] sm:$0xf0]  ;;  %v10160_v55 = vld [vmem:[#allocation5 + $0x14c] sm:$0xf] }
 0x269   :  { %5730 = vmatpush.bf16.msra.mxu0 %v6854_v16  ;;  %5699 = vmatmul.bf16.vlgmr.msrb.gmra.mxu1 %v11328_v2  ;;  %v5479_v16 = vpop.f32.mrf.mxu0  ;;  %v6899_v17 = vld [vmem:[#allocation5 + $0x158] sm:$0xf0]  ;;  %v10192_v57 = vld [vmem:[#allocation5 + $0x24c] sm:$0xf] }
 0x26a   :  { %5743 = vmatpush.bf16.msra.mxu1 %v6982_v21  ;;  %5712 = vmatmul.bf16.vlgmr.msrb.gmra.mxu2 %v11326_v1  ;;  %v6934_v21 = vor.u32 %v10168_v63, %v6931_v53  ;;  %v10224_v60 = vld [vmem:[#allocation5 + $0x34c] sm:$0xf]  ;;  %v7155_v62 = vld [vmem:[#allocation5 + $0x358] sm:$0xf0] }
 0x26b   :  { %5756 = vmatpush.bf16.msra.mxu2 %v7110_v28  ;;  %5725 = vmatmul.bf16.vlgmr.msrb.gmra.mxu3 %v11330_v5  ;;  %v7062_v28 = vor.u32 %v10200_v6, %v7059_v51  ;;  %v6902_v6 = vor.u32 %v10160_v55, %v6899_v17  ;;  %v10124_v7 = vld [vmem:[#allocation5 + $0x2c] sm:$0xf]  ;;  %v6755_v11 = vld [vmem:[#allocation5 + $0x38] sm:$0xf0] }
 0x26c   :  { %5769 = vmatpush.bf16.msra.mxu3 %v7238_v33  ;;  %v5480_v33 = vadd.f32 %v5479_v16, %v11412_v10  ;;  %v10188_v58 = vld [vmem:[#allocation5 + $0x22c] sm:$0xf]  ;;  %v7011_v0 = vld [vmem:[#allocation5 + $0x238] sm:$0xf0] }
 0x26d   :  { %5731 = vmatpush.bf16.msra.mxu0 %v6838_v46  ;;  %v10228_v46 = vld [vmem:[#allocation5 + $0x36c] sm:$0xf]  ;;  %v5505_v56 = vpop.f32.mrf.mxu2  ;;  %v6739_v41 = vld [vmem:[#allocation5 + $0x18] sm:$0xf0]  ;;  %v7014_v45 = vor.u32 %v10188_v58, %v7011_v0 }
 0x26e   :  { %5744 = vmatpush.bf16.msra.mxu1 %v6966_v47  ;;  %v7171_v47 = vld [vmem:[#allocation5 + $0x378] sm:$0xf0]  ;;  %v5494_v16 = vpop.f32.mrf.mxu1  ;;  %v10220_v30 = vld [vmem:[#allocation5 + $0x32c] sm:$0xf] }
 0x26f   :  { %5757 = vmatpush.bf16.msra.mxu2 %v7094_v12  ;;  %v5493_v12 = vadd.f32 %v5492_v35, %v5480_v33  ;;  %v7174_v10 = vor.u32 %v10228_v46, %v7171_v47  ;;  %v7139_v33 = vld [vmem:[#allocation5 + $0x338] sm:$0xf0]  ;;  %v6758_v35 = vor.u32 %v10124_v7, %v6755_v11  ;;  %v10152_v46 = vld [vmem:[#allocation5 + $0x10c] sm:$0xf] }
 0x270   :  { %5770 = vmatpush.bf16.msra.mxu3 %v7222_v52  ;;  %v10128_v52 = vld [vmem:[#allocation5 + $0x4c] sm:$0xf]  ;;  %v6867_v47 = vld [vmem:[#allocation5 + $0x118] sm:$0xf0] }
 0x271   :  { %5732 = vmatpush.bf16.msra.mxu0 %v6822_v43  ;;  %v7027_v43 = vld [vmem:[#allocation5 + $0x258] sm:$0xf0]  ;;  %v6774_v63 = vor.u32 %v10128_v52, %v6771_v54  ;;  %v5481_v53 = vpop.f32.mrf.mxu0  ;;  %v10216_v52 = vld [vmem:[#allocation5 + $0x30c] sm:$0xf] }
 0x272   :  { %5745 = vmatpush.bf16.msra.mxu1 %v6950_v44  ;;  %v5506_v44 = vadd.f32 %v5505_v56, %v5493_v12  ;;  %v7030_v51 = vor.u32 %v10192_v57, %v7027_v43  ;;  %v10184_v12 = vld [vmem:[#allocation5 + $0x20c] sm:$0xf]  ;;  %v7123_v54 = vld [vmem:[#allocation5 + $0x318] sm:$0xf0] }
 0x273   :  { %5758 = vmatpush.bf16.msra.mxu2 %v7078_v59  ;;  %v5518_v59 = vpop.f32.mrf.mxu3  ;;  %v10276_v56 = vld [vmem:[#allocation5 + $0x4ec] sm:$0xf]  ;;  %v7491_v43 = vld [vmem:[#allocation5 + $0x5f8] sm:$0xf0] }
 0x274   :  { %5771 = vmatpush.bf16.msra.mxu3 %v7206_v3  ;;  %v11419_v3 = vadd.f32 %v5518_v59, %v5506_v44  ;;  %v10308_v17 = vld [vmem:[#allocation5 + $0x5ec] sm:$0xf]  ;;  %v7619_v59 = vld [vmem:[#allocation5 + $0x6f8] sm:$0xf0] }
 0x275   :  { %5733 = vmatpush.bf16.msra.mxu0 %v6806_v14  ;;  %v10156_v14 = vld [vmem:[#allocation5 + $0x12c] sm:$0xf]  ;;  %v7747_v53 = vld [vmem:[#allocation5 + $0x7f8] sm:$0xf0]  ;;  %v7494_v7 = vor.u32 %v10308_v17, %v7491_v43 }
 0x276   :  { %5746 = vmatpush.bf16.msra.mxu1 %v6934_v21  ;;  %v7158_v21 = vor.u32 %v10224_v60, %v7155_v62  ;;  %v10340_v44 = vld [vmem:[#allocation5 + $0x6ec] sm:$0xf]  ;;  %v6870_v60 = vor.u32 %v10152_v46, %v6867_v47  ;;  %v7347_v16 = vld [vmem:[#allocation5 + $0x4d8] sm:$0xf0] }
 0x277   :  { %5759 = vmatpush.bf16.msra.mxu2 %v7062_v28  ;;  %v6883_v28 = vld [vmem:[#allocation5 + $0x138] sm:$0xf0]  ;;  %v7622_v11 = vor.u32 %v10340_v44, %v7619_v59  ;;  %v10336_v0 = vld [vmem:[#allocation5 + $0x6cc] sm:$0xf] }
 0x278   :  { %5772 = vmatpush.bf16.msra.mxu3 %v7190_v39  ;;  %v10120_v39 = vld [vmem:[#allocation5 + $0xc] sm:$0xf]  ;;  %v6886_v4 = vor.u32 %v10156_v14, %v6883_v28  ;;  %v7475_v58 = vld [vmem:[#allocation5 + $0x5d8] sm:$0xf0] }
 0x279   :  { %5734 = vmatpush.bf16.msra.mxu0 %v6790_v48  ;;  %v5507_v48 = vpop.f32.mrf.mxu2  ;;  %v6742_v57 = vor.u32 %v10120_v39, %v6739_v41  ;;  %v10272_v14 = vld [vmem:[#allocation5 + $0x4cc] sm:$0xf]  ;;  %v7331_v46 = vld [vmem:[#allocation5 + $0x4b8] sm:$0xf0] }
 0x27a   :  { %5747 = vmatpush.bf16.msra.mxu1 %v6918_v49  ;;  %v7142_v49 = vor.u32 %v10220_v30, %v7139_v33  ;;  %v7603_v30 = vld [vmem:[#allocation5 + $0x6d8] sm:$0xf0]  ;;  %v10368_v33 = vld [vmem:[#allocation5 + $0x7cc] sm:$0xf]  ;;  %v7350_v39 = vor.u32 %v10272_v14, %v7347_v16 }
 0x27b   :  { %5760 = vmatpush.bf16.msra.mxu2 %v7046_v50  ;;  %v6995_v50 = vld [vmem:[#allocation5 + $0x218] sm:$0xf0]  ;;  %v5520_v55 = vpop.f32.mrf.mxu3  ;;  %v10300_v47 = vld [vmem:[#allocation5 + $0x5ac] sm:$0xf] }
 0x27c   :  { %5773 = vmatpush.bf16.msra.mxu3 %v7174_v10  ;;  %v7363_v10 = vld [vmem:[#allocation5 + $0x4f8] sm:$0xf0]  ;;  %v6998_v62 = vor.u32 %v10184_v12, %v6995_v50  ;;  %v10264_v17 = vld [vmem:[#allocation5 + $0x48c] sm:$0xf] }
 0x27d   :  { %5735 = vmatpush.bf16.msra.mxu0 %v6774_v63  ;;  %v10372_v63 = vld [vmem:[#allocation5 + $0x7ec] sm:$0xf]  ;;  %v7459_v48 = vld [vmem:[#allocation5 + $0x5b8] sm:$0xf0] }
 0x27e   :  { %5748 = vmatpush.bf16.msra.mxu1 %v6902_v6  ;;  %v7126_v6 = vor.u32 %v10216_v52, %v7123_v54  ;;  %v7750_v28 = vor.u32 %v10372_v63, %v7747_v53  ;;  %v7587_v50 = vld [vmem:[#allocation5 + $0x6b8] sm:$0xf0]  ;;  %v10364_v52 = vld [vmem:[#allocation5 + $0x7ac] sm:$0xf] }
 0x27f   :  { %5761 = vmatpush.bf16.msra.mxu2 %v7030_v51  ;;  %v7366_v51 = vor.u32 %v10276_v56, %v7363_v10  ;;  %v7715_v54 = vld [vmem:[#allocation5 + $0x7b8] sm:$0xf0]  ;;  %v7462_v56 = vor.u32 %v10300_v47, %v7459_v48  ;;  %v10296_v43 = vld [vmem:[#allocation5 + $0x58c] sm:$0xf] }
 0x280   :  { %5774 = vmatpush.bf16.msra.mxu3 %v7158_v21  ;;  %v10304_v21 = vld [vmem:[#allocation5 + $0x5cc] sm:$0xf]  ;;  %v7718_v44 = vor.u32 %v10364_v52, %v7715_v54  ;;  %v7699_v63 = vld [vmem:[#allocation5 + $0x798] sm:$0xf0] }
 0x281   :  { %5736 = vmatpush.bf16.msra.mxu0 %v6758_v35  ;;  %v7731_v35 = vld [vmem:[#allocation5 + $0x7d8] sm:$0xf0]  ;;  %v7478_v41 = vor.u32 %v10304_v21, %v7475_v58  ;;  %v10328_v59 = vld [vmem:[#allocation5 + $0x68c] sm:$0xf] }
 0x282   :  { %5749 = vmatpush.bf16.msra.mxu1 %v6886_v4  ;;  %v7606_v4 = vor.u32 %v10336_v0, %v7603_v30  ;;  %v7734_v12 = vor.u32 %v10368_v33, %v7731_v35  ;;  %v10292_v14 = vld [vmem:[#allocation5 + $0x56c] sm:$0xf]  ;;  %v7555_v0 = vld [vmem:[#allocation5 + $0x678] sm:$0xf0] }
 0x283   :  { %5762 = vmatpush.bf16.msra.mxu2 %v7014_v45  ;;  %v10268_v45 = vld [vmem:[#allocation5 + $0x4ac] sm:$0xf]  ;;  %v7683_v33 = vld [vmem:[#allocation5 + $0x778] sm:$0xf0] }
 0x284   :  { %5775 = vmatpush.bf16.msra.mxu3 %v7142_v49  ;;  %v10332_v49 = vld [vmem:[#allocation5 + $0x6ac] sm:$0xf]  ;;  %v7334_v55 = vor.u32 %v10268_v45, %v7331_v46 }
 0x285   :  { %5737 = vmatpush.bf16.msra.mxu0 %v6742_v57  ;;  %v7590_v10 = vor.u32 %v10332_v49, %v7587_v50  ;;  %v7315_v57 = vld [vmem:[#allocation5 + $0x498] sm:$0xf0]  ;;  %v10324_v58 = vld [vmem:[#allocation5 + $0x66c] sm:$0xf] }
 0x286   :  { %5750 = vmatpush.bf16.msra.mxu1 %v6870_v60  ;;  %v7571_v60 = vld [vmem:[#allocation5 + $0x698] sm:$0xf0]  ;;  %v7318_v53 = vor.u32 %v10264_v17, %v7315_v57  ;;  %v10356_v30 = vld [vmem:[#allocation5 + $0x76c] sm:$0xf] }
 0x287   :  { %5763 = vmatpush.bf16.msra.mxu2 %v6998_v62  ;;  %v5531_v62 = vpop.f32.mrf.mxu0  ;;  %v10288_v45 = vld [vmem:[#allocation5 + $0x54c] sm:$0xf]  ;;  %v7686_v46 = vor.u32 %v10356_v30, %v7683_v33  ;;  %v7539_v49 = vld [vmem:[#allocation5 + $0x658] sm:$0xf0] }
 0x288   :  { %5776 = vmatpush.bf16.msra.mxu3 %v7126_v6  ;;  %5738 = vmatmul.bf16.vlgmr.msra.gmra.mxu0 %v11264_v9  ;;  %v10360_v9 = vld [vmem:[#allocation5 + $0x78c] sm:$0xf]  ;;  %v7635_v33 = vld [vmem:[#allocation5 + $0x718] sm:$0xf0] }
 0x289   :  { %5782 = vmatpush.bf16.msrb.mxu0 %v7366_v51  ;;  %5751 = vmatmul.bf16.vlgmr.msra.gmra.mxu1 %v11271_v25  ;;  %v5544_v25 = vpop.f32.mrf.mxu1  ;;  %v7574_v51 = vor.u32 %v10328_v59, %v7571_v60  ;;  %v7702_v16 = vor.u32 %v10360_v9, %v7699_v63  ;;  %v10320_v48 = vld [vmem:[#allocation5 + $0x64c] sm:$0xf]  ;;  %v7267_v59 = vld [vmem:[#allocation5 + $0x438] sm:$0xf0] }
 0x28a   :  { %5795 = vmatpush.bf16.msrb.mxu1 %v7494_v7  ;;  %5764 = vmatmul.bf16.vlgmr.msra.gmra.mxu2 %v11262_v8  ;;  %v7443_v8 = vld [vmem:[#allocation5 + $0x598] sm:$0xf0]  ;;  %v10260_v7 = vld [vmem:[#allocation5 + $0x46c] sm:$0xf] }
 0x28b   :  { %5808 = vmatpush.bf16.msrb.mxu2 %v7622_v11  ;;  %5777 = vmatmul.bf16.vlgmr.msra.gmra.mxu3 %v11266_v15  ;;  %v5532_v15 = vadd.f32 %v5531_v62, %v11419_v3  ;;  %v7446_v6 = vor.u32 %v10296_v43, %v7443_v8  ;;  %v7299_v11 = vld [vmem:[#allocation5 + $0x478] sm:$0xf0]  ;;  %v10352_v54 = vld [vmem:[#allocation5 + $0x74c] sm:$0xf] }
 0x28c   :  { %5821 = vmatpush.bf16.msrb.mxu3 %v7750_v28  ;;  %v7427_v28 = vld [vmem:[#allocation5 + $0x578] sm:$0xf0]  ;;  %v7302_v35 = vor.u32 %v10260_v7, %v7299_v11  ;;  %v10252_v8 = vld [vmem:[#allocation5 + $0x42c] sm:$0xf] }
 0x28d   :  { %5783 = vmatpush.bf16.msrb.mxu0 %v7350_v39  ;;  %v5545_v21 = vadd.f32 %v5544_v25, %v5532_v15  ;;  %v7430_v3 = vor.u32 %v10292_v14, %v7427_v28  ;;  %v7558_v39 = vor.u32 %v10324_v58, %v7555_v0  ;;  %v5557_v47 = vpop.f32.mrf.mxu2  ;;  %v10284_v60 = vld [vmem:[#allocation5 + $0x52c] sm:$0xf]  ;;  %v7395_v9 = vld [vmem:[#allocation5 + $0x538] sm:$0xf0] }
 0x28e   :  { %5796 = vmatpush.bf16.msrb.mxu1 %v7478_v41  ;;  %v10256_v41 = vld [vmem:[#allocation5 + $0x44c] sm:$0xf]  ;;  %v5570_v52 = vpop.f32.mrf.mxu3  ;;  %v7523_v15 = vld [vmem:[#allocation5 + $0x638] sm:$0xf0]  ;;  %v7398_v11 = vor.u32 %v10284_v60, %v7395_v9 }
 0x28f   :  { %5809 = vmatpush.bf16.msrb.mxu2 %v7606_v4  ;;  %v7283_v4 = vld [vmem:[#allocation5 + $0x458] sm:$0xf0]  ;;  %v5558_v50 = vadd.f32 %v5557_v47, %v5545_v21  ;;  %v10316_v63 = vld [vmem:[#allocation5 + $0x62c] sm:$0xf] }
 0x290   :  { %5822 = vmatpush.bf16.msrb.mxu3 %v7734_v12  ;;  %v7411_v12 = vld [vmem:[#allocation5 + $0x558] sm:$0xf0]  ;;  %v7526_v14 = vor.u32 %v10316_v63, %v7523_v15  ;;  %v10312_v28 = vld [vmem:[#allocation5 + $0x60c] sm:$0xf] }
 0x291   :  { %5784 = vmatpush.bf16.msrb.mxu0 %v7334_v55  ;;  %v7667_v55 = vld [vmem:[#allocation5 + $0x758] sm:$0xf0]  ;;  %v5546_v17 = vpop.f32.mrf.mxu1  ;;  %v11426_v57 = vadd.f32 %v5570_v52, %v5558_v50  ;;  %v7414_v43 = vor.u32 %v10288_v45, %v7411_v12  ;;  %v10344_v30 = vld [vmem:[#allocation5 + $0x70c] sm:$0xf] }
 0x292   :  { %5797 = vmatpush.bf16.msrb.mxu1 %v7462_v56  ;;  %v5533_v56 = vpop.f32.mrf.mxu0  ;;  %v7670_v62 = vor.u32 %v10352_v54, %v7667_v55  ;;  %v7651_v25 = vld [vmem:[#allocation5 + $0x738] sm:$0xf0]  ;;  %v10468_v47 = vld [vmem:[#allocation5 + $0xaec] sm:$0xf]  ;;  %v7638_v54 = vor.u32 %v10344_v30, %v7635_v33 }
 0x293   :  { %5810 = vmatpush.bf16.msrb.mxu2 %v7590_v10  ;;  %v7286_v10 = vor.u32 %v10256_v41, %v7283_v4  ;;  %v7251_v7 = vld [vmem:[#allocation5 + $0x418] sm:$0xf0]  ;;  %v10436_v41 = vld [vmem:[#allocation5 + $0x9ec] sm:$0xf] }
 0x294   :  { %5823 = vmatpush.bf16.msrb.mxu3 %v7718_v44  ;;  %v7542_v44 = vor.u32 %v10320_v48, %v7539_v49  ;;  %v7379_v21 = vld [vmem:[#allocation5 + $0x518] sm:$0xf0]  ;;  %v10500_v50 = vld [vmem:[#allocation5 + $0xbec] sm:$0xf] }
 0x295   :  { %5785 = vmatpush.bf16.msrb.mxu0 %v7318_v53  ;;  %v10348_v53 = vld [vmem:[#allocation5 + $0x72c] sm:$0xf]  ;;  %v7507_v0 = vld [vmem:[#allocation5 + $0x618] sm:$0xf0] }
 0x296   :  { %5798 = vmatpush.bf16.msrb.mxu1 %v7446_v6  ;;  %v7270_v6 = vor.u32 %v10252_v8, %v7267_v59  ;;  %v7654_v58 = vor.u32 %v10348_v53, %v7651_v25  ;;  %v5572_v4 = vpop.f32.mrf.mxu3  ;;  %v8131_v12 = vld [vmem:[#allocation5 + $0xaf8] sm:$0xf0]  ;;  %v7510_v49 = vor.u32 %v10312_v28, %v7507_v0  ;;  %v10400_v17 = vld [vmem:[#allocation5 + $0x8cc] sm:$0xf] }
 0x297   :  { %5811 = vmatpush.bf16.msrb.mxu2 %v7574_v51  ;;  %v10248_v51 = vld [vmem:[#allocation5 + $0x40c] sm:$0xf]  ;;  %v8259_v52 = vld [vmem:[#allocation5 + $0xbf8] sm:$0xf0] }
 0x298   :  { %5824 = vmatpush.bf16.msrb.mxu3 %v7702_v16  ;;  %v10280_v16 = vld [vmem:[#allocation5 + $0x50c] sm:$0xf]  ;;  %v7254_v45 = vor.u32 %v10248_v51, %v7251_v7  ;;  %v8262_v8 = vor.u32 %v10500_v50, %v8259_v52  ;;  %v7987_v59 = vld [vmem:[#allocation5 + $0x9d8] sm:$0xf0] }
 0x299   :  { %5786 = vmatpush.bf16.msrb.mxu0 %v7302_v35  ;;  %v5559_v35 = vpop.f32.mrf.mxu2  ;;  %v7382_v48 = vor.u32 %v10280_v16, %v7379_v21  ;;  %v10464_v60 = vld [vmem:[#allocation5 + $0xacc] sm:$0xf]  ;;  %v8243_v63 = vld [vmem:[#allocation5 + $0xbd8] sm:$0xf0] }
 0x29a   :  { %5799 = vmatpush.bf16.msrb.mxu1 %v7430_v3  ;;  %v10404_v3 = vld [vmem:[#allocation5 + $0x8ec] sm:$0xf]  ;;  %v7843_v51 = vld [vmem:[#allocation5 + $0x8b8] sm:$0xf0] }
 0x29b   :  { %5812 = vmatpush.bf16.msrb.mxu2 %v7558_v39  ;;  %v7875_v39 = vld [vmem:[#allocation5 + $0x8f8] sm:$0xf0]  ;;  %v10496_v9 = vld [vmem:[#allocation5 + $0xbcc] sm:$0xf] }
 0x29c   :  { %5825 = vmatpush.bf16.msrb.mxu3 %v7686_v46  ;;  %v8003_v46 = vld [vmem:[#allocation5 + $0x9f8] sm:$0xf0]  ;;  %v7878_v55 = vor.u32 %v10404_v3, %v7875_v39  ;;  %v10428_v7 = vld [vmem:[#allocation5 + $0x9ac] sm:$0xf] }
 0x29d   :  { %5787 = vmatpush.bf16.msrb.mxu0 %v7286_v10  ;;  %v8006_v56 = vor.u32 %v10436_v41, %v8003_v46  ;;  %v8134_v10 = vor.u32 %v10468_v47, %v8131_v12  ;;  %v10460_v16 = vld [vmem:[#allocation5 + $0xaac] sm:$0xf]  ;;  %v8099_v21 = vld [vmem:[#allocation5 + $0xab8] sm:$0xf0] }
 0x29e   :  { %5800 = vmatpush.bf16.msrb.mxu1 %v7414_v43  ;;  %v7859_v43 = vld [vmem:[#allocation5 + $0x8d8] sm:$0xf0]  ;;  %v10492_v28 = vld [vmem:[#allocation5 + $0xbac] sm:$0xf]  ;;  %v8102_v33 = vor.u32 %v10460_v16, %v8099_v21 }
 0x29f   :  { %5813 = vmatpush.bf16.msrb.mxu2 %v7542_v44  ;;  %v10432_v44 = vld [vmem:[#allocation5 + $0x9cc] sm:$0xf]  ;;  %v7862_v15 = vor.u32 %v10400_v17, %v7859_v43  ;;  %v7827_v3 = vld [vmem:[#allocation5 + $0x898] sm:$0xf0] }
 0x2a0   :  { %5826 = vmatpush.bf16.msrb.mxu3 %v7670_v62  ;;  %v8115_v62 = vld [vmem:[#allocation5 + $0xad8] sm:$0xf0]  ;;  %v7990_v53 = vor.u32 %v10432_v44, %v7987_v59  ;;  %v10392_v35 = vld [vmem:[#allocation5 + $0x88c] sm:$0xf] }
 0x2a1   :  { %5788 = vmatpush.bf16.msrb.mxu0 %v7270_v6  ;;  %v8118_v25 = vor.u32 %v10464_v60, %v8115_v62  ;;  %v10396_v6 = vld [vmem:[#allocation5 + $0x8ac] sm:$0xf]  ;;  %v7955_v41 = vld [vmem:[#allocation5 + $0x998] sm:$0xf0]  ;;  %v7830_v12 = vor.u32 %v10392_v35, %v7827_v3 }
 0x2a2   :  { %5801 = vmatpush.bf16.msrb.mxu1 %v7398_v11  ;;  %v8246_v11 = vor.u32 %v10496_v9, %v8243_v63  ;;  %v7846_v0 = vor.u32 %v10396_v6, %v7843_v51  ;;  %v10456_v4 = vld [vmem:[#allocation5 + $0xa8c] sm:$0xf]  ;;  %v8211_v47 = vld [vmem:[#allocation5 + $0xb98] sm:$0xf0] }
 0x2a3   :  { %5814 = vmatpush.bf16.msrb.mxu2 %v7526_v14  ;;  %v7971_v14 = vld [vmem:[#allocation5 + $0x9b8] sm:$0xf0]  ;;  %v10388_v50 = vld [vmem:[#allocation5 + $0x86c] sm:$0xf] }
 0x2a4   :  { %5827 = vmatpush.bf16.msrb.mxu3 %v7654_v58  ;;  %v8227_v58 = vld [vmem:[#allocation5 + $0xbb8] sm:$0xf0]  ;;  %v7974_v30 = vor.u32 %v10428_v7, %v7971_v14  ;;  %v10452_v17 = vld [vmem:[#allocation5 + $0xa6c] sm:$0xf] }
 0x2a5   :  { %5789 = vmatpush.bf16.msrb.mxu0 %v7254_v45  ;;  %v8230_v39 = vor.u32 %v10492_v28, %v8227_v58  ;;  %v8083_v45 = vld [vmem:[#allocation5 + $0xa98] sm:$0xf0]  ;;  %v5583_v46 = vpop.f32.mrf.mxu0  ;;  %v10484_v44 = vld [vmem:[#allocation5 + $0xb6c] sm:$0xf] }
 0x2a6   :  { %5802 = vmatpush.bf16.msrb.mxu1 %v7382_v48  ;;  %v7811_v52 = vld [vmem:[#allocation5 + $0x878] sm:$0xf0]  ;;  %v10384_v62 = vld [vmem:[#allocation5 + $0x84c] sm:$0xf] }
 0x2a7   :  { %5815 = vmatpush.bf16.msrb.mxu2 %v7510_v49  ;;  %v8086_v49 = vor.u32 %v10456_v4, %v8083_v45  ;;  %v8067_v43 = vld [vmem:[#allocation5 + $0xa78] sm:$0xf0]  ;;  %v7814_v59 = vor.u32 %v10388_v50, %v7811_v52  ;;  %v10416_v63 = vld [vmem:[#allocation5 + $0x94c] sm:$0xf] }
 0x2a8   :  { %5828 = vmatpush.bf16.msrb.mxu3 %v7638_v54  ;;  %5790 = vmatmul.bf16.vlgmr.msrb.gmra.mxu0 %v11276_v37  ;;  %v10488_v37 = vld [vmem:[#allocation5 + $0xb8c] sm:$0xf]  ;;  %v8070_v60 = vor.u32 %v10452_v17, %v8067_v43  ;;  %v7795_v9 = vld [vmem:[#allocation5 + $0x858] sm:$0xf0] }
 0x2a9   :  { %5834 = vmatpush.bf16.msra.mxu0 %v7878_v55  ;;  %5803 = vmatmul.bf16.vlgmr.msrb.gmra.mxu1 %v11280_v40  ;;  %v5596_v40 = vpop.f32.mrf.mxu1  ;;  %v10420_v54 = vld [vmem:[#allocation5 + $0x96c] sm:$0xf]  ;;  %v8214_v55 = vor.u32 %v10488_v37, %v8211_v47  ;;  %v8051_v51 = vld [vmem:[#allocation5 + $0xa58] sm:$0xf0]  ;;  %v7798_v28 = vor.u32 %v10384_v62, %v7795_v9 }
 0x2aa   :  { %5847 = vmatpush.bf16.msra.mxu1 %v8006_v56  ;;  %5816 = vmatmul.bf16.vlgmr.msrb.gmra.mxu2 %v11274_v34  ;;  %v10424_v34 = vld [vmem:[#allocation5 + $0x98c] sm:$0xf]  ;;  %v8179_v16 = vld [vmem:[#allocation5 + $0xb58] sm:$0xf0] }
 0x2ab   :  { %5860 = vmatpush.bf16.msra.mxu2 %v8134_v10  ;;  %5829 = vmatmul.bf16.vlgmr.msrb.gmra.mxu3 %v11278_v38  ;;  %v5584_v38 = vadd.f32 %v5583_v46, %v11426_v57  ;;  %v7958_v48 = vor.u32 %v10424_v34, %v7955_v41  ;;  %v7939_v10 = vld [vmem:[#allocation5 + $0x978] sm:$0xf0]  ;;  %v10448_v6 = vld [vmem:[#allocation5 + $0xa4c] sm:$0xf] }
 0x2ac   :  { %5873 = vmatpush.bf16.msra.mxu3 %v8262_v8  ;;  %v8195_v8 = vld [vmem:[#allocation5 + $0xb78] sm:$0xf0]  ;;  %v7942_v57 = vor.u32 %v10420_v54, %v7939_v10  ;;  %v10480_v14 = vld [vmem:[#allocation5 + $0xb4c] sm:$0xf] }
 0x2ad   :  { %5835 = vmatpush.bf16.msra.mxu0 %v7862_v15  ;;  %v5597_v56 = vadd.f32 %v5596_v40, %v5584_v38  ;;  %v8198_v15 = vor.u32 %v10484_v44, %v8195_v8  ;;  %v5585_v21 = vpop.f32.mrf.mxu0  ;;  %v10380_v35 = vld [vmem:[#allocation5 + $0x82c] sm:$0xf]  ;;  %v7779_v3 = vld [vmem:[#allocation5 + $0x838] sm:$0xf0] }
 0x2ae   :  { %5848 = vmatpush.bf16.msra.mxu1 %v7990_v53  ;;  %v5609_v53 = vpop.f32.mrf.mxu2  ;;  %v10412_v34 = vld [vmem:[#allocation5 + $0x92c] sm:$0xf]  ;;  %v7907_v41 = vld [vmem:[#allocation5 + $0x938] sm:$0xf0]  ;;  %v7782_v47 = vor.u32 %v10380_v35, %v7779_v3 }
 0x2af   :  { %5861 = vmatpush.bf16.msra.mxu2 %v8118_v25  ;;  %v7923_v25 = vld [vmem:[#allocation5 + $0x958] sm:$0xf0]  ;;  %v5610_v7 = vadd.f32 %v5609_v53, %v5597_v56  ;;  %v10444_v4 = vld [vmem:[#allocation5 + $0xa2c] sm:$0xf]  ;;  %v7910_v40 = vor.u32 %v10412_v34, %v7907_v41 }
 0x2b0   :  { %5874 = vmatpush.bf16.msra.mxu3 %v8246_v11  ;;  %v5622_v11 = vpop.f32.mrf.mxu3  ;;  %v8035_v45 = vld [vmem:[#allocation5 + $0xa38] sm:$0xf0]  ;;  %v10476_v46 = vld [vmem:[#allocation5 + $0xb2c] sm:$0xf] }
 0x2b1   :  { %5836 = vmatpush.bf16.msra.mxu0 %v7846_v0  ;;  %v5598_v58 = vpop.f32.mrf.mxu1  ;;  %v11433_v0 = vadd.f32 %v5622_v11, %v5610_v7  ;;  %v8163_v37 = vld [vmem:[#allocation5 + $0xb38] sm:$0xf0]  ;;  %v10376_v38 = vld [vmem:[#allocation5 + $0x80c] sm:$0xf] }
 0x2b2   :  { %5849 = vmatpush.bf16.msra.mxu1 %v7974_v30  ;;  %v7926_v30 = vor.u32 %v10416_v63, %v7923_v25  ;;  %v7891_v50 = vld [vmem:[#allocation5 + $0x918] sm:$0xf0]  ;;  %v10440_v52 = vld [vmem:[#allocation5 + $0xa0c] sm:$0xf]  ;;  %v8166_v54 = vor.u32 %v10476_v46, %v8163_v37 }
 0x2b3   :  { %5862 = vmatpush.bf16.msra.mxu2 %v8102_v33  ;;  %v8054_v33 = vor.u32 %v10448_v6, %v8051_v51  ;;  %v10472_v56 = vld [vmem:[#allocation5 + $0xb0c] sm:$0xf]  ;;  %v8147_v10 = vld [vmem:[#allocation5 + $0xb18] sm:$0xf0] }
 0x2b4   :  { %5875 = vmatpush.bf16.msra.mxu3 %v8230_v39  ;;  %v8182_v39 = vor.u32 %v10480_v14, %v8179_v16  ;;  %v10532_v43 = vld [vmem:[#allocation5 + $0xcec] sm:$0xf]  ;;  %v8387_v44 = vld [vmem:[#allocation5 + $0xcf8] sm:$0xf0]  ;;  %v8150_v6 = vor.u32 %v10472_v56, %v8147_v10 }
 0x2b5   :  { %5837 = vmatpush.bf16.msra.mxu0 %v7830_v12  ;;  %v7763_v12 = vld [vmem:[#allocation5 + $0x818] sm:$0xf0]  ;;  %v10564_v8 = vld [vmem:[#allocation5 + $0xdec] sm:$0xf]  ;;  %v8390_v51 = vor.u32 %v10532_v43, %v8387_v44 }
 0x2b6   :  { %5850 = vmatpush.bf16.msra.mxu1 %v7958_v48  ;;  %v8038_v48 = vor.u32 %v10444_v4, %v8035_v45  ;;  %v5611_v17 = vpop.f32.mrf.mxu2  ;;  %v10596_v62 = vld [vmem:[#allocation5 + $0xeec] sm:$0xf]  ;;  %v8643_v9 = vld [vmem:[#allocation5 + $0xef8] sm:$0xf0] }
 0x2b7   :  { %5863 = vmatpush.bf16.msra.mxu2 %v8086_v49  ;;  %v10408_v49 = vld [vmem:[#allocation5 + $0x90c] sm:$0xf]  ;;  %v8771_v25 = vld [vmem:[#allocation5 + $0xff8] sm:$0xf0]  ;;  %v8646_v11 = vor.u32 %v10596_v62, %v8643_v9 }
 0x2b8   :  { %5876 = vmatpush.bf16.msra.mxu3 %v8214_v55  ;;  %v8019_v55 = vld [vmem:[#allocation5 + $0xa18] sm:$0xf0]  ;;  %v7894_v63 = vor.u32 %v10408_v49, %v7891_v50  ;;  %v10628_v53 = vld [vmem:[#allocation5 + $0xfec] sm:$0xf] }
 0x2b9   :  { %5838 = vmatpush.bf16.msra.mxu0 %v7814_v59  ;;  %v5624_v59 = vpop.f32.mrf.mxu3  ;;  %v10528_v14 = vld [vmem:[#allocation5 + $0xccc] sm:$0xf]  ;;  %v8371_v16 = vld [vmem:[#allocation5 + $0xcd8] sm:$0xf0] }
 0x2ba   :  { %5851 = vmatpush.bf16.msra.mxu1 %v7942_v57  ;;  %v7766_v57 = vor.u32 %v10376_v38, %v7763_v12  ;;  %v10560_v21 = vld [vmem:[#allocation5 + $0xdcc] sm:$0xf]  ;;  %v8499_v58 = vld [vmem:[#allocation5 + $0xdd8] sm:$0xf0]  ;;  %v8374_v34 = vor.u32 %v10528_v14, %v8371_v16 }
 0x2bb   :  { %5864 = vmatpush.bf16.msra.mxu2 %v8070_v60  ;;  %v8515_v60 = vld [vmem:[#allocation5 + $0xdf8] sm:$0xf0]  ;;  %v10624_v35 = vld [vmem:[#allocation5 + $0xfcc] sm:$0xf] }
 0x2bc   :  { %5877 = vmatpush.bf16.msra.mxu3 %v8198_v15  ;;  %v8022_v15 = vor.u32 %v10440_v52, %v8019_v55  ;;  %v8518_v7 = vor.u32 %v10564_v8, %v8515_v60  ;;  %v8755_v3 = vld [vmem:[#allocation5 + $0xfd8] sm:$0xf0]  ;;  %v10524_v4 = vld [vmem:[#allocation5 + $0xcac] sm:$0xf] }
 0x2bd   :  { %5839 = vmatpush.bf16.msra.mxu0 %v7798_v28  ;;  %v8774_v28 = vor.u32 %v10628_v53, %v8771_v25  ;;  %v8355_v45 = vld [vmem:[#allocation5 + $0xcb8] sm:$0xf0]  ;;  %v10556_v46 = vld [vmem:[#allocation5 + $0xdac] sm:$0xf]  ;;  %v8758_v37 = vor.u32 %v10624_v35, %v8755_v3 }
 0x2be   :  { %5852 = vmatpush.bf16.msra.mxu1 %v7926_v30  ;;  %v10592_v30 = vld [vmem:[#allocation5 + $0xecc] sm:$0xf]  ;;  %v8611_v12 = vld [vmem:[#allocation5 + $0xeb8] sm:$0xf0]  ;;  %v8358_v49 = vor.u32 %v10524_v4, %v8355_v45 }
 0x2bf   :  { %5865 = vmatpush.bf16.msra.mxu2 %v8054_v33  ;;  %v8627_v33 = vld [vmem:[#allocation5 + $0xed8] sm:$0xf0]  ;;  %v10588_v38 = vld [vmem:[#allocation5 + $0xeac] sm:$0xf] }
 0x2c0   :  { %5878 = vmatpush.bf16.msra.mxu3 %v8182_v39  ;;  %v8502_v39 = vor.u32 %v10560_v21, %v8499_v58  ;;  %v8630_v41 = vor.u32 %v10592_v30, %v8627_v33  ;;  %v8614_v52 = vor.u32 %v10588_v38, %v8611_v12  ;;  %v10552_v55 = vld [vmem:[#allocation5 + $0xd8c] sm:$0xf]  ;;  %v8467_v10 = vld [vmem:[#allocation5 + $0xd98] sm:$0xf0] }
 0x2c1   :  { %5840 = vmatpush.bf16.msra.mxu0 %v7782_v47  ;;  %v8483_v47 = vld [vmem:[#allocation5 + $0xdb8] sm:$0xf0]  ;;  %v10584_v17 = vld [vmem:[#allocation5 + $0xe8c] sm:$0xf] }
 0x2c2   :  { %5853 = vmatpush.bf16.msra.mxu1 %v7910_v40  ;;  %v10620_v40 = vld [vmem:[#allocation5 + $0xfac] sm:$0xf]  ;;  %v8486_v50 = vor.u32 %v10556_v46, %v8483_v47  ;;  %v8723_v44 = vld [vmem:[#allocation5 + $0xf98] sm:$0xf0] }
 0x2c3   :  { %5866 = vmatpush.bf16.msra.mxu2 %v8038_v48  ;;  %v8739_v48 = vld [vmem:[#allocation5 + $0xfb8] sm:$0xf0]  ;;  %v10516_v62 = vld [vmem:[#allocation5 + $0xc6c] sm:$0xf] }
 0x2c4   :  { %5879 = vmatpush.bf16.msra.mxu3 %v8166_v54  ;;  %v10520_v54 = vld [vmem:[#allocation5 + $0xc8c] sm:$0xf]  ;;  %v8742_v56 = vor.u32 %v10620_v40, %v8739_v48  ;;  %v8323_v9 = vld [vmem:[#allocation5 + $0xc78] sm:$0xf0] }
 0x2c5   :  { %5841 = vmatpush.bf16.msra.mxu0 %v7766_v57  ;;  %v5635_v43 = vpop.f32.mrf.mxu0  ;;  %v8470_v57 = vor.u32 %v10552_v55, %v8467_v10  ;;  %v8451_v25 = vld [vmem:[#allocation5 + $0xd78] sm:$0xf0]  ;;  %v8326_v14 = vor.u32 %v10516_v62, %v8323_v9  ;;  %v10512_v21 = vld [vmem:[#allocation5 + $0xc4c] sm:$0xf] }
 0x2c6   :  { %5854 = vmatpush.bf16.msra.mxu1 %v7894_v63  ;;  %v5648_v59 = vpop.f32.mrf.mxu1  ;;  %v10548_v63 = vld [vmem:[#allocation5 + $0xd6c] sm:$0xf]  ;;  %v8435_v35 = vld [vmem:[#allocation5 + $0xd58] sm:$0xf0] }
 0x2c7   :  { %5867 = vmatpush.bf16.msra.mxu2 %v8022_v15  ;;  %v10544_v58 = vld [vmem:[#allocation5 + $0xd4c] sm:$0xf]  ;;  %v8691_v45 = vld [vmem:[#allocation5 + $0xf58] sm:$0xf0] }
 0x2c8   :  { %5880 = vmatpush.bf16.msra.mxu3 %v8150_v6  ;;  %5842 = vmatmul.bf16.vlgmr.msra.gmra.mxu0 %v11286_v18  ;;  %v8339_v18 = vld [vmem:[#allocation5 + $0xc98] sm:$0xf0]  ;;  %v10580_v6 = vld [vmem:[#allocation5 + $0xe6c] sm:$0xf]  ;;  %v8438_v12 = vor.u32 %v10544_v58, %v8435_v35 }
 0x2c9   :  { %5886 = vmatpush.bf16.msrb.mxu0 %v8390_v51  ;;  %5855 = vmatmul.bf16.vlgmr.msra.gmra.mxu1 %v11290_v23  ;;  %v10616_v23 = vld [vmem:[#allocation5 + $0xf8c] sm:$0xf]  ;;  %v8342_v8 = vor.u32 %v10520_v54, %v8339_v18  ;;  %v8579_v51 = vld [vmem:[#allocation5 + $0xe78] sm:$0xf0] }
 0x2ca   :  { %5899 = vmatpush.bf16.msrb.mxu1 %v8518_v7  ;;  %5868 = vmatmul.bf16.vlgmr.msra.gmra.mxu2 %v11288_v22  ;;  %v8595_v22 = vld [vmem:[#allocation5 + $0xe98] sm:$0xf0]  ;;  %v8726_v15 = vor.u32 %v10616_v23, %v8723_v44  ;;  %v10612_v7 = vld [vmem:[#allocation5 + $0xf6c] sm:$0xf]  ;;  %v8582_v16 = vor.u32 %v10580_v6, %v8579_v51 }
 0x2cb   :  { %5912 = vmatpush.bf16.msrb.mxu2 %v8646_v11  ;;  %5881 = vmatmul.bf16.vlgmr.msra.gmra.mxu3 %v11292_v27  ;;  %v5636_v27 = vadd.f32 %v5635_v43, %v11433_v0  ;;  %v8598_v60 = vor.u32 %v10584_v17, %v8595_v22  ;;  %v8707_v11 = vld [vmem:[#allocation5 + $0xf78] sm:$0xf0]  ;;  %v8454_v0 = vor.u32 %v10548_v63, %v8451_v25  ;;  %v10576_v3 = vld [vmem:[#allocation5 + $0xe4c] sm:$0xf] }
 0x2cc   :  { %5925 = vmatpush.bf16.msrb.mxu3 %v8774_v28  ;;  %v8307_v28 = vld [vmem:[#allocation5 + $0xc58] sm:$0xf0]  ;;  %v8710_v30 = vor.u32 %v10612_v7, %v8707_v11  ;;  %v10608_v4 = vld [vmem:[#allocation5 + $0xf4c] sm:$0xf] }
 0x2cd   :  { %5887 = vmatpush.bf16.msrb.mxu0 %v8374_v34  ;;  %v5649_v53 = vadd.f32 %v5648_v59, %v5636_v27  ;;  %v5661_v33 = vpop.f32.mrf.mxu2  ;;  %v8563_v34 = vld [vmem:[#allocation5 + $0xe58] sm:$0xf0]  ;;  %v5637_v46 = vpop.f32.mrf.mxu0  ;;  %v10508_v48 = vld [vmem:[#allocation5 + $0xc2c] sm:$0xf] }
 0x2ce   :  { %5900 = vmatpush.bf16.msrb.mxu1 %v8502_v39  ;;  %v5650_v47 = vpop.f32.mrf.mxu1  ;;  %v8566_v40 = vor.u32 %v10576_v3, %v8563_v34  ;;  %v8419_v54 = vld [vmem:[#allocation5 + $0xd38] sm:$0xf0]  ;;  %v10572_v18 = vld [vmem:[#allocation5 + $0xe2c] sm:$0xf] }
 0x2cf   :  { %5913 = vmatpush.bf16.msrb.mxu2 %v8630_v41  ;;  %v5662_v39 = vadd.f32 %v5661_v33, %v5649_v53  ;;  %v5674_v41 = vpop.f32.mrf.mxu3  ;;  %v8547_v55 = vld [vmem:[#allocation5 + $0xe38] sm:$0xf0]  ;;  %v10504_v22 = vld [vmem:[#allocation5 + $0xc0c] sm:$0xf] }
 0x2d0   :  { %5926 = vmatpush.bf16.msrb.mxu3 %v8758_v37  ;;  %v8310_v37 = vor.u32 %v10512_v21, %v8307_v28  ;;  %v8675_v10 = vld [vmem:[#allocation5 + $0xf38] sm:$0xf0]  ;;  %v8550_v44 = vor.u32 %v10572_v18, %v8547_v55  ;;  %v10536_v27 = vld [vmem:[#allocation5 + $0xd0c] sm:$0xf] }
 0x2d1   :  { %5888 = vmatpush.bf16.msrb.mxu0 %v8358_v49  ;;  %v11440_v38 = vadd.f32 %v5674_v41, %v5662_v39  ;;  %v8291_v49 = vld [vmem:[#allocation5 + $0xc38] sm:$0xf0]  ;;  %v10568_v59 = vld [vmem:[#allocation5 + $0xe0c] sm:$0xf] }
 0x2d2   :  { %5901 = vmatpush.bf16.msrb.mxu1 %v8486_v50  ;;  %v10540_v50 = vld [vmem:[#allocation5 + $0xd2c] sm:$0xf]  ;;  %v8294_v17 = vor.u32 %v10508_v48, %v8291_v49  ;;  %v8275_v43 = vld [vmem:[#allocation5 + $0xc18] sm:$0xf0] }
 0x2d3   :  { %5914 = vmatpush.bf16.msrb.mxu2 %v8614_v52  ;;  %v8694_v52 = vor.u32 %v10608_v4, %v8691_v45  ;;  %v8422_v23 = vor.u32 %v10540_v50, %v8419_v54  ;;  %v10600_v62 = vld [vmem:[#allocation5 + $0xf0c] sm:$0xf]  ;;  %v8659_v9 = vld [vmem:[#allocation5 + $0xf18] sm:$0xf0]  ;;  %v8278_v51 = vor.u32 %v10504_v22, %v8275_v43 }
 0x2d4   :  { %5927 = vmatpush.bf16.msrb.mxu3 %v8742_v56  ;;  %v10604_v56 = vld [vmem:[#allocation5 + $0xf2c] sm:$0xf]  ;;  %v8899_v53 = vld [vmem:[#allocation5 + $0x10f8] sm:$0xf0]  ;;  %v8662_v58 = vor.u32 %v10600_v62, %v8659_v9 }
 0x2d5   :  { %5889 = vmatpush.bf16.msrb.mxu0 %v8342_v8  ;;  %v8403_v8 = vld [vmem:[#allocation5 + $0xd18] sm:$0xf0]  ;;  %v5663_v63 = vpop.f32.mrf.mxu2  ;;  %v10692_v25 = vld [vmem:[#allocation5 + $0x11ec] sm:$0xf] }
 0x2d6   :  { %5902 = vmatpush.bf16.msrb.mxu1 %v8470_v57  ;;  %v8678_v57 = vor.u32 %v10604_v56, %v8675_v10  ;;  %v9027_v7 = vld [vmem:[#allocation5 + $0x11f8] sm:$0xf0]  ;;  %v10724_v11 = vld [vmem:[#allocation5 + $0x12ec] sm:$0xf] }
 0x2d7   :  { %5915 = vmatpush.bf16.msrb.mxu2 %v8598_v60  ;;  %v8531_v60 = vld [vmem:[#allocation5 + $0xe18] sm:$0xf0]  ;;  %v5676_v6 = vpop.f32.mrf.mxu3  ;;  %v10756_v21 = vld [vmem:[#allocation5 + $0x13ec] sm:$0xf]  ;;  %v9030_v33 = vor.u32 %v10692_v25, %v9027_v7 }
 0x2d8   :  { %5928 = vmatpush.bf16.msrb.mxu3 %v8726_v15  ;;  %v10660_v15 = vld [vmem:[#allocation5 + $0x10ec] sm:$0xf]  ;;  %v9283_v28 = vld [vmem:[#allocation5 + $0x13f8] sm:$0xf0] }
 0x2d9   :  { %5890 = vmatpush.bf16.msrb.mxu0 %v8326_v14  ;;  %v9155_v14 = vld [vmem:[#allocation5 + $0x12f8] sm:$0xf0]  ;;  %v10656_v3 = vld [vmem:[#allocation5 + $0x10cc] sm:$0xf]  ;;  %v9286_v41 = vor.u32 %v10756_v21, %v9283_v28 }
 0x2da   :  { %5903 = vmatpush.bf16.msrb.mxu1 %v8454_v0  ;;  %v8406_v0 = vor.u32 %v10536_v27, %v8403_v8  ;;  %v9158_v35 = vor.u32 %v10724_v11, %v9155_v14  ;;  %v8883_v34 = vld [vmem:[#allocation5 + $0x10d8] sm:$0xf0]  ;;  %v10688_v39 = vld [vmem:[#allocation5 + $0x11cc] sm:$0xf] }
 0x2db   :  { %5916 = vmatpush.bf16.msrb.mxu2 %v8582_v16  ;;  %v8534_v16 = vor.u32 %v10568_v59, %v8531_v60  ;;  %v9011_v4 = vld [vmem:[#allocation5 + $0x11d8] sm:$0xf0]  ;;  %v10720_v45 = vld [vmem:[#allocation5 + $0x12cc] sm:$0xf] }
 0x2dc   :  { %5929 = vmatpush.bf16.msrb.mxu3 %v8710_v30  ;;  %v8902_v30 = vor.u32 %v10660_v15, %v8899_v53  ;;  %v9139_v46 = vld [vmem:[#allocation5 + $0x12d8] sm:$0xf0]  ;;  %v10652_v49 = vld [vmem:[#allocation5 + $0x10ac] sm:$0xf] }
 0x2dd   :  { %5891 = vmatpush.bf16.msrb.mxu0 %v8310_v37  ;;  %v10752_v37 = vld [vmem:[#allocation5 + $0x13cc] sm:$0xf]  ;;  %v9267_v47 = vld [vmem:[#allocation5 + $0x13d8] sm:$0xf0]  ;;  %v9142_v48 = vor.u32 %v10720_v45, %v9139_v46 }
 0x2de   :  { %5904 = vmatpush.bf16.msrb.mxu1 %v8438_v12  ;;  %v8886_v12 = vor.u32 %v10656_v3, %v8883_v34  ;;  %v8867_v50 = vld [vmem:[#allocation5 + $0x10b8] sm:$0xf0]  ;;  %v9270_v54 = vor.u32 %v10752_v37, %v9267_v47  ;;  %v10716_v55 = vld [vmem:[#allocation5 + $0x12ac] sm:$0xf] }
 0x2df   :  { %5917 = vmatpush.bf16.msrb.mxu2 %v8566_v40  ;;  %v9014_v40 = vor.u32 %v10688_v39, %v9011_v4  ;;  %v8995_v18 = vld [vmem:[#allocation5 + $0x11b8] sm:$0xf0]  ;;  %v10748_v10 = vld [vmem:[#allocation5 + $0x13ac] sm:$0xf]  ;;  %v8870_v22 = vor.u32 %v10652_v49, %v8867_v50 }
 0x2e0   :  { %5930 = vmatpush.bf16.msrb.mxu3 %v8694_v52  ;;  %v10684_v52 = vld [vmem:[#allocation5 + $0x11ac] sm:$0xf]  ;;  %v9123_v56 = vld [vmem:[#allocation5 + $0x12b8] sm:$0xf0] }
 0x2e1   :  { %5892 = vmatpush.bf16.msrb.mxu0 %v8294_v17  ;;  %v9251_v17 = vld [vmem:[#allocation5 + $0x13b8] sm:$0xf0]  ;;  %v8998_v43 = vor.u32 %v10684_v52, %v8995_v18  ;;  %v10680_v27 = vld [vmem:[#allocation5 + $0x118c] sm:$0xf] }
 0x2e2   :  { %5905 = vmatpush.bf16.msrb.mxu1 %v8422_v23  ;;  %v9126_v23 = vor.u32 %v10716_v55, %v9123_v56  ;;  %v9254_v8 = vor.u32 %v10748_v10, %v9251_v17  ;;  %v8979_v59 = vld [vmem:[#allocation5 + $0x1198] sm:$0xf0]  ;;  %v10644_v25 = vld [vmem:[#allocation5 + $0x106c] sm:$0xf] }
 0x2e3   :  { %5918 = vmatpush.bf16.msrb.mxu2 %v8550_v44  ;;  %v10648_v44 = vld [vmem:[#allocation5 + $0x108c] sm:$0xf]  ;;  %v9235_v62 = vld [vmem:[#allocation5 + $0x1398] sm:$0xf0]  ;;  %v8982_v15 = vor.u32 %v10680_v27, %v8979_v59 }
 0x2e4   :  { %5931 = vmatpush.bf16.msrb.mxu3 %v8678_v57  ;;  %v10712_v57 = vld [vmem:[#allocation5 + $0x128c] sm:$0xf]  ;;  %v8835_v6 = vld [vmem:[#allocation5 + $0x1078] sm:$0xf0] }
 0x2e5   :  { %5893 = vmatpush.bf16.msrb.mxu0 %v8278_v51  ;;  %v5687_v60 = vpop.f32.mrf.mxu0  ;;  %v10676_v51 = vld [vmem:[#allocation5 + $0x116c] sm:$0xf]  ;;  %v8963_v14 = vld [vmem:[#allocation5 + $0x1178] sm:$0xf0] }
 0x2e6   :  { %5906 = vmatpush.bf16.msrb.mxu1 %v8406_v0  ;;  %v5700_v63 = vpop.f32.mrf.mxu1  ;;  %v10708_v0 = vld [vmem:[#allocation5 + $0x126c] sm:$0xf]  ;;  %v9219_v28 = vld [vmem:[#allocation5 + $0x1378] sm:$0xf0] }
 0x2e7   :  { %5919 = vmatpush.bf16.msrb.mxu2 %v8534_v16  ;;  %v9091_v16 = vld [vmem:[#allocation5 + $0x1278] sm:$0xf0]  ;;  %v10740_v21 = vld [vmem:[#allocation5 + $0x136c] sm:$0xf] }
 0x2e8   :  { %5932 = vmatpush.bf16.msrb.mxu3 %v8662_v58  ;;  %5894 = vmatmul.bf16.vlgmr.msrb.gmra.mxu0 %v11298_v13  ;;  %v8851_v13 = vld [vmem:[#allocation5 + $0x1098] sm:$0xf0]  ;;  %v8838_v58 = vor.u32 %v10644_v25, %v8835_v6  ;;  %v10672_v3 = vld [vmem:[#allocation5 + $0x114c] sm:$0xf]  ;;  %v9222_v34 = vor.u32 %v10740_v21, %v9219_v28 }
 0x2e9   :  { %5938 = vmatpush.bf16.msra.mxu0 %v8902_v30  ;;  %5907 = vmatmul.bf16.vlgmr.msrb.gmra.mxu1 %v11302_v20  ;;  %v10744_v20 = vld [vmem:[#allocation5 + $0x138c] sm:$0xf]  ;;  %v8854_v9 = vor.u32 %v10648_v44, %v8851_v13  ;;  %v9094_v30 = vor.u32 %v10708_v0, %v9091_v16  ;;  %v9075_v45 = vld [vmem:[#allocation5 + $0x1258] sm:$0xf0] }
 0x2ea   :  { %5951 = vmatpush.bf16.msra.mxu1 %v9030_v33  ;;  %5920 = vmatmul.bf16.vlgmr.msrb.gmra.mxu2 %v11300_v19  ;;  %v9107_v19 = vld [vmem:[#allocation5 + $0x1298] sm:$0xf0]  ;;  %v9238_v7 = vor.u32 %v10744_v20, %v9235_v62  ;;  %v10640_v33 = vld [vmem:[#allocation5 + $0x104c] sm:$0xf] }
 0x2eb   :  { %5964 = vmatpush.bf16.msra.mxu2 %v9158_v35  ;;  %5933 = vmatmul.bf16.vlgmr.msrb.gmra.mxu3 %v11304_v26  ;;  %v5688_v26 = vadd.f32 %v5687_v60, %v11440_v38  ;;  %v9110_v53 = vor.u32 %v10712_v57, %v9107_v19  ;;  %v8966_v38 = vor.u32 %v10676_v51, %v8963_v14  ;;  %v8819_v35 = vld [vmem:[#allocation5 + $0x1058] sm:$0xf0]  ;;  %v10704_v4 = vld [vmem:[#allocation5 + $0x124c] sm:$0xf] }
 0x2ec   :  { %5977 = vmatpush.bf16.msra.mxu3 %v9286_v41  ;;  %v8947_v41 = vld [vmem:[#allocation5 + $0x1158] sm:$0xf0]  ;;  %v10736_v47 = vld [vmem:[#allocation5 + $0x134c] sm:$0xf] }
 0x2ed   :  { %5939 = vmatpush.bf16.msra.mxu0 %v8886_v12  ;;  %v5701_v11 = vadd.f32 %v5700_v63, %v5688_v26  ;;  %v5713_v39 = vpop.f32.mrf.mxu2  ;;  %v9203_v12 = vld [vmem:[#allocation5 + $0x1358] sm:$0xf0]  ;;  %v8950_v52 = vor.u32 %v10672_v3, %v8947_v41  ;;  %v10636_v18 = vld [vmem:[#allocation5 + $0x102c] sm:$0xf] }
 0x2ee   :  { %5952 = vmatpush.bf16.msra.mxu1 %v9014_v40  ;;  %v5726_v37 = vpop.f32.mrf.mxu3  ;;  %v5689_v40 = vpop.f32.mrf.mxu0  ;;  %v8803_v55 = vld [vmem:[#allocation5 + $0x1038] sm:$0xf0]  ;;  %v10668_v56 = vld [vmem:[#allocation5 + $0x112c] sm:$0xf]  ;;  %v9206_v10 = vor.u32 %v10736_v47, %v9203_v12 }
 0x2ef   :  { %5965 = vmatpush.bf16.msra.mxu2 %v9142_v48  ;;  %v5714_v46 = vadd.f32 %v5713_v39, %v5701_v11  ;;  %v8822_v48 = vor.u32 %v10640_v33, %v8819_v35  ;;  %v5702_v49 = vpop.f32.mrf.mxu1  ;;  %v8931_v17 = vld [vmem:[#allocation5 + $0x1138] sm:$0xf0]  ;;  %v8806_v13 = vor.u32 %v10636_v18, %v8803_v55  ;;  %v10632_v27 = vld [vmem:[#allocation5 + $0x100c] sm:$0xf] }
 0x2f0   :  { %5978 = vmatpush.bf16.msra.mxu3 %v9270_v54  ;;  %v9078_v54 = vor.u32 %v10704_v4, %v9075_v45  ;;  %v9187_v44 = vld [vmem:[#allocation5 + $0x1338] sm:$0xf0]  ;;  %v8934_v59 = vor.u32 %v10668_v56, %v8931_v17  ;;  %v10664_v19 = vld [vmem:[#allocation5 + $0x110c] sm:$0xf] }
 0x2f1   :  { %5940 = vmatpush.bf16.msra.mxu0 %v8870_v22  ;;  %v11447_v50 = vadd.f32 %v5726_v37, %v5714_v46  ;;  %v10700_v22 = vld [vmem:[#allocation5 + $0x122c] sm:$0xf]  ;;  %v8915_v60 = vld [vmem:[#allocation5 + $0x1118] sm:$0xf0] }
 0x2f2   :  { %5953 = vmatpush.bf16.msra.mxu1 %v8998_v43  ;;  %v9059_v43 = vld [vmem:[#allocation5 + $0x1238] sm:$0xf0]  ;;  %v10696_v20 = vld [vmem:[#allocation5 + $0x120c] sm:$0xf]  ;;  %v8918_v16 = vor.u32 %v10664_v19, %v8915_v60 }
 0x2f3   :  { %5966 = vmatpush.bf16.msra.mxu2 %v9126_v23  ;;  %v10732_v23 = vld [vmem:[#allocation5 + $0x132c] sm:$0xf]  ;;  %v9062_v57 = vor.u32 %v10700_v22, %v9059_v43  ;;  %v9043_v26 = vld [vmem:[#allocation5 + $0x1218] sm:$0xf0] }
 0x2f4   :  { %5979 = vmatpush.bf16.msra.mxu3 %v9254_v8  ;;  %v8787_v8 = vld [vmem:[#allocation5 + $0x1018] sm:$0xf0]  ;;  %v9190_v62 = vor.u32 %v10732_v23, %v9187_v44  ;;  %v10820_v6 = vld [vmem:[#allocation5 + $0x15ec] sm:$0xf]  ;;  %v9046_v21 = vor.u32 %v10696_v20, %v9043_v26 }
 0x2f5   :  { %5941 = vmatpush.bf16.msra.mxu0 %v8854_v9  ;;  %v10728_v9 = vld [vmem:[#allocation5 + $0x130c] sm:$0xf]  ;;  %v9171_v63 = vld [vmem:[#allocation5 + $0x1318] sm:$0xf0] }
 0x2f6   :  { %5954 = vmatpush.bf16.msra.mxu1 %v8982_v15  ;;  %v5715_v15 = vpop.f32.mrf.mxu2  ;;  %v9411_v25 = vld [vmem:[#allocation5 + $0x14f8] sm:$0xf0]  ;;  %v5728_v51 = vpop.f32.mrf.mxu3  ;;  %v10852_v14 = vld [vmem:[#allocation5 + $0x16ec] sm:$0xf] }
 0x2f7   :  { %5967 = vmatpush.bf16.msra.mxu2 %v9110_v53  ;;  %v10788_v53 = vld [vmem:[#allocation5 + $0x14ec] sm:$0xf]  ;;  %v9539_v11 = vld [vmem:[#allocation5 + $0x15f8] sm:$0xf0] }
 0x2f8   :  { %5980 = vmatpush.bf16.msra.mxu3 %v9238_v7  ;;  %v8790_v7 = vor.u32 %v10632_v27, %v8787_v8  ;;  %v9667_v0 = vld [vmem:[#allocation5 + $0x16f8] sm:$0xf0]  ;;  %v10884_v28 = vld [vmem:[#allocation5 + $0x17ec] sm:$0xf]  ;;  %v9542_v33 = vor.u32 %v10820_v6, %v9539_v11  ;;  %v10984_v8 = vld [vmem:[#allocation7] sm:$0xf] }
 0x2f9   :  { %5942 = vmatpush.bf16.msra.mxu0 %v8838_v58  ;;  %v9795_v58 = vld [vmem:[#allocation5 + $0x17f8] sm:$0xf0]  ;;  %v9670_v35 = vor.u32 %v10852_v14, %v9667_v0  ;;  %v10784_v3 = vld [vmem:[#allocation5 + $0x14cc] sm:$0xf] }
 0x2fa   :  { %5955 = vmatpush.bf16.msra.mxu1 %v8966_v38  ;;  %v9174_v38 = vor.u32 %v10728_v9, %v9171_v63  ;;  %v10816_v39 = vld [vmem:[#allocation5 + $0x15cc] sm:$0xf]  ;;  %v9798_v41 = vor.u32 %v10884_v28, %v9795_v58  ;;  %v9523_v4 = vld [vmem:[#allocation5 + $0x15d8] sm:$0xf0] }
 0x2fb   :  { %5968 = vmatpush.bf16.msra.mxu2 %v9094_v30  ;;  %v9414_v30 = vor.u32 %v10788_v53, %v9411_v25  ;;  %v10848_v45 = vld [vmem:[#allocation5 + $0x16cc] sm:$0xf]  ;;  %v9651_v46 = vld [vmem:[#allocation5 + $0x16d8] sm:$0xf0]  ;;  %v9526_v40 = vor.u32 %v10816_v39, %v9523_v4 }
 0x2fc   :  { %5981 = vmatpush.bf16.msra.mxu3 %v9222_v34  ;;  %v9395_v34 = vld [vmem:[#allocation5 + $0x14d8] sm:$0xf0]  ;;  %v10880_v37 = vld [vmem:[#allocation5 + $0x17cc] sm:$0xf] }
 0x2fd   :  { %5943 = vmatpush.bf16.msra.mxu0 %v8822_v48  ;;  %v9779_v47 = vld [vmem:[#allocation5 + $0x17d8] sm:$0xf0]  ;;  %v9398_v12 = vor.u32 %v10784_v3, %v9395_v34  ;;  %v9654_v48 = vor.u32 %v10848_v45, %v9651_v46  ;;  %v10780_v49 = vld [vmem:[#allocation5 + $0x14ac] sm:$0xf] }
 0x2fe   :  { %5956 = vmatpush.bf16.msra.mxu1 %v8950_v52  ;;  %v9379_v52 = vld [vmem:[#allocation5 + $0x14b8] sm:$0xf0]  ;;  %v9782_v18 = vor.u32 %v10880_v37, %v9779_v47  ;;  %v10844_v56 = vld [vmem:[#allocation5 + $0x16ac] sm:$0xf] }
 0x2ff   :  { %5969 = vmatpush.bf16.msra.mxu2 %v9078_v54  ;;  %v10812_v54 = vld [vmem:[#allocation5 + $0x15ac] sm:$0xf]  ;;  %v9507_v55 = vld [vmem:[#allocation5 + $0x15b8] sm:$0xf0]  ;;  %v9382_v43 = vor.u32 %v10780_v49, %v9379_v52 }
 0x300   :  { %5982 = vmatpush.bf16.msra.mxu3 %v9206_v10  ;;  %v9635_v10 = vld [vmem:[#allocation5 + $0x16b8] sm:$0xf0]  ;;  %v10876_v17 = vld [vmem:[#allocation5 + $0x17ac] sm:$0xf]  ;;  %v9510_v44 = vor.u32 %v10812_v54, %v9507_v55 }
 0x301   :  { %5944 = vmatpush.bf16.msra.mxu0 %v8806_v13  ;;  %v9763_v22 = vld [vmem:[#allocation5 + $0x17b8] sm:$0xf0]  ;;  %v10776_v23 = vld [vmem:[#allocation5 + $0x148c] sm:$0xf]  ;;  %v9638_v13 = vor.u32 %v10844_v56, %v9635_v10 }
 0x302   :  { %5957 = vmatpush.bf16.msra.mxu1 %v8934_v59  ;;  %v10808_v27 = vld [vmem:[#allocation5 + $0x158c] sm:$0xf]  ;;  %v949_v59 = vperm.slane %v10984_v8, 3  ;;  %v9747_v20 = vld [vmem:[#allocation5 + $0x1798] sm:$0xf0] }
 0x303   :  { %5970 = vmatpush.bf16.msra.mxu2 %v9062_v57  ;;  %v9766_v57 = vor.u32 %v10876_v17, %v9763_v22  ;;  %v10840_v19 = vld [vmem:[#allocation5 + $0x168c] sm:$0xf]  ;;  %v9347_v15 = vld [vmem:[#allocation5 + $0x1478] sm:$0xf0] }
 0x304   :  { %5983 = vmatpush.bf16.msra.mxu3 %v9190_v62  ;;  %v10872_v60 = vld [vmem:[#allocation5 + $0x178c] sm:$0xf]  ;;  %v9603_v14 = vld [vmem:[#allocation5 + $0x1678] sm:$0xf0] }
 0x305   :  { %5945 = vmatpush.bf16.msra.mxu0 %v8790_v7  ;;  %v5739_v62 = vpop.f32.mrf.mxu0  ;;  %v10772_v63 = vld [vmem:[#allocation5 + $0x146c] sm:$0xf]  ;;  %v9750_v51 = vor.u32 %v10872_v60, %v9747_v20  ;;  %v9475_v7 = vld [vmem:[#allocation5 + $0x1578] sm:$0xf0] }
 0x306   :  { %5958 = vmatpush.bf16.msra.mxu1 %v8918_v16  ;;  %v10804_v53 = vld [vmem:[#allocation5 + $0x156c] sm:$0xf]  ;;  %v5740_v25 = vadd.f32 %v5739_v62, %v949_v59  ;;  %v5752_v6 = vpop.f32.mrf.mxu1  ;;  %v9731_v16 = vld [vmem:[#allocation5 + $0x1778] sm:$0xf0]  ;;  %v9350_v28 = vor.u32 %v10772_v63, %v9347_v15  ;;  %v9921_v15 = vld [vmem:[#allocation8 + $0xf0] sm:$0xf] }
 0x307   :  { %5971 = vmatpush.bf16.msra.mxu2 %v9046_v21  ;;  %v10836_v11 = vld [vmem:[#allocation5 + $0x166c] sm:$0xf]  ;;  %v9478_v58 = vor.u32 %v10804_v53, %v9475_v7  ;;  %v9459_v39 = vld [vmem:[#allocation5 + $0x1558] sm:$0xf0] }
 0x308   :  { %5984 = vmatpush.bf16.msra.mxu3 %v9174_v38  ;;  %5946 = vmatmul.bf16.vlgmr.msra.gmra.mxu0 %v11310_v24  ;;  %v9363_v24 = vld [vmem:[#allocation5 + $0x1498] sm:$0xf0]  ;;  %v10868_v0 = vld [vmem:[#allocation5 + $0x176c] sm:$0xf]  ;;  %v5753_v21 = vadd.f32 %v5752_v6, %v5740_v25  ;;  %v9606_v38 = vor.u32 %v10836_v11, %v9603_v14  ;;  %v9985_v6 = vld [vmem:[#allocation8 + $0x170] sm:$0xf] }
 0x309   :  { %5990 = vmatpush.bf16.msrb.mxu0 %v9414_v30  ;;  %5959 = vmatmul.bf16.vlgmr.msra.gmra.mxu1 %v11314_v32  ;;  %v9619_v32 = vld [vmem:[#allocation5 + $0x1698] sm:$0xf0]  ;;  %v10768_v30 = vld [vmem:[#allocation5 + $0x144c] sm:$0xf]  ;;  %v9734_v34 = vor.u32 %v10868_v0, %v9731_v16 }
 0x30a   :  { %6003 = vmatpush.bf16.msrb.mxu1 %v9542_v33  ;;  %5972 = vmatmul.bf16.vlgmr.msra.gmra.mxu2 %v11312_v31  ;;  %v9491_v31 = vld [vmem:[#allocation5 + $0x1598] sm:$0xf0]  ;;  %v9622_v9 = vor.u32 %v10840_v19, %v9619_v32  ;;  %v10864_v37 = vld [vmem:[#allocation5 + $0x174c] sm:$0xf] }
 0x30b   :  { %6016 = vmatpush.bf16.msrb.mxu2 %v9670_v35  ;;  %5985 = vmatmul.bf16.vlgmr.msra.gmra.mxu3 %v11316_v36  ;;  %v9366_v36 = vor.u32 %v10776_v23, %v9363_v24  ;;  %v9494_v26 = vor.u32 %v10808_v27, %v9491_v31  ;;  %v9331_v33 = vld [vmem:[#allocation5 + $0x1458] sm:$0xf0]  ;;  %v10800_v35 = vld [vmem:[#allocation5 + $0x154c] sm:$0xf] }
 0x30c   :  { %6029 = vmatpush.bf16.msrb.mxu3 %v9798_v41  ;;  %v10832_v41 = vld [vmem:[#allocation5 + $0x164c] sm:$0xf]  ;;  %v9587_v4 = vld [vmem:[#allocation5 + $0x1658] sm:$0xf0]  ;;  %v9462_v49 = vor.u32 %v10800_v35, %v9459_v39 }
 0x30d   :  { %5991 = vmatpush.bf16.msrb.mxu0 %v9398_v12  ;;  %v5765_v3 = vpop.f32.mrf.mxu2  ;;  %v9715_v47 = vld [vmem:[#allocation5 + $0x1758] sm:$0xf0]  ;;  %v9334_v12 = vor.u32 %v10768_v30, %v9331_v33  ;;  %v9590_v52 = vor.u32 %v10832_v41, %v9587_v4  ;;  %v10764_v54 = vld [vmem:[#allocation5 + $0x142c] sm:$0xf]  ;;  %v9977_v33 = vld [vmem:[#allocation8 + $0x160] sm:$0xf] }
 0x30e   :  { %6004 = vmatpush.bf16.msrb.mxu1 %v9526_v40  ;;  %v5766_v45 = vadd.f32 %v5765_v3, %v5753_v21  ;;  %v5778_v46 = vpop.f32.mrf.mxu3  ;;  %v10796_v55 = vld [vmem:[#allocation5 + $0x152c] sm:$0xf]  ;;  %v5754_v56 = vpop.f32.mrf.mxu1  ;;  %v9718_v10 = vor.u32 %v10864_v37, %v9715_v47  ;;  %v9443_v17 = vld [vmem:[#allocation5 + $0x1538] sm:$0xf0]  ;;  %v9841_v41 = vld [vmem:[#allocation8 + $0x50] sm:$0xf] }
 0x30f   :  { %6017 = vmatpush.bf16.msrb.mxu2 %v9654_v48  ;;  %v5741_v48 = vpop.f32.mrf.mxu0  ;;  %v10828_v22 = vld [vmem:[#allocation5 + $0x162c] sm:$0xf]  ;;  %v9299_v27 = vld [vmem:[#allocation5 + $0x1418] sm:$0xf0]  ;;  %v9446_v8 = vor.u32 %v10796_v55, %v9443_v17  ;;  %v9969_v37 = vld [vmem:[#allocation8 + $0x150] sm:$0xf] }
 0x310   :  { %6030 = vmatpush.bf16.msrb.mxu3 %v9782_v18  ;;  %v11453_v40 = vadd.f32 %v5778_v46, %v5766_v45  ;;  %v9315_v18 = vld [vmem:[#allocation5 + $0x1438] sm:$0xf0]  ;;  %v10860_v23 = vld [vmem:[#allocation5 + $0x172c] sm:$0xf]  ;;  %v9905_v45 = vld [vmem:[#allocation8 + $0xd0] sm:$0xf] }
 0x311   :  { %5992 = vmatpush.bf16.msrb.mxu0 %v9382_v43  ;;  %v9571_v43 = vld [vmem:[#allocation5 + $0x1638] sm:$0xf0]  ;;  %v10760_v24 = vld [vmem:[#allocation5 + $0x140c] sm:$0xf] }
 0x312   :  { %6005 = vmatpush.bf16.msrb.mxu1 %v9510_v44  ;;  %v9699_v44 = vld [vmem:[#allocation5 + $0x1738] sm:$0xf0]  ;;  %v9574_v59 = vor.u32 %v10828_v22, %v9571_v43  ;;  %v10824_v19 = vld [vmem:[#allocation5 + $0x160c] sm:$0xf]  ;;  %v9302_v53 = vor.u32 %v10760_v24, %v9299_v27  ;;  %v9889_v43 = vld [vmem:[#allocation8 + $0xb0] sm:$0xf] }
 0x313   :  { %6018 = vmatpush.bf16.msrb.mxu2 %v9638_v13  ;;  %v9318_v13 = vor.u32 %v10764_v54, %v9315_v18  ;;  %v9427_v31 = vld [vmem:[#allocation5 + $0x1518] sm:$0xf0]  ;;  %v9702_v60 = vor.u32 %v10860_v23, %v9699_v44  ;;  %v10916_v30 = vld [vmem:[#allocation8 + $0xe4] sm:$0xf0]  ;;  %v9897_v18 = vld [vmem:[#allocation8 + $0xc0] sm:$0xf] }
 0x314   :  { %6031 = vmatpush.bf16.msrb.mxu3 %v9766_v57  ;;  %v10792_v57 = vld [vmem:[#allocation5 + $0x150c] sm:$0xf]  ;;  %v9555_v20 = vld [vmem:[#allocation5 + $0x1618] sm:$0xf0]  ;;  %v9953_v24 = vld [vmem:[#allocation8 + $0x130] sm:$0xf] }
 0x315   :  { %5993 = vmatpush.bf16.msrb.mxu0 %v9366_v36  ;;  %v5767_v32 = vpop.f32.mrf.mxu2  ;;  %v10856_v36 = vld [vmem:[#allocation5 + $0x170c] sm:$0xf]  ;;  %v9683_v62 = vld [vmem:[#allocation5 + $0x1718] sm:$0xf0]  ;;  %v9430_v7 = vor.u32 %v10792_v57, %v9427_v31  ;;  %v9558_v11 = vor.u32 %v10824_v19, %v9555_v20  ;;  %v9817_v19 = vld [vmem:[#allocation8 + $0x20] sm:$0xf] }
 0x316   :  { %6006 = vmatpush.bf16.msrb.mxu1 %v9494_v26  ;;  %v5780_v26 = vpop.f32.mrf.mxu3  ;;  %v10902_v63 = vld [vmem:[#allocation8 + $0x74] sm:$0xf0]  ;;  %v9686_v14 = vor.u32 %v10856_v36, %v9683_v62  ;;  %v10932_v35 = vld [vmem:[#allocation8 + $0x164] sm:$0xf0]  ;;  %v9945_v62 = vld [vmem:[#allocation8 + $0x120] sm:$0xf] }
 0x317   :  { %6019 = vmatpush.bf16.msrb.mxu2 %v9622_v9  ;;  %v9857_v9 = vld [vmem:[#allocation8 + $0x70] sm:$0xf]  ;;  %v10918_v25 = vld [vmem:[#allocation8 + $0xf4] sm:$0xf0]  ;;  %v9978_v39 = vor.u32 %v10932_v35, %v9977_v33  ;;  %v10896_v54 = vld [vmem:[#allocation8 + $0x44] sm:$0xf0] }
 0x318   :  { %6032 = vmatpush.bf16.msrb.mxu3 %v9750_v51  ;;  %v10934_v51 = vld [vmem:[#allocation8 + $0x174] sm:$0xf0]  ;;  %v9858_v0 = vor.u32 %v10902_v63, %v9857_v9  ;;  %v9922_v16 = vor.u32 %v10918_v25, %v9921_v15  ;;  %v10912_v55 = vld [vmem:[#allocation8 + $0xc4] sm:$0xf0]  ;;  %v9865_v35 = vld [vmem:[#allocation8 + $0x80] sm:$0xf] }
 0x319   :  { %5994 = vmatpush.bf16.msrb.mxu0 %v9350_v28  ;;  %v9986_v21 = vor.u32 %v10934_v51, %v9985_v6  ;;  %v9849_v28 = vld [vmem:[#allocation8 + $0x60] sm:$0xf]  ;;  %v10898_v4 = vld [vmem:[#allocation8 + $0x54] sm:$0xf0]  ;;  %v10928_v56 = vld [vmem:[#allocation8 + $0x144] sm:$0xf0] }
 0x31a   :  { %6007 = vmatpush.bf16.msrb.mxu1 %v9478_v58  ;;  %v10900_v58 = vld [vmem:[#allocation8 + $0x64] sm:$0xf0]  ;;  %v10914_v46 = vld [vmem:[#allocation8 + $0xd4] sm:$0xf0]  ;;  %v9809_v51 = vld [vmem:[#allocation8 + $0x10] sm:$0xf] }
 0x31b   :  { %6020 = vmatpush.bf16.msrb.mxu2 %v9606_v38  ;;  %v9913_v38 = vld [vmem:[#allocation8 + $0xe0] sm:$0xf]  ;;  %v9850_v3 = vor.u32 %v10900_v58, %v9849_v28  ;;  %v10930_v47 = vld [vmem:[#allocation8 + $0x154] sm:$0xf0]  ;;  %v9906_v48 = vor.u32 %v10914_v46, %v9905_v45  ;;  %v10892_v32 = vld [vmem:[#allocation8 + $0x24] sm:$0xf0] }
 0x31c   :  { %6033 = vmatpush.bf16.msrb.mxu3 %v9734_v34  ;;  %v9914_v34 = vor.u32 %v10916_v30, %v9913_v38  ;;  %v10894_v22 = vld [vmem:[#allocation8 + $0x34] sm:$0xf0]  ;;  %v10908_v36 = vld [vmem:[#allocation8 + $0xa4] sm:$0xf0]  ;;  %v9818_v63 = vor.u32 %v10892_v32, %v9817_v19  ;;  %v9801_v58 = vld [vmem:[#allocation8] sm:$0xf] }
 0x31d   :  { %5995 = vmatpush.bf16.msrb.mxu0 %v9334_v12  ;;  %v9842_v12 = vor.u32 %v10898_v4, %v9841_v41  ;;  %v10926_v27 = vld [vmem:[#allocation8 + $0x134] sm:$0xf0]  ;;  %v10924_v26 = vld [vmem:[#allocation8 + $0x124] sm:$0xf0]  ;;  %v10901_v4 = vld [vmem:[#allocation8 + $0x74] sm:$0xf] }
 0x31e   :  { %6008 = vmatpush.bf16.msrb.mxu1 %v9462_v49  ;;  %v9970_v49 = vor.u32 %v10930_v47, %v9969_v37  ;;  %v9954_v31 = vor.u32 %v10926_v27, %v9953_v24  ;;  %v9946_v6 = vor.u32 %v10924_v26, %v9945_v62  ;;  %v10888_v33 = vld [vmem:[#allocation8 + $0x4] sm:$0xf0]  ;;  %v9859_v46 = vld [vmem:[#allocation8 + $0x78] sm:$0xf0]  ;;  %v10917_v37 = vld [vmem:[#allocation8 + $0xf4] sm:$0xf] }
 0x31f   :  { %6021 = vmatpush.bf16.msrb.mxu2 %v9590_v52  ;;  %v9833_v52 = vld [vmem:[#allocation8 + $0x40] sm:$0xf]  ;;  %v10920_v41 = vld [vmem:[#allocation8 + $0x104] sm:$0xf0]  ;;  %v9923_v47 = vld [vmem:[#allocation8 + $0xf8] sm:$0xf0] }
 0x320   :  { %6034 = vmatpush.bf16.msrb.mxu3 %v9718_v10  ;;  %v10897_v24 = vld [vmem:[#allocation8 + $0x54] sm:$0xf]  ;;  %v9971_v19 = vld [vmem:[#allocation8 + $0x158] sm:$0xf0]  ;;  %v9835_v62 = vld [vmem:[#allocation8 + $0x48] sm:$0xf0] }
 0x321   :  { %5996 = vmatpush.bf16.msrb.mxu0 %v9318_v13  ;;  %v10910_v13 = vld [vmem:[#allocation8 + $0xb4] sm:$0xf0]  ;;  %v10911_v26 = vld [vmem:[#allocation8 + $0xc4] sm:$0xf] }
 0x322   :  { %6009 = vmatpush.bf16.msrb.mxu1 %v9446_v8  ;;  %v9890_v57 = vor.u32 %v10910_v13, %v9889_v43  ;;  %v10931_v43 = vld [vmem:[#allocation8 + $0x164] sm:$0xf] }
 0x323   :  { %6022 = vmatpush.bf16.msrb.mxu2 %v9574_v59 }
 0x324   :  { %6035 = vmatpush.bf16.msrb.mxu3 %v9702_v60  ;;  %v9881_v60 = vld [vmem:[#allocation8 + $0xa0] sm:$0xf] }
 0x325   :  { %5997 = vmatpush.bf16.msrb.mxu0 %v9302_v53  ;;  %v5791_v10 = vpop.f32.mrf.mxu0  ;;  %v9882_v25 = vor.u32 %v10908_v36, %v9881_v60 }
 0x326   :  { %6010 = vmatpush.bf16.msrb.mxu1 %v9430_v7  ;;  %v5792_v23 = vadd.f32 %v5791_v10, %v11453_v40  ;;  %v5804_v44 = vpop.f32.mrf.mxu1  ;;  %v10890_v7 = vld [vmem:[#allocation8 + $0x14] sm:$0xf0]  ;;  %v10899_v10 = vld [vmem:[#allocation8 + $0x64] sm:$0xf] }
 0x327   :  { %6023 = vmatpush.bf16.msrb.mxu2 %v9558_v11  ;;  %v9873_v11 = vld [vmem:[#allocation8 + $0x90] sm:$0xf]  ;;  %v9810_v28 = vor.u32 %v10890_v7, %v9809_v51 }
 0x328   :  { %6036 = vmatpush.bf16.msrb.mxu3 %v9686_v14  ;;  %5998 = vmatmul.bf16.vlgmr.msrb.gmra.mxu0 %v11324_v61  ;;  %v9961_v61 = vld [vmem:[#allocation8 + $0x140] sm:$0xf]  ;;  %v5805_v8 = vadd.f32 %v5804_v44, %v5792_v23  ;;  %v9979_v23 = vld [vmem:[#allocation8 + $0x168] sm:$0xf0] }
 0x329   :  { %6440 = vmatpush.bf16.msra.mxu0 %v9858_v0  ;;  %6011 = vmatmul.bf16.vlgmr.msrb.gmra.mxu1 %v11328_v2  ;;  %v9834_v2 = vor.u32 %v10896_v54, %v9833_v52  ;;  %v9962_v17 = vor.u32 %v10928_v56, %v9961_v61  ;;  %v10906_v0 = vld [vmem:[#allocation8 + $0x94] sm:$0xf0]  ;;  %v6042_v52 = vmax.f32 %v11365_v42, 0.0  ;;  %v6043_v54 = vmax.f32 %v11406_v29, 0.0 }
 0x32a   :  { %6453 = vmatpush.bf16.msra.mxu1 %v9922_v16  ;;  %6024 = vmatmul.bf16.vlgmr.msrb.gmra.mxu2 %v11326_v1  ;;  %v9898_v1 = vor.u32 %v10912_v55, %v9897_v18  ;;  %v9937_v16 = vld [vmem:[#allocation8 + $0x110] sm:$0xf]  ;;  %v9874_v38 = vor.u32 %v10906_v0, %v9873_v11  ;;  %v6044_v61 = vmax.f32 %v11447_v50, 0.0  ;;  %v9862_v56 = vor.u32 %v10901_v4, %v9859_v46  ;;  %v10893_v11 = vld [vmem:[#allocation8 + $0x34] sm:$0xf] }
 0x32b   :  { %6466 = vmatpush.bf16.msra.mxu2 %v9986_v21  ;;  %6037 = vmatmul.bf16.vlgmr.msrb.gmra.mxu3 %v11330_v5  ;;  %v9825_v5 = vld [vmem:[#allocation8 + $0x30] sm:$0xf]  ;;  %v10922_v21 = vld [vmem:[#allocation8 + $0x114] sm:$0xf0]  ;;  %v11465_v44 = vpack.c.bf16 %v6042_v52, %v6042_v52  ;;  %v11467_v42 = vpack.c.bf16 %v6043_v54, %v6043_v54  ;;  %v9982_v27 = vor.u32 %v10931_v43, %v9979_v23  ;;  %v9827_v0 = vld [vmem:[#allocation8 + $0x38] sm:$0xf0] }
 0x32c   :  { %v9826_v59 = vor.u32 %v10894_v22, %v9825_v5  ;;  %v9938_v30 = vor.u32 %v10922_v21, %v9937_v16  ;;  %v10915_v5 = vld [vmem:[#allocation8 + $0xe4] sm:$0xf]  ;;  %v9915_v22 = vld [vmem:[#allocation8 + $0xe8] sm:$0xf0]  ;;  %v11469_v29 = vpack.c.bf16 %v6044_v61, %v6044_v61  ;;  %v10909_v16 = vld [vmem:[#allocation8 + $0xb4] sm:$0xf] }
 0x32d   :  { %6441 = vmatpush.bf16.msra.mxu0 %v9850_v3  ;;  %v5817_v20 = vpop.f32.mrf.mxu2  ;;  %v5793_v53 = vpop.f32.mrf.mxu0  ;;  %v10904_v3 = vld [vmem:[#allocation8 + $0x84] sm:$0xf0]  ;;  %v9918_v13 = vor.u32 %v10915_v5, %v9915_v22  ;;  %v9891_v21 = vld [vmem:[#allocation8 + $0xb8] sm:$0xf0]  ;;  %v10923_v4 = vld [vmem:[#allocation8 + $0x124] sm:$0xf] }
 0x32e   :  { %6454 = vmatpush.bf16.msra.mxu1 %v9914_v34  ;;  %v5818_v9 = vadd.f32 %v5817_v20, %v5805_v8  ;;  %v5830_v40 = vpop.f32.mrf.mxu3  ;;  %v5806_v14 = vpop.f32.mrf.mxu1  ;;  %v9866_v18 = vor.u32 %v10904_v3, %v9865_v35  ;;  %v9843_v8 = vld [vmem:[#allocation8 + $0x58] sm:$0xf0]  ;;  %v10895_v20 = vld [vmem:[#allocation8 + $0x44] sm:$0xf]  ;;  %v10905_v61 = vld [vmem:[#allocation8 + $0x94] sm:$0xf] }
 0x32f   :  { %6467 = vmatpush.bf16.msra.mxu2 %v9978_v39  ;;  %v9929_v39 = vld [vmem:[#allocation8 + $0x100] sm:$0xf]  ;;  %v9846_v32 = vor.u32 %v10897_v24, %v9843_v8  ;;  %v10891_v35 = vld [vmem:[#allocation8 + $0x24] sm:$0xf]  ;;  %v9803_v43 = vld [vmem:[#allocation8 + $0x8] sm:$0xf0] }
 0x330   :  { %v11460_v15 = vadd.f32 %v5830_v40, %v5818_v9  ;;  %v9930_v55 = vor.u32 %v10920_v41, %v9929_v39  ;;  %v9899_v9 = vld [vmem:[#allocation8 + $0xc8] sm:$0xf0]  ;;  %v10927_v40 = vld [vmem:[#allocation8 + $0x144] sm:$0xf] }
 0x331   :  { %6442 = vmatpush.bf16.msra.mxu0 %v9842_v12  ;;  %v9802_v12 = vor.u32 %v10888_v33, %v9801_v58  ;;  %v9902_v51 = vor.u32 %v10911_v26, %v9899_v9  ;;  %v10925_v58 = vld [vmem:[#allocation8 + $0x134] sm:$0xf]  ;;  %v9894_v33 = vor.u32 %v10909_v16, %v9891_v21  ;;  %v9883_v39 = vld [vmem:[#allocation8 + $0xa8] sm:$0xf0]  ;;  %v10887_v5 = vld [vmem:[#allocation8 + $0x4] sm:$0xf] }
 0x332   :  { %6455 = vmatpush.bf16.msra.mxu1 %v9906_v48  ;;  %v10933_v48 = vld [vmem:[#allocation8 + $0x174] sm:$0xf]  ;;  %v10903_v23 = vld [vmem:[#allocation8 + $0x84] sm:$0xf]  ;;  %v9931_v24 = vld [vmem:[#allocation8 + $0x108] sm:$0xf0] }
 0x333   :  { %6468 = vmatpush.bf16.msra.mxu2 %v9970_v49  ;;  %v9987_v49 = vld [vmem:[#allocation8 + $0x178] sm:$0xf0]  ;;  %v10948_v26 = vld [vmem:[#allocation8 + $0x1e4] sm:$0xf0]  ;;  %v10009_v16 = vld [vmem:[#allocation8 + $0x1a0] sm:$0xf] }
 0x334   :  { %v10940_v21 = vld [vmem:[#allocation8 + $0x1a4] sm:$0xf0] }
 0x335   :  { %6443 = vmatpush.bf16.msra.mxu0 %v9834_v2  ;;  %v5819_v34 = vpop.f32.mrf.mxu2  ;;  %v9926_v2 = vor.u32 %v10917_v37, %v9923_v47 }
 0x336   :  { %6456 = vmatpush.bf16.msra.mxu1 %v9898_v1  ;;  %v5832_v45 = vpop.f32.mrf.mxu3  ;;  %v9990_v1 = vor.u32 %v10933_v48, %v9987_v49  ;;  %v10907_v34 = vld [vmem:[#allocation8 + $0xa4] sm:$0xf]  ;;  %v10889_v49 = vld [vmem:[#allocation8 + $0x14] sm:$0xf] }
 0x337   :  { %6469 = vmatpush.bf16.msra.mxu2 %v9962_v17  ;;  %v9851_v17 = vld [vmem:[#allocation8 + $0x68] sm:$0xf0]  ;;  %v9886_v48 = vor.u32 %v10907_v34, %v9883_v39  ;;  %v10949_v39 = vld [vmem:[#allocation8 + $0x1f4] sm:$0xf] }
 0x338   :  { %v9854_v50 = vor.u32 %v10899_v10, %v9851_v17  ;;  %v9947_v45 = vld [vmem:[#allocation8 + $0x128] sm:$0xf0]  ;;  %v9939_v10 = vld [vmem:[#allocation8 + $0x118] sm:$0xf0] }
 0x339   :  { %6444 = vmatpush.bf16.msra.mxu0 %v9826_v59  ;;  %v10913_v59 = vld [vmem:[#allocation8 + $0xd4] sm:$0xf] }
 0x33a   :  { %6457 = vmatpush.bf16.msra.mxu1 %v9890_v57  ;;  %v9907_v57 = vld [vmem:[#allocation8 + $0xd8] sm:$0xf0] }
 0x33b   :  { %6470 = vmatpush.bf16.msra.mxu2 %v9954_v31  ;;  %v10929_v31 = vld [vmem:[#allocation8 + $0x154] sm:$0xf]  ;;  %v9910_v60 = vor.u32 %v10913_v59, %v9907_v57  ;;  %v9806_v59 = vor.u32 %v10887_v5, %v9803_v43  ;;  %v10019_v43 = vld [vmem:[#allocation8 + $0x1b8] sm:$0xf0] }
 0x33c   :  { %v9974_v36 = vor.u32 %v10929_v31, %v9971_v19  ;;  %v10049_v19 = vld [vmem:[#allocation8 + $0x1f0] sm:$0xf] }
 0x33d   :  { %6445 = vmatpush.bf16.msra.mxu0 %v9818_v63  ;;  %v9963_v63 = vld [vmem:[#allocation8 + $0x148] sm:$0xf0] }
 0x33e   :  { %6458 = vmatpush.bf16.msra.mxu1 %v9882_v25  ;;  %v9966_v14 = vor.u32 %v10927_v40, %v9963_v63  ;;  %v10033_v40 = vld [vmem:[#allocation8 + $0x1d0] sm:$0xf]  ;;  %v10946_v63 = vld [vmem:[#allocation8 + $0x1d4] sm:$0xf0] }
 0x33f   :  { %6471 = vmatpush.bf16.msra.mxu2 %v9946_v6  ;;  %v9838_v6 = vor.u32 %v10895_v20, %v9835_v62  ;;  %v10041_v62 = vld [vmem:[#allocation8 + $0x1e0] sm:$0xf] }
 0x340   :  { %v10042_v9 = vor.u32 %v10948_v26, %v10041_v62 }
 0x341   :  { %6446 = vmatpush.bf16.msra.mxu0 %v9810_v28 }
 0x342   :  { %6459 = vmatpush.bf16.msra.mxu1 %v9874_v38  ;;  %v9955_v38 = vld [vmem:[#allocation8 + $0x138] sm:$0xf0] }
 0x343   :  { %6472 = vmatpush.bf16.msra.mxu2 %v9938_v30  ;;  %v9830_v30 = vor.u32 %v10893_v11, %v9827_v0  ;;  %v9958_v3 = vor.u32 %v10925_v58, %v9955_v38  ;;  %v10017_v11 = vld [vmem:[#allocation8 + $0x1b0] sm:$0xf]  ;;  %v10010_v38 = vor.u32 %v10940_v21, %v10009_v16  ;;  %v6114_v21 = vld [vmem:[#allocation10] sm:$0x3] }
 0x345   :  { %6447 = vmatpush.bf16.msra.mxu0 %v9802_v12  ;;  %v5843_v53 = vpop.f32.mrf.mxu0 }
 0x346   :  { %6460 = vmatpush.bf16.msra.mxu1 %v9866_v18  ;;  %v5844_v25 = vadd.f32 %v5843_v53, %v11460_v15  ;;  %v5856_v7 = vpop.f32.mrf.mxu1  ;;  %v9819_v15 = vld [vmem:[#allocation8 + $0x28] sm:$0xf0]  ;;  %v9950_v18 = vor.u32 %v10923_v4, %v9947_v45 }
 0x347   :  { %6473 = vmatpush.bf16.msra.mxu2 %v9930_v55  ;;  %v9822_v12 = vor.u32 %v10891_v35, %v9819_v15  ;;  %v9811_v55 = vld [vmem:[#allocation8 + $0x18] sm:$0xf0]  ;;  %v10936_v15 = vld [vmem:[#allocation8 + $0x184] sm:$0xf0] }
 0x348   :  { %6448 = vmatmul.bf16.vlgmr.msra.gmra.mxu0 %v11465_v44  ;;  %v5857_v28 = vadd.f32 %v5856_v7, %v5844_v25  ;;  %v10034_v25 = vor.u32 %v10946_v63, %v10033_v40 }
 0x349   :  { %6492 = vmatpush.bf16.msrb.mxu0 %v9862_v56  ;;  %6461 = vmatmul.bf16.vlgmr.msra.gmra.mxu1 %v11467_v42  ;;  %v9875_v56 = vld [vmem:[#allocation8 + $0x98] sm:$0xf0] }
 0x34a   :  { %6505 = vmatpush.bf16.msrb.mxu1 %v9926_v2  ;;  %6474 = vmatmul.bf16.vlgmr.msra.gmra.mxu2 %v11469_v29  ;;  %v10921_v2 = vld [vmem:[#allocation8 + $0x114] sm:$0xf]  ;;  %v9878_v17 = vor.u32 %v10905_v61, %v9875_v56 }
 0x34b   :  { %6518 = vmatpush.bf16.msrb.mxu2 %v9990_v1  ;;  %v9814_v1 = vor.u32 %v10889_v49, %v9811_v55  ;;  %v9942_v22 = vor.u32 %v10921_v2, %v9939_v10  ;;  %v10035_v49 = vld [vmem:[#allocation8 + $0x1d8] sm:$0xf0]  ;;  %v10943_v10 = vld [vmem:[#allocation8 + $0x1c4] sm:$0xf] }
 0x34d   :  { %6493 = vmatpush.bf16.msrb.mxu0 %v9854_v50  ;;  %v5869_v41 = vpop.f32.mrf.mxu2  ;;  %v5845_v47 = vpop.f32.mrf.mxu0  ;;  %v9867_v50 = vld [vmem:[#allocation8 + $0x88] sm:$0xf0] }
 0x34e   :  { %6506 = vmatpush.bf16.msrb.mxu1 %v9918_v13  ;;  %v5870_v46 = vadd.f32 %v5869_v41, %v5857_v28  ;;  %v5882_v37 = vpop.f32.mrf.mxu3  ;;  %v5858_v52 = vpop.f32.mrf.mxu1  ;;  %v10919_v13 = vld [vmem:[#allocation8 + $0x104] sm:$0xf]  ;;  %v9870_v57 = vor.u32 %v10903_v23, %v9867_v50  ;;  %v10051_v41 = vld [vmem:[#allocation8 + $0x1f8] sm:$0xf0]  ;;  %v10043_v47 = vld [vmem:[#allocation8 + $0x1e8] sm:$0xf0] }
 0x34f   :  { %6519 = vmatpush.bf16.msrb.mxu2 %v9982_v27  ;;  %v9934_v31 = vor.u32 %v10919_v13, %v9931_v24  ;;  %v10054_v4 = vor.u32 %v10949_v39, %v10051_v41  ;;  %v10939_v13 = vld [vmem:[#allocation8 + $0x1a4] sm:$0xf]  ;;  %v10011_v24 = vld [vmem:[#allocation8 + $0x1a8] sm:$0xf0]  ;;  %v10958_v39 = vld [vmem:[#allocation11 + $0x38] sm:$0xff] }
 0x350   :  { %v11475_v54 = vadd.f32 %v5882_v37, %v5870_v46  ;;  %v10947_v37 = vld [vmem:[#allocation8 + $0x1e4] sm:$0xf]  ;;  %v10966_v41 = vld [vmem:[#allocation11 + $0x78] sm:$0xff] }
 0x351   :  { %6494 = vmatpush.bf16.msrb.mxu0 %v9846_v32  ;;  %v10950_v32 = vld [vmem:[#allocation8 + $0x1f4] sm:$0xf0] }
 0x352   :  { %6507 = vmatpush.bf16.msrb.mxu1 %v9910_v60  ;;  %v10050_v60 = vor.u32 %v10950_v32, %v10049_v19 }
 0x353   :  { %6520 = vmatpush.bf16.msrb.mxu2 %v9974_v36 }
 0x354   :  { %6479 = vmatpush.bf16.msra.mxu3 %v10050_v60  ;;  %v10935_v60 = vld [vmem:[#allocation8 + $0x184] sm:$0xf] }
 0x355   :  { %6495 = vmatpush.bf16.msrb.mxu0 %v9838_v6  ;;  %v5871_v27 = vpop.f32.mrf.mxu2 }
 0x356   :  { %6508 = vmatpush.bf16.msrb.mxu1 %v9902_v51  ;;  %v5884_v8 = vpop.f32.mrf.mxu3  ;;  %v10025_v51 = vld [vmem:[#allocation8 + $0x1c0] sm:$0xf] }
 0x357   :  { %6521 = vmatpush.bf16.msrb.mxu2 %v9966_v14  ;;  %v10942_v14 = vld [vmem:[#allocation8 + $0x1b4] sm:$0xf0] }
 0x358   :  { %6480 = vmatpush.bf16.msra.mxu3 %v10042_v9  ;;  %v10018_v0 = vor.u32 %v10942_v14, %v10017_v11 }
 0x359   :  { %6496 = vmatpush.bf16.msrb.mxu0 %v9830_v30  ;;  %v10001_v30 = vld [vmem:[#allocation8 + $0x190] sm:$0xf] }
 0x35a   :  { %6509 = vmatpush.bf16.msrb.mxu1 %v9894_v33  ;;  %v10938_v33 = vld [vmem:[#allocation8 + $0x194] sm:$0xf0] }
 0x35b   :  { %6522 = vmatpush.bf16.msrb.mxu2 %v9958_v3  ;;  %v10002_v35 = vor.u32 %v10938_v33, %v10001_v30  ;;  %v9993_v3 = vld [vmem:[#allocation8 + $0x180] sm:$0xf] }
 0x35c   :  { %6481 = vmatpush.bf16.msra.mxu3 %v10034_v25  ;;  %v9994_v34 = vor.u32 %v10936_v15, %v9993_v3 }
 0x35d   :  { %6497 = vmatpush.bf16.msrb.mxu0 %v9822_v12  ;;  %v10046_v12 = vor.u32 %v10947_v37, %v10043_v47  ;;  %v10956_v37 = vld [vmem:[#allocation11 + $0x28] sm:$0xff]  ;;  %v10955_v47 = vld [vmem:[#allocation11 + $0x20] sm:$0xff] }
 0x35e   :  { %6510 = vmatpush.bf16.msrb.mxu1 %v9886_v48  ;;  %v10945_v48 = vld [vmem:[#allocation8 + $0x1d4] sm:$0xf] }
 0x35f   :  { %6523 = vmatpush.bf16.msrb.mxu2 %v9950_v18  ;;  %v10038_v52 = vor.u32 %v10945_v48, %v10035_v49  ;;  %v10954_v48 = vld [vmem:[#allocation11 + $0x18] sm:$0xff] }
 0x361   :  { %6498 = vmatpush.bf16.msrb.mxu0 %v9814_v1  ;;  %v10027_v1 = vld [vmem:[#allocation8 + $0x1c8] sm:$0xf0] }
 0x362   :  { %6511 = vmatpush.bf16.msrb.mxu1 %v9878_v17  ;;  %v10030_v17 = vor.u32 %v10943_v10, %v10027_v1 }
 0x363   :  { %6524 = vmatpush.bf16.msrb.mxu2 %v9942_v22  ;;  %v10941_v22 = vld [vmem:[#allocation8 + $0x1b4] sm:$0xf] }
 0x364   :  { %v10022_v50 = vor.u32 %v10941_v22, %v10019_v43  ;;  %v10964_v22 = vld [vmem:[#allocation11 + $0x68] sm:$0xff]  ;;  %v10951_v43 = vld [vmem:[#allocation11] sm:$0xff] }
 0x365   :  { %6499 = vmatpush.bf16.msrb.mxu0 %v9806_v59  ;;  %v5895_v20 = vpop.f32.mrf.mxu0  ;;  %v10014_v59 = vor.u32 %v10939_v13, %v10011_v24  ;;  %v10961_v13 = vld [vmem:[#allocation11 + $0x50] sm:$0xff]  ;;  %v10960_v24 = vld [vmem:[#allocation11 + $0x48] sm:$0xff] }
 0x366   :  { %6512 = vmatpush.bf16.msrb.mxu1 %v9870_v57  ;;  %v5908_v36 = vpop.f32.mrf.mxu1  ;;  %v5896_v55 = vadd.f32 %v5895_v20, %v11475_v54  ;;  %v10937_v54 = vld [vmem:[#allocation8 + $0x194] sm:$0xf]  ;;  %v10003_v57 = vld [vmem:[#allocation8 + $0x198] sm:$0xf0]  ;;  %v9995_v20 = vld [vmem:[#allocation8 + $0x188] sm:$0xf0] }
 0x367   :  { %6525 = vmatpush.bf16.msrb.mxu2 %v9934_v31  ;;  %v10006_v32 = vor.u32 %v10937_v54, %v10003_v57  ;;  %v9998_v62 = vor.u32 %v10935_v60, %v9995_v20 }
 0x368   :  { %6500 = vmatmul.bf16.vlgmr.msrb.gmra.mxu0 %v11465_v44  ;;  %v5909_v5 = vadd.f32 %v5908_v36, %v5896_v55  ;;  %v10953_v55 = vld [vmem:[#allocation11 + $0x10] sm:$0xff] }
 0x369   :  { %6513 = vmatmul.bf16.vlgmr.msrb.gmra.mxu1 %v11467_v42  ;;  %v10944_v42 = vld [vmem:[#allocation8 + $0x1c4] sm:$0xf0]  ;;  %6680 = vmatpush.bf16.msra.mxu0 %v10958_v39 }
 0x36a   :  { %6526 = vmatmul.bf16.vlgmr.msrb.gmra.mxu2 %v11469_v29  ;;  %v10026_v29 = vor.u32 %v10944_v42, %v10025_v51  ;;  %6693 = vmatpush.bf16.msra.mxu1 %v10966_v41 }
 0x36c   :  { %6482 = vmatpush.bf16.msra.mxu3 %v10026_v29 }
 0x36d   :  { %v5921_v53 = vpop.f32.mrf.mxu2  ;;  %v5897_v44 = vpop.f32.mrf.mxu0 }
 0x36e   :  { %v5934_v6 = vpop.f32.mrf.mxu3  ;;  %v5910_v7 = vpop.f32.mrf.mxu1  ;;  %v5922_v23 = vadd.f32 %v5921_v53, %v5909_v5  ;;  %v10952_v5 = vld [vmem:[#allocation11 + $0x8] sm:$0xff] }
 0x370   :  { %6483 = vmatpush.bf16.msra.mxu3 %v10018_v0  ;;  %v5935_v31 = vadd.f32 %v5934_v6, %v5922_v23  ;;  %v10963_v23 = vld [vmem:[#allocation11 + $0x60] sm:$0xff] }
 0x374   :  { %6484 = vmatpush.bf16.msra.mxu3 %v10010_v38 }
 0x375   :  { %v5923_v28 = vpop.f32.mrf.mxu2 }
 0x376   :  { %v5936_v58 = vpop.f32.mrf.mxu3  ;;  %v6116_v28 = vperm.slane %v6114_v21, 0 }
 0x378   :  { %6485 = vmatpush.bf16.msra.mxu3 %v10002_v35 }
 0x37c   :  { %6486 = vmatpush.bf16.msra.mxu3 %v9994_v34 }
 0x380   :  { %6531 = vmatpush.bf16.msrb.mxu3 %v10054_v4 }
 0x384   :  { %6532 = vmatpush.bf16.msrb.mxu3 %v10046_v12  ;;  %v6117_v12 = vperm.slane %v6114_v21, 1 }
 0x385   :  { %v5947_v45 = vpop.f32.mrf.mxu0 }
 0x386   :  { %v5960_v46 = vpop.f32.mrf.mxu1  ;;  %v5948_v19 = vadd.f32 %v5947_v45, %v5935_v31  ;;  %v10957_v45 = vld [vmem:[#allocation11 + $0x30] sm:$0xff] }
 0x387   :  { %6681 = vmatpush.bf16.msra.mxu0 %v10957_v45 }
 0x388   :  { %6533 = vmatpush.bf16.msrb.mxu3 %v10038_v52  ;;  %v5961_v36 = vadd.f32 %v5960_v46, %v5948_v19  ;;  %v10965_v46 = vld [vmem:[#allocation11 + $0x70] sm:$0xff] }
 0x389   :  { %6694 = vmatpush.bf16.msra.mxu1 %v10965_v46 }
 0x38b   :  { %6682 = vmatpush.bf16.msra.mxu0 %v10956_v37 }
 0x38c   :  { %6534 = vmatpush.bf16.msrb.mxu3 %v10030_v17 }
 0x38d   :  { %v5973_v18 = vpop.f32.mrf.mxu2  ;;  %v5949_v56 = vpop.f32.mrf.mxu0  ;;  %6695 = vmatpush.bf16.msra.mxu1 %v10964_v22 }
 0x38e   :  { %v5986_v61 = vpop.f32.mrf.mxu3  ;;  %v5962_v2 = vpop.f32.mrf.mxu1  ;;  %v5974_v26 = vadd.f32 %v5973_v18, %v5961_v36 }
 0x38f   :  { %6683 = vmatpush.bf16.msra.mxu0 %v10955_v47 }
 0x390   :  { %6535 = vmatpush.bf16.msrb.mxu3 %v10022_v50  ;;  %v5987_v9 = vadd.f32 %v5986_v61, %v5974_v26  ;;  %v10962_v50 = vld [vmem:[#allocation11 + $0x58] sm:$0xff] }
 0x391   :  { %6696 = vmatpush.bf16.msra.mxu1 %v10963_v23 }
 0x393   :  { %6684 = vmatpush.bf16.msra.mxu0 %v10954_v48 }
 0x394   :  { %6536 = vmatpush.bf16.msrb.mxu3 %v10014_v59 }
 0x395   :  { %v5975_v27 = vpop.f32.mrf.mxu2  ;;  %6697 = vmatpush.bf16.msra.mxu1 %v10962_v50 }
 0x396   :  { %v5988_v8 = vpop.f32.mrf.mxu3  ;;  %v10959_v27 = vld [vmem:[#allocation11 + $0x40] sm:$0xff] }
 0x397   :  { %6685 = vmatpush.bf16.msra.mxu0 %v10953_v55 }
 0x398   :  { %6537 = vmatpush.bf16.msrb.mxu3 %v10006_v32 }
 0x399   :  { %6698 = vmatpush.bf16.msra.mxu1 %v10961_v13 }
 0x39b   :  { %6686 = vmatpush.bf16.msra.mxu0 %v10952_v5 }
 0x39c   :  { %6538 = vmatpush.bf16.msrb.mxu3 %v9998_v62 }
 0x39d   :  { %6699 = vmatpush.bf16.msra.mxu1 %v10960_v24 }
 0x39f   :  { %6687 = vmatpush.bf16.msra.mxu0 %v10951_v43 }
 0x3a1   :  { %6700 = vmatpush.bf16.msra.mxu1 %v10959_v27 }
 0x3a5   :  { %v5999_v40 = vpop.f32.mrf.mxu0 }
 0x3a6   :  { %v6012_v63 = vpop.f32.mrf.mxu1  ;;  %v6000_v53 = vadd.f32 %v5999_v40, %v5987_v9  ;;  %v10981_v9 = vld [vmem:[#allocation13] ss:$0 sm:$0xff] }
 0x3a8   :  { %v6013_v25 = vadd.f32 %v6012_v63, %v6000_v53 }
 0x3ad   :  { %v6025_v44 = vpop.f32.mrf.mxu2  ;;  %v6001_v7 = vpop.f32.mrf.mxu0 }
 0x3ae   :  { %v6038_v51 = vpop.f32.mrf.mxu3  ;;  %v6026_v42 = vadd.f32 %v6025_v44, %v6013_v25  ;;  %v6014_v6 = vpop.f32.mrf.mxu1 }
 0x3b0   :  { %v6039_v29 = vadd.f32 %v6038_v51, %v6026_v42 }
 0x3b2   :  { %v6045_v11 = vmax.f32 %v6039_v29, 0.0 }
 0x3b4   :  { %v6049_v14 = vpack.c.bf16 %v6045_v11, %v6045_v11 }
 0x3b5   :  { %v6027_v0 = vpop.f32.mrf.mxu2 }
 0x3b6   :  { %v6040_v16 = vpop.f32.mrf.mxu3  ;;  %6487 = vmatmul.bf16.vlgmr.msra.gmra.mxu3 %v6049_v14 }
 0x3c5   :  { %v6449_v58 = vpop.f32.mrf.mxu0 }
 0x3c6   :  { %v6450_v38 = vadd.f32 %v6449_v58, %v6116_v28  ;;  %v6462_v30 = vpop.f32.mrf.mxu1  ;;  %6539 = vmatmul.bf16.vlgmr.msrb.gmra.mxu3 %v6049_v14 }
 0x3c8   :  { %v6463_v33 = vadd.f32 %v6462_v30, %v6450_v38 }
 0x3cd   :  { %v6475_v35 = vpop.f32.mrf.mxu2  ;;  %v6451_v15 = vpop.f32.mrf.mxu0 }
 0x3ce   :  { %v6476_v3 = vadd.f32 %v6475_v35, %v6463_v33  ;;  %v6464_v34 = vpop.f32.mrf.mxu1 }
 0x3d5   :  { %v6477_v4 = vpop.f32.mrf.mxu2 }
 0x3e5   :  { %v6501_v49 = vpop.f32.mrf.mxu0 }
 0x3e6   :  { %v6514_v52 = vpop.f32.mrf.mxu1  ;;  %v6502_v18 = vadd.f32 %v6501_v49, %v6117_v12 }
 0x3e8   :  { %v6515_v61 = vadd.f32 %v6514_v52, %v6502_v18 }
 0x3ed   :  { %v6527_v56 = vpop.f32.mrf.mxu2  ;;  %v6503_v10 = vpop.f32.mrf.mxu0 }
 0x3ee   :  { %v6528_v2 = vadd.f32 %v6527_v56, %v6515_v61  ;;  %v6516_v1 = vpop.f32.mrf.mxu1 }
 0x3f5   :  { %v6529_v17 = vpop.f32.mrf.mxu2 }
 0x439   :  { %v6488_v8 = vpop.f32.mrf.mxu3 }
 0x43a   :  { %v6489_v59 = vadd.f32 %v6488_v8, %v6476_v3 }
 0x43c   :  { %v6544_v54 = vmax.f32 %v6489_v59, 0.0 }
 0x43e   :  { %v6546_v57 = vpack.c.bf16 %v6544_v54, %v6544_v54 }
 0x440   :  { %6688 = vmatmul.bf16.vlgmr.msra.gmra.mxu0 %v6546_v57 }
 0x441   :  { %v6490_v31 = vpop.f32.mrf.mxu3 }
 0x449   :  { %v6540_v19 = vpop.f32.mrf.mxu3 }
 0x44a   :  { %v6541_v32 = vadd.f32 %v6540_v19, %v6528_v2 }
 0x44c   :  { %v6545_v60 = vmax.f32 %v6541_v32, 0.0 }
 0x44e   :  { %v6547_v20 = vpack.c.bf16 %v6545_v60, %v6545_v60 }
 0x450   :  { %6701 = vmatmul.bf16.vlgmr.msra.gmra.mxu1 %v6547_v20 }
 0x451   :  { %v6542_v36 = vpop.f32.mrf.mxu3 }
 0x4bd   :  { %v6689_v62 = vpop.f32.mrf.mxu0 }
 0x4be   :  { %v6690_v40 = vadd.f32 %v10981_v9, %v6689_v62 }
 0x4c5   :  { %v6691_v26 = vpop.f32.mrf.mxu0 }
 0x4cd   :  { %v6702_v63 = vpop.f32.mrf.mxu1 }
 0x4ce   :  { %v6703_v53 = vadd.f32 %v6702_v63, %v6690_v40 }
 0x4d0   :  { %6706 = vst [vmem:[#allocation14] sm:$0xff] %v6703_v53 }
 0x4d1   :  { %6717 = dma.vmem_to_hbm [thread:$0]  %s6713_s6, 128, %s6715_s15, [#allocation4]  }
 0x4d5   :  { %v6704_v25 = vpop.f32.mrf.mxu1 }
 0x4d6   :  { %11185 = dma.done.wait [#allocation4], 128  }
 0x4d7   :  { %11186 = vsyncadd [#allocation4], 4294967168 }
 0x4d8   :  { %6722 = vsyncpa [#allocation3], 1 }
 0x4d9   :  { %6723 = vsyncpa [#allocation6], 1 }
 0x4da   :  { %6724 = vsyncpa [#allocation9], 1 }
 0x4db   :  { %6725 = vsyncpa [#allocation12], 1 }
 0x4dc   :  { %6726 = vsyncpa [#allocation4], 1 }

</bundles_post_ra>
